<compile_context>
chip_gen: v7x
topology: tpu7x:2x2x1
jax: 0.10.0
libtpu: 0.0.40
codegen_flags: <defaults>
</compile_context>

<pallas_src>
import jax
import jax.numpy as jnp
from jax import lax
from jax.experimental import pallas as pl
from jax.experimental.pallas import tpu as pltpu

LANE = 128
SUBLANE = 8


def _round_up(x, m):
    return (x + m - 1) // m * m


def basic_block_kernel(x_ref, w1_ref, b1_ref, w2_ref, b2_ref, o_ref, pad_scr):
    H, W, Cp = x_ref.shape          # lane-padded channels (multiple of 128)
    Cr = w1_ref.shape[1]            # real contraction width (C rounded to 8)
    W2p = pad_scr.shape[1]          # sublane-friendly padded width
    M = H * W

    # Zero only the 1-pixel border of the padded scratch; the interior is
    # fully overwritten below.  Done every step so a "parallel" batch axis
    # (megacore sharding) stays correct — each core has its own scratch.
    zrow = jnp.zeros((1, W2p, Cp), jnp.float32)
    zcol = jnp.zeros((H, 1, Cp), jnp.float32)
    pad_scr[0:1, :, :] = zrow
    pad_scr[H + 1:H + 2, :, :] = zrow
    pad_scr[1:H + 1, 0:1, :] = zcol
    pad_scr[1:H + 1, W + 1:W + 2, :] = zcol

    def conv3x3(w_ref):
        # 9 accumulating MXU dots (one per tap) instead of an im2col concat:
        # no (M, 9*Cp) buffer, and the contraction runs only over the Cr real
        # input channels (K = Cr), not the 128-padded Cp.  The window is read
        # lane-dense from the scratch and then prefix-sliced to Cr; operands
        # are cast to bf16 at the dot (native MXU rate), accumulation is f32.
        acc = jnp.zeros((M, Cp), jnp.float32)
        for kh in range(3):
            for kw in range(3):
                t = kh * 3 + kw
                slab = pad_scr[kh:kh + H, kw:kw + W, :].reshape(M, Cp)[:, :Cr]
                acc = acc + jnp.dot(slab.astype(jnp.bfloat16), w_ref[t],
                                    preferred_element_type=jnp.float32)
        return acc

    # ---- conv1 (BN1 scale folded into w1) + bias + relu ----
    # x is not kept live across the convs; re-read from x_ref for the residual.
    pad_scr[1:H + 1, 1:W + 1, :] = x_ref[...]
    out1 = jnp.maximum(conv3x3(w1_ref) + b1_ref[...], 0.0)

    # ---- conv2 (BN2 scale folded) + bias + residual + relu ----
    pad_scr[1:H + 1, 1:W + 1, :] = out1.reshape(H, W, Cp)
    out2 = conv3x3(w2_ref) + b2_ref[...]
    o_ref[...] = jnp.maximum(out2.reshape(H, W, Cp) + x_ref[...],
                             0.0).astype(o_ref.dtype)


def basic_block(x_nhwc, w1, g1, be1, m1, v1, w2, g2, be2, m2, v2, eps=1e-5):
    """x_nhwc: (N,H,W,C); w: (3,3,Cin,Cout) HWIO; BN params: (C,) each."""
    N, H, W, C = x_nhwc.shape
    Cp = _round_up(C, LANE)        # lane-padded output channels
    Cr = _round_up(C, SUBLANE)     # contraction width (sublane-rounded)
    W2p = _round_up(W + 2, SUBLANE)

    # Fold eval-mode BatchNorm into the conv: scale goes into the weights
    # (conv is linear), leaving only a per-channel bias for the kernel.
    def fold(w, gamma, beta, mean, var):
        scale = gamma / jnp.sqrt(var + eps)                # (Cout,)
        return w * scale[None, None, None, :], beta - mean * scale

    w1f, b1f = fold(w1, g1, be1, m1, v1)
    w2f, b2f = fold(w2, g2, be2, m2, v2)

    # Weights: (3,3,C,C) -> (9, Cr, Cp) bf16.  Input-channel dim padded only
    # to a sublane multiple (no 128 zero-padding of K), output channels
    # lane-padded to 128.  Zero padding is exact through conv/bias/relu.
    def prep_w(wf):
        wp = jnp.pad(wf, ((0, 0), (0, 0), (0, Cr - C), (0, Cp - C)))
        return wp.reshape(9, Cr, Cp).astype(jnp.bfloat16)

    w1p, w2p = prep_w(w1f), prep_w(w2f)
    b1p = jnp.pad(b1f, ((0, Cp - C),)).reshape(1, Cp).astype(jnp.float32)
    b2p = jnp.pad(b2f, ((0, Cp - C),)).reshape(1, Cp).astype(jnp.float32)

    # Lane-dense activations (padded channels stay exactly 0 through
    # conv/bias/relu/residual and are sliced off at the end).
    xp = jnp.pad(x_nhwc, ((0, 0), (0, 0), (0, 0), (0, Cp - C)))

    def make_call(weight_mode):
        def const_spec(shape):
            index_map = lambda b: (0,) * len(shape)
            if weight_mode is None:
                return pl.BlockSpec(shape, index_map)
            return pl.BlockSpec(shape, index_map, pipeline_mode=weight_mode)

        return pl.pallas_call(
            basic_block_kernel,
            out_shape=jax.ShapeDtypeStruct((N, H, W, Cp), x_nhwc.dtype),
            grid_spec=pltpu.PrefetchScalarGridSpec(
                num_scalar_prefetch=0,
                grid=(N,),
                in_specs=[
                    pl.BlockSpec((None, H, W, Cp), lambda b: (b, 0, 0, 0)),
                    const_spec((9, Cr, Cp)),   # w1 (grid-invariant)
                    const_spec((1, Cp)),       # b1
                    const_spec((9, Cr, Cp)),   # w2
                    const_spec((1, Cp)),       # b2
                ],
                out_specs=pl.BlockSpec((None, H, W, Cp), lambda b: (b, 0, 0, 0)),
                scratch_shapes=[pltpu.VMEM((H + 2, W2p, Cp), jnp.float32)],
            ),
            compiler_params=pltpu.CompilerParams(
                dimension_semantics=("parallel",)),
        )

    try:
        # Single-buffer the grid-invariant weights/biases (their index_map is
        # constant, so default double-buffering would only waste VMEM).
        out_p = make_call(pl.Buffered(buffer_count=1))(xp, w1p, b1p, w2p, b2p)
    except Exception:
        # jax build without per-BlockSpec pipeline_mode support: fall back to
        # default double-buffering (identical results, slightly more VMEM).
        out_p = make_call(None)(xp, w1p, b1p, w2p, b2p)

    return out_p[..., :C]


def reference(x_nhwc, w1, g1, be1, m1, v1, w2, g2, be2, m2, v2, eps=1e-5):
    """Pure-JAX f32 reference (XLA convs + explicit eval-mode BN)."""
    def conv(x, w):
        return lax.conv_general_dilated(
            x, w, window_strides=(1, 1), padding=((1, 1), (1, 1)),
            dimension_numbers=('NHWC', 'HWIO', 'NHWC'))

    def bn(x, g, b, m, v):
        return (x - m) * (g / jnp.sqrt(v + eps)) + b

    o = jnp.maximum(bn(conv(x_nhwc, w1), g1, be1, m1, v1), 0.0)
    o = bn(conv(o, w2), g2, be2, m2, v2)
    return jnp.maximum(o + x_nhwc, 0.0)


if __name__ == "__main__":
    N, C, H, W = 2, 4, 16, 16     # in_channel == out_channel, stride=1, no downsample
    eps = 1e-5

    key = jax.random.PRNGKey(0)
    ks = jax.random.split(key, 11)

    # PyTorch-style input (NCHW), conv weights (OIHW), BN params — deterministic.
    x_nchw = jax.random.normal(ks[0], (N, C, H, W), jnp.float32)
    w1_oihw = jax.random.normal(ks[1], (C, C, 3, 3), jnp.float32) * 0.1
    w2_oihw = jax.random.normal(ks[2], (C, C, 3, 3), jnp.float32) * 0.1
    gamma1 = 1.0 + 0.1 * jax.random.normal(ks[3], (C,), jnp.float32)
    beta1 = 0.1 * jax.random.normal(ks[4], (C,), jnp.float32)
    mean1 = 0.1 * jax.random.normal(ks[5], (C,), jnp.float32)
    var1 = 1.0 + 0.1 * jax.random.uniform(ks[6], (C,), jnp.float32)
    gamma2 = 1.0 + 0.1 * jax.random.normal(ks[7], (C,), jnp.float32)
    beta2 = 0.1 * jax.random.normal(ks[8], (C,), jnp.float32)
    mean2 = 0.1 * jax.random.normal(ks[9], (C,), jnp.float32)
    var2 = 1.0 + 0.1 * jax.random.uniform(ks[10], (C,), jnp.float32)

    # Layout conversion: NCHW -> NHWC, OIHW -> HWIO.
    x_nhwc = jnp.transpose(x_nchw, (0, 2, 3, 1))
    w1 = jnp.transpose(w1_oihw, (2, 3, 1, 0))
    w2 = jnp.transpose(w2_oihw, (2, 3, 1, 0))

    out = basic_block(x_nhwc, w1, gamma1, beta1, mean1, var1,
                      w2, gamma2, beta2, mean2, var2, eps)
    out = jax.block_until_ready(out)

    ref = reference(x_nhwc, w1, gamma1, beta1, mean1, var1,
                    w2, gamma2, beta2, mean2, var2, eps)
    assert out.shape == (N, H, W, C)
    # bf16-at-the-dot kernel vs f32 XLA reference: loosened tolerance.
    max_err = float(jnp.max(jnp.abs(out - ref)))
    assert jnp.allclose(out, ref, atol=3e-2, rtol=3e-2), (
        f"mismatch vs reference, max abs err = {max_err}")

    # Back to PyTorch NCHW convention if needed downstream.
    out_nchw = jnp.transpose(out, (0, 3, 1, 2))
    assert out_nchw.shape == (N, C, H, W)

    print("KERNEL_OK")
</pallas_src>

<mosaic_0001>
module attributes {stable_mosaic.version = 11 : i64} {
  func.func @basic_block_kernel(%arg0: i32, %arg1: memref<1x16x16x128xf32, #tpu.memory_space<vmem>>, %arg2: memref<9x8x128xbf16, #tpu.memory_space<vmem>>, %arg3: memref<1x128xf32, #tpu.memory_space<vmem>>, %arg4: memref<9x8x128xbf16, #tpu.memory_space<vmem>>, %arg5: memref<1x128xf32, #tpu.memory_space<vmem>>, %arg6: memref<1x16x16x128xf32, #tpu.memory_space<vmem>>, %arg7: memref<18x24x128xf32, #tpu.memory_space<vmem>>) attributes {dimension_semantics = [#tpu.dimension_semantics<parallel>], iteration_bounds = array<i64: 2>, scalar_prefetch = 0 : i64, scratch_operands = 1 : i64, tpu.core_type = #tpu.core_type<tc>, window_params = [{transform_indices = @transform_0, window_bounds = array<i64: 1, 16, 16, 128>}, {pipeline_mode = #tpu.pipeline_mode<synchronous>, transform_indices = @transform_1, window_bounds = array<i64: 9, 8, 128>}, {pipeline_mode = #tpu.pipeline_mode<synchronous>, transform_indices = @transform_2, window_bounds = array<i64: 1, 128>}, {pipeline_mode = #tpu.pipeline_mode<synchronous>, transform_indices = @transform_3, window_bounds = array<i64: 9, 8, 128>}, {pipeline_mode = #tpu.pipeline_mode<synchronous>, transform_indices = @transform_4, window_bounds = array<i64: 1, 128>}, {transform_indices = @transform_5, window_bounds = array<i64: 1, 16, 16, 128>}]} {
    %cst = arith.constant 0.000000e+00 : f32
    %0 = vector.broadcast %cst : f32 to vector<1x24x128xf32>
    %cst_0 = arith.constant 0.000000e+00 : f32
    %1 = vector.broadcast %cst_0 : f32 to vector<16x1x128xf32>
    %c0 = arith.constant 0 : index
    %c0_1 = arith.constant 0 : index
    %c0_2 = arith.constant 0 : index
    %2 = vector.load %arg7[%c0, %c0_1, %c0_2] : memref<18x24x128xf32, #tpu.memory_space<vmem>>, vector<1x24x128xf32>
    tpu.vector_store %arg7[%c0, %c0_1, %c0_2], %0 {strides = array<i32>} : memref<18x24x128xf32, #tpu.memory_space<vmem>>, vector<1x24x128xf32>,
    %c17 = arith.constant 17 : index
    %c0_3 = arith.constant 0 : index
    %c0_4 = arith.constant 0 : index
    %3 = vector.load %arg7[%c17, %c0_3, %c0_4] : memref<18x24x128xf32, #tpu.memory_space<vmem>>, vector<1x24x128xf32>
    tpu.vector_store %arg7[%c17, %c0_3, %c0_4], %0 {strides = array<i32>} : memref<18x24x128xf32, #tpu.memory_space<vmem>>, vector<1x24x128xf32>,
    %c1 = arith.constant 1 : index
    %c0_5 = arith.constant 0 : index
    %c0_6 = arith.constant 0 : index
    %4 = vector.load %arg7[%c1, %c0_5, %c0_6] : memref<18x24x128xf32, #tpu.memory_space<vmem>>, vector<16x1x128xf32>
    tpu.vector_store %arg7[%c1, %c0_5, %c0_6], %1 {strides = array<i32>} : memref<18x24x128xf32, #tpu.memory_space<vmem>>, vector<16x1x128xf32>,
    %c1_7 = arith.constant 1 : index
    %c17_8 = arith.constant 17 : index
    %c0_9 = arith.constant 0 : index
    %5 = vector.load %arg7[%c1_7, %c17_8, %c0_9] : memref<18x24x128xf32, #tpu.memory_space<vmem>>, vector<16x1x128xf32>
    tpu.vector_store %arg7[%c1_7, %c17_8, %c0_9], %1 {strides = array<i32>} : memref<18x24x128xf32, #tpu.memory_space<vmem>>, vector<16x1x128xf32>,
    %c0_10 = arith.constant 0 : index
    %c0_11 = arith.constant 0 : index
    %c0_12 = arith.constant 0 : index
    %c0_13 = arith.constant 0 : index
    %6 = vector.load %arg1[%c0_10, %c0_11, %c0_12, %c0_13] : memref<1x16x16x128xf32, #tpu.memory_space<vmem>>, vector<1x16x16x128xf32>
    %7 = vector.shape_cast %6 : vector<1x16x16x128xf32> to vector<16x16x128xf32>
    %c1_14 = arith.constant 1 : index
    %c1_15 = arith.constant 1 : index
    %c0_16 = arith.constant 0 : index
    %8 = vector.load %arg7[%c1_14, %c1_15, %c0_16] : memref<18x24x128xf32, #tpu.memory_space<vmem>>, vector<16x16x128xf32>
    tpu.vector_store %arg7[%c1_14, %c1_15, %c0_16], %7 {strides = array<i32>} : memref<18x24x128xf32, #tpu.memory_space<vmem>>, vector<16x16x128xf32>,
    %cst_17 = arith.constant 0.000000e+00 : f32
    %9 = vector.broadcast %cst_17 : f32 to vector<256x128xf32>
    %c0_18 = arith.constant 0 : index
    %c0_19 = arith.constant 0 : index
    %c0_20 = arith.constant 0 : index
    %10 = vector.load %arg7[%c0_18, %c0_19, %c0_20] : memref<18x24x128xf32, #tpu.memory_space<vmem>>, vector<16x16x128xf32>
    %11 = vector.shape_cast %10 : vector<16x16x128xf32> to vector<256x128xf32>
    %12 = vector.extract_strided_slice %11 {offsets = [0, 0], sizes = [256, 8], strides = [1, 1]} : vector<256x128xf32> to vector<256x8xf32>
    %13 = arith.truncf %12 : vector<256x8xf32> to vector<256x8xbf16>
    %c0_21 = arith.constant 0 : index
    %c0_22 = arith.constant 0 : index
    %c0_23 = arith.constant 0 : index
    %14 = vector.load %arg2[%c0_21, %c0_22, %c0_23] : memref<9x8x128xbf16, #tpu.memory_space<vmem>>, vector<1x8x128xbf16>
    %15 = vector.shape_cast %14 : vector<1x8x128xbf16> to vector<8x128xbf16>
    %cst_24 = arith.constant dense<0.000000e+00> : vector<256x128xf32>
    %16 = tpu.matmul %13, %15, %cst_24 {dimension_numbers = #tpu.dot_dimension_numbers<[1], [0], [0], [1], [0, 0, 1, 1], [], []>} : vector<256x8xbf16>, vector<8x128xbf16>, vector<256x128xf32> -> vector<256x128xf32>
    %17 = arith.addf %9, %16 : vector<256x128xf32>
    %c0_25 = arith.constant 0 : index
    %c1_26 = arith.constant 1 : index
    %c0_27 = arith.constant 0 : index
    %18 = vector.load %arg7[%c0_25, %c1_26, %c0_27] : memref<18x24x128xf32, #tpu.memory_space<vmem>>, vector<16x16x128xf32>
    %19 = vector.shape_cast %18 : vector<16x16x128xf32> to vector<256x128xf32>
    %20 = vector.extract_strided_slice %19 {offsets = [0, 0], sizes = [256, 8], strides = [1, 1]} : vector<256x128xf32> to vector<256x8xf32>
    %21 = arith.truncf %20 : vector<256x8xf32> to vector<256x8xbf16>
    %c1_28 = arith.constant 1 : index
    %c0_29 = arith.constant 0 : index
    %c0_30 = arith.constant 0 : index
    %22 = vector.load %arg2[%c1_28, %c0_29, %c0_30] : memref<9x8x128xbf16, #tpu.memory_space<vmem>>, vector<1x8x128xbf16>
    %23 = vector.shape_cast %22 : vector<1x8x128xbf16> to vector<8x128xbf16>
    %cst_31 = arith.constant dense<0.000000e+00> : vector<256x128xf32>
    %24 = tpu.matmul %21, %23, %cst_31 {dimension_numbers = #tpu.dot_dimension_numbers<[1], [0], [0], [1], [0, 0, 1, 1], [], []>} : vector<256x8xbf16>, vector<8x128xbf16>, vector<256x128xf32> -> vector<256x128xf32>
    %25 = arith.addf %17, %24 : vector<256x128xf32>
    %c0_32 = arith.constant 0 : index
    %c2 = arith.constant 2 : index
    %c0_33 = arith.constant 0 : index
    %26 = vector.load %arg7[%c0_32, %c2, %c0_33] : memref<18x24x128xf32, #tpu.memory_space<vmem>>, vector<16x16x128xf32>
    %27 = vector.shape_cast %26 : vector<16x16x128xf32> to vector<256x128xf32>
    %28 = vector.extract_strided_slice %27 {offsets = [0, 0], sizes = [256, 8], strides = [1, 1]} : vector<256x128xf32> to vector<256x8xf32>
    %29 = arith.truncf %28 : vector<256x8xf32> to vector<256x8xbf16>
    %c2_34 = arith.constant 2 : index
    %c0_35 = arith.constant 0 : index
    %c0_36 = arith.constant 0 : index
    %30 = vector.load %arg2[%c2_34, %c0_35, %c0_36] : memref<9x8x128xbf16, #tpu.memory_space<vmem>>, vector<1x8x128xbf16>
    %31 = vector.shape_cast %30 : vector<1x8x128xbf16> to vector<8x128xbf16>
    %cst_37 = arith.constant dense<0.000000e+00> : vector<256x128xf32>
    %32 = tpu.matmul %29, %31, %cst_37 {dimension_numbers = #tpu.dot_dimension_numbers<[1], [0], [0], [1], [0, 0, 1, 1], [], []>} : vector<256x8xbf16>, vector<8x128xbf16>, vector<256x128xf32> -> vector<256x128xf32>
    %33 = arith.addf %25, %32 : vector<256x128xf32>
    %c1_38 = arith.constant 1 : index
    %c0_39 = arith.constant 0 : index
    %c0_40 = arith.constant 0 : index
    %34 = vector.load %arg7[%c1_38, %c0_39, %c0_40] : memref<18x24x128xf32, #tpu.memory_space<vmem>>, vector<16x16x128xf32>
    %35 = vector.shape_cast %34 : vector<16x16x128xf32> to vector<256x128xf32>
    %36 = vector.extract_strided_slice %35 {offsets = [0, 0], sizes = [256, 8], strides = [1, 1]} : vector<256x128xf32> to vector<256x8xf32>
    %37 = arith.truncf %36 : vector<256x8xf32> to vector<256x8xbf16>
    %c3 = arith.constant 3 : index
    %c0_41 = arith.constant 0 : index
    %c0_42 = arith.constant 0 : index
    %38 = vector.load %arg2[%c3, %c0_41, %c0_42] : memref<9x8x128xbf16, #tpu.memory_space<vmem>>, vector<1x8x128xbf16>
    %39 = vector.shape_cast %38 : vector<1x8x128xbf16> to vector<8x128xbf16>
    %cst_43 = arith.constant dense<0.000000e+00> : vector<256x128xf32>
    %40 = tpu.matmul %37, %39, %cst_43 {dimension_numbers = #tpu.dot_dimension_numbers<[1], [0], [0], [1], [0, 0, 1, 1], [], []>} : vector<256x8xbf16>, vector<8x128xbf16>, vector<256x128xf32> -> vector<256x128xf32>
    %41 = arith.addf %33, %40 : vector<256x128xf32>
    %c1_44 = arith.constant 1 : index
    %c1_45 = arith.constant 1 : index
    %c0_46 = arith.constant 0 : index
    %42 = vector.load %arg7[%c1_44, %c1_45, %c0_46] : memref<18x24x128xf32, #tpu.memory_space<vmem>>, vector<16x16x128xf32>
    %43 = vector.shape_cast %42 : vector<16x16x128xf32> to vector<256x128xf32>
    %44 = vector.extract_strided_slice %43 {offsets = [0, 0], sizes = [256, 8], strides = [1, 1]} : vector<256x128xf32> to vector<256x8xf32>
    %45 = arith.truncf %44 : vector<256x8xf32> to vector<256x8xbf16>
    %c4 = arith.constant 4 : index
    %c0_47 = arith.constant 0 : index
    %c0_48 = arith.constant 0 : index
    %46 = vector.load %arg2[%c4, %c0_47, %c0_48] : memref<9x8x128xbf16, #tpu.memory_space<vmem>>, vector<1x8x128xbf16>
    %47 = vector.shape_cast %46 : vector<1x8x128xbf16> to vector<8x128xbf16>
    %cst_49 = arith.constant dense<0.000000e+00> : vector<256x128xf32>
    %48 = tpu.matmul %45, %47, %cst_49 {dimension_numbers = #tpu.dot_dimension_numbers<[1], [0], [0], [1], [0, 0, 1, 1], [], []>} : vector<256x8xbf16>, vector<8x128xbf16>, vector<256x128xf32> -> vector<256x128xf32>
    %49 = arith.addf %41, %48 : vector<256x128xf32>
    %c1_50 = arith.constant 1 : index
    %c2_51 = arith.constant 2 : index
    %c0_52 = arith.constant 0 : index
    %50 = vector.load %arg7[%c1_50, %c2_51, %c0_52] : memref<18x24x128xf32, #tpu.memory_space<vmem>>, vector<16x16x128xf32>
    %51 = vector.shape_cast %50 : vector<16x16x128xf32> to vector<256x128xf32>
    %52 = vector.extract_strided_slice %51 {offsets = [0, 0], sizes = [256, 8], strides = [1, 1]} : vector<256x128xf32> to vector<256x8xf32>
    %53 = arith.truncf %52 : vector<256x8xf32> to vector<256x8xbf16>
    %c5 = arith.constant 5 : index
    %c0_53 = arith.constant 0 : index
    %c0_54 = arith.constant 0 : index
    %54 = vector.load %arg2[%c5, %c0_53, %c0_54] : memref<9x8x128xbf16, #tpu.memory_space<vmem>>, vector<1x8x128xbf16>
    %55 = vector.shape_cast %54 : vector<1x8x128xbf16> to vector<8x128xbf16>
    %cst_55 = arith.constant dense<0.000000e+00> : vector<256x128xf32>
    %56 = tpu.matmul %53, %55, %cst_55 {dimension_numbers = #tpu.dot_dimension_numbers<[1], [0], [0], [1], [0, 0, 1, 1], [], []>} : vector<256x8xbf16>, vector<8x128xbf16>, vector<256x128xf32> -> vector<256x128xf32>
    %57 = arith.addf %49, %56 : vector<256x128xf32>
    %c2_56 = arith.constant 2 : index
    %c0_57 = arith.constant 0 : index
    %c0_58 = arith.constant 0 : index
    %58 = vector.load %arg7[%c2_56, %c0_57, %c0_58] : memref<18x24x128xf32, #tpu.memory_space<vmem>>, vector<16x16x128xf32>
    %59 = vector.shape_cast %58 : vector<16x16x128xf32> to vector<256x128xf32>
    %60 = vector.extract_strided_slice %59 {offsets = [0, 0], sizes = [256, 8], strides = [1, 1]} : vector<256x128xf32> to vector<256x8xf32>
    %61 = arith.truncf %60 : vector<256x8xf32> to vector<256x8xbf16>
    %c6 = arith.constant 6 : index
    %c0_59 = arith.constant 0 : index
    %c0_60 = arith.constant 0 : index
    %62 = vector.load %arg2[%c6, %c0_59, %c0_60] : memref<9x8x128xbf16, #tpu.memory_space<vmem>>, vector<1x8x128xbf16>
    %63 = vector.shape_cast %62 : vector<1x8x128xbf16> to vector<8x128xbf16>
    %cst_61 = arith.constant dense<0.000000e+00> : vector<256x128xf32>
    %64 = tpu.matmul %61, %63, %cst_61 {dimension_numbers = #tpu.dot_dimension_numbers<[1], [0], [0], [1], [0, 0, 1, 1], [], []>} : vector<256x8xbf16>, vector<8x128xbf16>, vector<256x128xf32> -> vector<256x128xf32>
    %65 = arith.addf %57, %64 : vector<256x128xf32>
    %c2_62 = arith.constant 2 : index
    %c1_63 = arith.constant 1 : index
    %c0_64 = arith.constant 0 : index
    %66 = vector.load %arg7[%c2_62, %c1_63, %c0_64] : memref<18x24x128xf32, #tpu.memory_space<vmem>>, vector<16x16x128xf32>
    %67 = vector.shape_cast %66 : vector<16x16x128xf32> to vector<256x128xf32>
    %68 = vector.extract_strided_slice %67 {offsets = [0, 0], sizes = [256, 8], strides = [1, 1]} : vector<256x128xf32> to vector<256x8xf32>
    %69 = arith.truncf %68 : vector<256x8xf32> to vector<256x8xbf16>
    %c7 = arith.constant 7 : index
    %c0_65 = arith.constant 0 : index
    %c0_66 = arith.constant 0 : index
    %70 = vector.load %arg2[%c7, %c0_65, %c0_66] : memref<9x8x128xbf16, #tpu.memory_space<vmem>>, vector<1x8x128xbf16>
    %71 = vector.shape_cast %70 : vector<1x8x128xbf16> to vector<8x128xbf16>
    %cst_67 = arith.constant dense<0.000000e+00> : vector<256x128xf32>
    %72 = tpu.matmul %69, %71, %cst_67 {dimension_numbers = #tpu.dot_dimension_numbers<[1], [0], [0], [1], [0, 0, 1, 1], [], []>} : vector<256x8xbf16>, vector<8x128xbf16>, vector<256x128xf32> -> vector<256x128xf32>
    %73 = arith.addf %65, %72 : vector<256x128xf32>
    %c2_68 = arith.constant 2 : index
    %c2_69 = arith.constant 2 : index
    %c0_70 = arith.constant 0 : index
    %74 = vector.load %arg7[%c2_68, %c2_69, %c0_70] : memref<18x24x128xf32, #tpu.memory_space<vmem>>, vector<16x16x128xf32>
    %75 = vector.shape_cast %74 : vector<16x16x128xf32> to vector<256x128xf32>
    %76 = vector.extract_strided_slice %75 {offsets = [0, 0], sizes = [256, 8], strides = [1, 1]} : vector<256x128xf32> to vector<256x8xf32>
    %77 = arith.truncf %76 : vector<256x8xf32> to vector<256x8xbf16>
    %c8 = arith.constant 8 : index
    %c0_71 = arith.constant 0 : index
    %c0_72 = arith.constant 0 : index
    %78 = vector.load %arg2[%c8, %c0_71, %c0_72] : memref<9x8x128xbf16, #tpu.memory_space<vmem>>, vector<1x8x128xbf16>
    %79 = vector.shape_cast %78 : vector<1x8x128xbf16> to vector<8x128xbf16>
    %cst_73 = arith.constant dense<0.000000e+00> : vector<256x128xf32>
    %80 = tpu.matmul %77, %79, %cst_73 {dimension_numbers = #tpu.dot_dimension_numbers<[1], [0], [0], [1], [0, 0, 1, 1], [], []>} : vector<256x8xbf16>, vector<8x128xbf16>, vector<256x128xf32> -> vector<256x128xf32>
    %81 = arith.addf %73, %80 : vector<256x128xf32>
    %c0_74 = arith.constant 0 : index
    %c0_75 = arith.constant 0 : index
    %82 = vector.load %arg3[%c0_74, %c0_75] : memref<1x128xf32, #tpu.memory_space<vmem>>, vector<1x128xf32>
    %83 = vector.broadcast %82 : vector<1x128xf32> to vector<256x128xf32>
    %84 = arith.addf %81, %83 : vector<256x128xf32>
    %cst_76 = arith.constant 0.000000e+00 : f32
    %85 = vector.broadcast %cst_76 : f32 to vector<256x128xf32>
    %86 = arith.maximumf %84, %85 : vector<256x128xf32>
    %87 = vector.shape_cast %86 : vector<256x128xf32> to vector<16x16x128xf32>
    %c1_77 = arith.constant 1 : index
    %c1_78 = arith.constant 1 : index
    %c0_79 = arith.constant 0 : index
    %88 = vector.load %arg7[%c1_77, %c1_78, %c0_79] : memref<18x24x128xf32, #tpu.memory_space<vmem>>, vector<16x16x128xf32>
    tpu.vector_store %arg7[%c1_77, %c1_78, %c0_79], %87 {strides = array<i32>} : memref<18x24x128xf32, #tpu.memory_space<vmem>>, vector<16x16x128xf32>,
    %cst_80 = arith.constant 0.000000e+00 : f32
    %89 = vector.broadcast %cst_80 : f32 to vector<256x128xf32>
    %c0_81 = arith.constant 0 : index
    %c0_82 = arith.constant 0 : index
    %c0_83 = arith.constant 0 : index
    %90 = vector.load %arg7[%c0_81, %c0_82, %c0_83] : memref<18x24x128xf32, #tpu.memory_space<vmem>>, vector<16x16x128xf32>
    %91 = vector.shape_cast %90 : vector<16x16x128xf32> to vector<256x128xf32>
    %92 = vector.extract_strided_slice %91 {offsets = [0, 0], sizes = [256, 8], strides = [1, 1]} : vector<256x128xf32> to vector<256x8xf32>
    %93 = arith.truncf %92 : vector<256x8xf32> to vector<256x8xbf16>
    %c0_84 = arith.constant 0 : index
    %c0_85 = arith.constant 0 : index
    %c0_86 = arith.constant 0 : index
    %94 = vector.load %arg4[%c0_84, %c0_85, %c0_86] : memref<9x8x128xbf16, #tpu.memory_space<vmem>>, vector<1x8x128xbf16>
    %95 = vector.shape_cast %94 : vector<1x8x128xbf16> to vector<8x128xbf16>
    %cst_87 = arith.constant dense<0.000000e+00> : vector<256x128xf32>
    %96 = tpu.matmul %93, %95, %cst_87 {dimension_numbers = #tpu.dot_dimension_numbers<[1], [0], [0], [1], [0, 0, 1, 1], [], []>} : vector<256x8xbf16>, vector<8x128xbf16>, vector<256x128xf32> -> vector<256x128xf32>
    %97 = arith.addf %89, %96 : vector<256x128xf32>
    %c0_88 = arith.constant 0 : index
    %c1_89 = arith.constant 1 : index
    %c0_90 = arith.constant 0 : index
    %98 = vector.load %arg7[%c0_88, %c1_89, %c0_90] : memref<18x24x128xf32, #tpu.memory_space<vmem>>, vector<16x16x128xf32>
    %99 = vector.shape_cast %98 : vector<16x16x128xf32> to vector<256x128xf32>
    %100 = vector.extract_strided_slice %99 {offsets = [0, 0], sizes = [256, 8], strides = [1, 1]} : vector<256x128xf32> to vector<256x8xf32>
    %101 = arith.truncf %100 : vector<256x8xf32> to vector<256x8xbf16>
    %c1_91 = arith.constant 1 : index
    %c0_92 = arith.constant 0 : index
    %c0_93 = arith.constant 0 : index
    %102 = vector.load %arg4[%c1_91, %c0_92, %c0_93] : memref<9x8x128xbf16, #tpu.memory_space<vmem>>, vector<1x8x128xbf16>
    %103 = vector.shape_cast %102 : vector<1x8x128xbf16> to vector<8x128xbf16>
    %cst_94 = arith.constant dense<0.000000e+00> : vector<256x128xf32>
    %104 = tpu.matmul %101, %103, %cst_94 {dimension_numbers = #tpu.dot_dimension_numbers<[1], [0], [0], [1], [0, 0, 1, 1], [], []>} : vector<256x8xbf16>, vector<8x128xbf16>, vector<256x128xf32> -> vector<256x128xf32>
    %105 = arith.addf %97, %104 : vector<256x128xf32>
    %c0_95 = arith.constant 0 : index
    %c2_96 = arith.constant 2 : index
    %c0_97 = arith.constant 0 : index
    %106 = vector.load %arg7[%c0_95, %c2_96, %c0_97] : memref<18x24x128xf32, #tpu.memory_space<vmem>>, vector<16x16x128xf32>
    %107 = vector.shape_cast %106 : vector<16x16x128xf32> to vector<256x128xf32>
    %108 = vector.extract_strided_slice %107 {offsets = [0, 0], sizes = [256, 8], strides = [1, 1]} : vector<256x128xf32> to vector<256x8xf32>
    %109 = arith.truncf %108 : vector<256x8xf32> to vector<256x8xbf16>
    %c2_98 = arith.constant 2 : index
    %c0_99 = arith.constant 0 : index
    %c0_100 = arith.constant 0 : index
    %110 = vector.load %arg4[%c2_98, %c0_99, %c0_100] : memref<9x8x128xbf16, #tpu.memory_space<vmem>>, vector<1x8x128xbf16>
    %111 = vector.shape_cast %110 : vector<1x8x128xbf16> to vector<8x128xbf16>
    %cst_101 = arith.constant dense<0.000000e+00> : vector<256x128xf32>
    %112 = tpu.matmul %109, %111, %cst_101 {dimension_numbers = #tpu.dot_dimension_numbers<[1], [0], [0], [1], [0, 0, 1, 1], [], []>} : vector<256x8xbf16>, vector<8x128xbf16>, vector<256x128xf32> -> vector<256x128xf32>
    %113 = arith.addf %105, %112 : vector<256x128xf32>
    %c1_102 = arith.constant 1 : index
    %c0_103 = arith.constant 0 : index
    %c0_104 = arith.constant 0 : index
    %114 = vector.load %arg7[%c1_102, %c0_103, %c0_104] : memref<18x24x128xf32, #tpu.memory_space<vmem>>, vector<16x16x128xf32>
    %115 = vector.shape_cast %114 : vector<16x16x128xf32> to vector<256x128xf32>
    %116 = vector.extract_strided_slice %115 {offsets = [0, 0], sizes = [256, 8], strides = [1, 1]} : vector<256x128xf32> to vector<256x8xf32>
    %117 = arith.truncf %116 : vector<256x8xf32> to vector<256x8xbf16>
    %c3_105 = arith.constant 3 : index
    %c0_106 = arith.constant 0 : index
    %c0_107 = arith.constant 0 : index
    %118 = vector.load %arg4[%c3_105, %c0_106, %c0_107] : memref<9x8x128xbf16, #tpu.memory_space<vmem>>, vector<1x8x128xbf16>
    %119 = vector.shape_cast %118 : vector<1x8x128xbf16> to vector<8x128xbf16>
    %cst_108 = arith.constant dense<0.000000e+00> : vector<256x128xf32>
    %120 = tpu.matmul %117, %119, %cst_108 {dimension_numbers = #tpu.dot_dimension_numbers<[1], [0], [0], [1], [0, 0, 1, 1], [], []>} : vector<256x8xbf16>, vector<8x128xbf16>, vector<256x128xf32> -> vector<256x128xf32>
    %121 = arith.addf %113, %120 : vector<256x128xf32>
    %c1_109 = arith.constant 1 : index
    %c1_110 = arith.constant 1 : index
    %c0_111 = arith.constant 0 : index
    %122 = vector.load %arg7[%c1_109, %c1_110, %c0_111] : memref<18x24x128xf32, #tpu.memory_space<vmem>>, vector<16x16x128xf32>
    %123 = vector.shape_cast %122 : vector<16x16x128xf32> to vector<256x128xf32>
    %124 = vector.extract_strided_slice %123 {offsets = [0, 0], sizes = [256, 8], strides = [1, 1]} : vector<256x128xf32> to vector<256x8xf32>
    %125 = arith.truncf %124 : vector<256x8xf32> to vector<256x8xbf16>
    %c4_112 = arith.constant 4 : index
    %c0_113 = arith.constant 0 : index
    %c0_114 = arith.constant 0 : index
    %126 = vector.load %arg4[%c4_112, %c0_113, %c0_114] : memref<9x8x128xbf16, #tpu.memory_space<vmem>>, vector<1x8x128xbf16>
    %127 = vector.shape_cast %126 : vector<1x8x128xbf16> to vector<8x128xbf16>
    %cst_115 = arith.constant dense<0.000000e+00> : vector<256x128xf32>
    %128 = tpu.matmul %125, %127, %cst_115 {dimension_numbers = #tpu.dot_dimension_numbers<[1], [0], [0], [1], [0, 0, 1, 1], [], []>} : vector<256x8xbf16>, vector<8x128xbf16>, vector<256x128xf32> -> vector<256x128xf32>
    %129 = arith.addf %121, %128 : vector<256x128xf32>
    %c1_116 = arith.constant 1 : index
    %c2_117 = arith.constant 2 : index
    %c0_118 = arith.constant 0 : index
    %130 = vector.load %arg7[%c1_116, %c2_117, %c0_118] : memref<18x24x128xf32, #tpu.memory_space<vmem>>, vector<16x16x128xf32>
    %131 = vector.shape_cast %130 : vector<16x16x128xf32> to vector<256x128xf32>
    %132 = vector.extract_strided_slice %131 {offsets = [0, 0], sizes = [256, 8], strides = [1, 1]} : vector<256x128xf32> to vector<256x8xf32>
    %133 = arith.truncf %132 : vector<256x8xf32> to vector<256x8xbf16>
    %c5_119 = arith.constant 5 : index
    %c0_120 = arith.constant 0 : index
    %c0_121 = arith.constant 0 : index
    %134 = vector.load %arg4[%c5_119, %c0_120, %c0_121] : memref<9x8x128xbf16, #tpu.memory_space<vmem>>, vector<1x8x128xbf16>
    %135 = vector.shape_cast %134 : vector<1x8x128xbf16> to vector<8x128xbf16>
    %cst_122 = arith.constant dense<0.000000e+00> : vector<256x128xf32>
    %136 = tpu.matmul %133, %135, %cst_122 {dimension_numbers = #tpu.dot_dimension_numbers<[1], [0], [0], [1], [0, 0, 1, 1], [], []>} : vector<256x8xbf16>, vector<8x128xbf16>, vector<256x128xf32> -> vector<256x128xf32>
    %137 = arith.addf %129, %136 : vector<256x128xf32>
    %c2_123 = arith.constant 2 : index
    %c0_124 = arith.constant 0 : index
    %c0_125 = arith.constant 0 : index
    %138 = vector.load %arg7[%c2_123, %c0_124, %c0_125] : memref<18x24x128xf32, #tpu.memory_space<vmem>>, vector<16x16x128xf32>
    %139 = vector.shape_cast %138 : vector<16x16x128xf32> to vector<256x128xf32>
    %140 = vector.extract_strided_slice %139 {offsets = [0, 0], sizes = [256, 8], strides = [1, 1]} : vector<256x128xf32> to vector<256x8xf32>
    %141 = arith.truncf %140 : vector<256x8xf32> to vector<256x8xbf16>
    %c6_126 = arith.constant 6 : index
    %c0_127 = arith.constant 0 : index
    %c0_128 = arith.constant 0 : index
    %142 = vector.load %arg4[%c6_126, %c0_127, %c0_128] : memref<9x8x128xbf16, #tpu.memory_space<vmem>>, vector<1x8x128xbf16>
    %143 = vector.shape_cast %142 : vector<1x8x128xbf16> to vector<8x128xbf16>
    %cst_129 = arith.constant dense<0.000000e+00> : vector<256x128xf32>
    %144 = tpu.matmul %141, %143, %cst_129 {dimension_numbers = #tpu.dot_dimension_numbers<[1], [0], [0], [1], [0, 0, 1, 1], [], []>} : vector<256x8xbf16>, vector<8x128xbf16>, vector<256x128xf32> -> vector<256x128xf32>
    %145 = arith.addf %137, %144 : vector<256x128xf32>
    %c2_130 = arith.constant 2 : index
    %c1_131 = arith.constant 1 : index
    %c0_132 = arith.constant 0 : index
    %146 = vector.load %arg7[%c2_130, %c1_131, %c0_132] : memref<18x24x128xf32, #tpu.memory_space<vmem>>, vector<16x16x128xf32>
    %147 = vector.shape_cast %146 : vector<16x16x128xf32> to vector<256x128xf32>
    %148 = vector.extract_strided_slice %147 {offsets = [0, 0], sizes = [256, 8], strides = [1, 1]} : vector<256x128xf32> to vector<256x8xf32>
    %149 = arith.truncf %148 : vector<256x8xf32> to vector<256x8xbf16>
    %c7_133 = arith.constant 7 : index
    %c0_134 = arith.constant 0 : index
    %c0_135 = arith.constant 0 : index
    %150 = vector.load %arg4[%c7_133, %c0_134, %c0_135] : memref<9x8x128xbf16, #tpu.memory_space<vmem>>, vector<1x8x128xbf16>
    %151 = vector.shape_cast %150 : vector<1x8x128xbf16> to vector<8x128xbf16>
    %cst_136 = arith.constant dense<0.000000e+00> : vector<256x128xf32>
    %152 = tpu.matmul %149, %151, %cst_136 {dimension_numbers = #tpu.dot_dimension_numbers<[1], [0], [0], [1], [0, 0, 1, 1], [], []>} : vector<256x8xbf16>, vector<8x128xbf16>, vector<256x128xf32> -> vector<256x128xf32>
    %153 = arith.addf %145, %152 : vector<256x128xf32>
    %c2_137 = arith.constant 2 : index
    %c2_138 = arith.constant 2 : index
    %c0_139 = arith.constant 0 : index
    %154 = vector.load %arg7[%c2_137, %c2_138, %c0_139] : memref<18x24x128xf32, #tpu.memory_space<vmem>>, vector<16x16x128xf32>
    %155 = vector.shape_cast %154 : vector<16x16x128xf32> to vector<256x128xf32>
    %156 = vector.extract_strided_slice %155 {offsets = [0, 0], sizes = [256, 8], strides = [1, 1]} : vector<256x128xf32> to vector<256x8xf32>
    %157 = arith.truncf %156 : vector<256x8xf32> to vector<256x8xbf16>
    %c8_140 = arith.constant 8 : index
    %c0_141 = arith.constant 0 : index
    %c0_142 = arith.constant 0 : index
    %158 = vector.load %arg4[%c8_140, %c0_141, %c0_142] : memref<9x8x128xbf16, #tpu.memory_space<vmem>>, vector<1x8x128xbf16>
    %159 = vector.shape_cast %158 : vector<1x8x128xbf16> to vector<8x128xbf16>
    %cst_143 = arith.constant dense<0.000000e+00> : vector<256x128xf32>
    %160 = tpu.matmul %157, %159, %cst_143 {dimension_numbers = #tpu.dot_dimension_numbers<[1], [0], [0], [1], [0, 0, 1, 1], [], []>} : vector<256x8xbf16>, vector<8x128xbf16>, vector<256x128xf32> -> vector<256x128xf32>
    %161 = arith.addf %153, %160 : vector<256x128xf32>
    %c0_144 = arith.constant 0 : index
    %c0_145 = arith.constant 0 : index
    %162 = vector.load %arg5[%c0_144, %c0_145] : memref<1x128xf32, #tpu.memory_space<vmem>>, vector<1x128xf32>
    %163 = vector.broadcast %162 : vector<1x128xf32> to vector<256x128xf32>
    %164 = arith.addf %161, %163 : vector<256x128xf32>
    %165 = vector.shape_cast %164 : vector<256x128xf32> to vector<16x16x128xf32>
    %c0_146 = arith.constant 0 : index
    %c0_147 = arith.constant 0 : index
    %c0_148 = arith.constant 0 : index
    %c0_149 = arith.constant 0 : index
    %166 = vector.load %arg1[%c0_146, %c0_147, %c0_148, %c0_149] : memref<1x16x16x128xf32, #tpu.memory_space<vmem>>, vector<1x16x16x128xf32>
    %167 = vector.shape_cast %166 : vector<1x16x16x128xf32> to vector<16x16x128xf32>
    %168 = arith.addf %165, %167 : vector<16x16x128xf32>
    %cst_150 = arith.constant 0.000000e+00 : f32
    %169 = vector.broadcast %cst_150 : f32 to vector<16x16x128xf32>
    %170 = arith.maximumf %168, %169 : vector<16x16x128xf32>
    %c0_151 = arith.constant 0 : index
    %c0_152 = arith.constant 0 : index
    %c0_153 = arith.constant 0 : index
    %c0_154 = arith.constant 0 : index
    %171 = vector.load %arg6[%c0_151, %c0_152, %c0_153, %c0_154] : memref<1x16x16x128xf32, #tpu.memory_space<vmem>>, vector<1x16x16x128xf32>
    %172 = vector.shape_cast %171 : vector<1x16x16x128xf32> to vector<16x16x128xf32>
    %173 = vector.shape_cast %170 : vector<16x16x128xf32> to vector<1x16x16x128xf32>
    tpu.vector_store %arg6[%c0_151, %c0_152, %c0_153, %c0_154], %173 {strides = array<i32>} : memref<1x16x16x128xf32, #tpu.memory_space<vmem>>, vector<1x16x16x128xf32>,
    return
  }
  func.func @transform_0(%arg0: i32) -> (i32, i32, i32, i32) {
    %c0_i32 = arith.constant 0 : i32
    %c0_i32_0 = arith.constant 0 : i32
    %c0_i32_1 = arith.constant 0 : i32
    %c0_i32_2 = arith.constant 0 : i32
    return %arg0, %c0_i32, %c0_i32_0, %c0_i32_1 : i32, i32, i32, i32
  }
  func.func @transform_1(%arg0: i32) -> (i32, i32, i32) {
    %c0_i32 = arith.constant 0 : i32
    %c0_i32_0 = arith.constant 0 : i32
    %c0_i32_1 = arith.constant 0 : i32
    %c0_i32_2 = arith.constant 0 : i32
    return %c0_i32, %c0_i32_0, %c0_i32_1 : i32, i32, i32
  }
  func.func @transform_2(%arg0: i32) -> (i32, i32) {
    %c0_i32 = arith.constant 0 : i32
    %c0_i32_0 = arith.constant 0 : i32
    %c0_i32_1 = arith.constant 0 : i32
    return %c0_i32, %c0_i32_0 : i32, i32
  }
  func.func @transform_3(%arg0: i32) -> (i32, i32, i32) {
    %c0_i32 = arith.constant 0 : i32
    %c0_i32_0 = arith.constant 0 : i32
    %c0_i32_1 = arith.constant 0 : i32
    %c0_i32_2 = arith.constant 0 : i32
    return %c0_i32, %c0_i32_0, %c0_i32_1 : i32, i32, i32
  }
  func.func @transform_4(%arg0: i32) -> (i32, i32) {
    %c0_i32 = arith.constant 0 : i32
    %c0_i32_0 = arith.constant 0 : i32
    %c0_i32_1 = arith.constant 0 : i32
    return %c0_i32, %c0_i32_0 : i32, i32
  }
  func.func @transform_5(%arg0: i32) -> (i32, i32, i32, i32) {
    %c0_i32 = arith.constant 0 : i32
    %c0_i32_0 = arith.constant 0 : i32
    %c0_i32_1 = arith.constant 0 : i32
    %c0_i32_2 = arith.constant 0 : i32
    return %arg0, %c0_i32, %c0_i32_0, %c0_i32_1 : i32, i32, i32, i32
  }
}

module attributes {stable_mosaic.version = 11 : i64} {
  func.func @basic_block_kernel(%arg0: i32, %arg1: memref<1x16x16x128xf32, #tpu.memory_space<vmem>>, %arg2: memref<9x8x128xbf16, #tpu.memory_space<vmem>>, %arg3: memref<1x128xf32, #tpu.memory_space<vmem>>, %arg4: memref<9x8x128xbf16, #tpu.memory_space<vmem>>, %arg5: memref<1x128xf32, #tpu.memory_space<vmem>>, %arg6: memref<1x16x16x128xf32, #tpu.memory_space<vmem>>, %arg7: memref<18x24x128xf32, #tpu.memory_space<vmem>>) attributes {dimension_semantics = [#tpu.dimension_semantics<parallel>], iteration_bounds = array<i64: 2>, scalar_prefetch = 0 : i64, scratch_operands = 1 : i64, tpu.core_type = #tpu.core_type<tc>, window_params = [{transform_indices = @transform_0, window_bounds = array<i64: 1, 16, 16, 128>}, {pipeline_mode = #tpu.pipeline_mode<synchronous>, transform_indices = @transform_1, window_bounds = array<i64: 9, 8, 128>}, {pipeline_mode = #tpu.pipeline_mode<synchronous>, transform_indices = @transform_2, window_bounds = array<i64: 1, 128>}, {pipeline_mode = #tpu.pipeline_mode<synchronous>, transform_indices = @transform_3, window_bounds = array<i64: 9, 8, 128>}, {pipeline_mode = #tpu.pipeline_mode<synchronous>, transform_indices = @transform_4, window_bounds = array<i64: 1, 128>}, {transform_indices = @transform_5, window_bounds = array<i64: 1, 16, 16, 128>}]} {
    %cst = arith.constant 0.000000e+00 : f32
    %0 = vector.broadcast %cst : f32 to vector<1x24x128xf32>
    %cst_0 = arith.constant 0.000000e+00 : f32
    %1 = vector.broadcast %cst_0 : f32 to vector<16x1x128xf32>
    %c0 = arith.constant 0 : index
    %c0_1 = arith.constant 0 : index
    %c0_2 = arith.constant 0 : index
    %2 = vector.load %arg7[%c0, %c0_1, %c0_2] : memref<18x24x128xf32, #tpu.memory_space<vmem>>, vector<1x24x128xf32>
    tpu.vector_store %arg7[%c0, %c0_1, %c0_2], %0 {strides = array<i32>} : memref<18x24x128xf32, #tpu.memory_space<vmem>>, vector<1x24x128xf32>,
    %c17 = arith.constant 17 : index
    %c0_3 = arith.constant 0 : index
    %c0_4 = arith.constant 0 : index
    %3 = vector.load %arg7[%c17, %c0_3, %c0_4] : memref<18x24x128xf32, #tpu.memory_space<vmem>>, vector<1x24x128xf32>
    tpu.vector_store %arg7[%c17, %c0_3, %c0_4], %0 {strides = array<i32>} : memref<18x24x128xf32, #tpu.memory_space<vmem>>, vector<1x24x128xf32>,
    %c1 = arith.constant 1 : index
    %c0_5 = arith.constant 0 : index
    %c0_6 = arith.constant 0 : index
    %4 = vector.load %arg7[%c1, %c0_5, %c0_6] : memref<18x24x128xf32, #tpu.memory_space<vmem>>, vector<16x1x128xf32>
    tpu.vector_store %arg7[%c1, %c0_5, %c0_6], %1 {strides = array<i32>} : memref<18x24x128xf32, #tpu.memory_space<vmem>>, vector<16x1x128xf32>,
    %c1_7 = arith.constant 1 : index
    %c17_8 = arith.constant 17 : index
    %c0_9 = arith.constant 0 : index
    %5 = vector.load %arg7[%c1_7, %c17_8, %c0_9] : memref<18x24x128xf32, #tpu.memory_space<vmem>>, vector<16x1x128xf32>
    tpu.vector_store %arg7[%c1_7, %c17_8, %c0_9], %1 {strides = array<i32>} : memref<18x24x128xf32, #tpu.memory_space<vmem>>, vector<16x1x128xf32>,
    %c0_10 = arith.constant 0 : index
    %c0_11 = arith.constant 0 : index
    %c0_12 = arith.constant 0 : index
    %c0_13 = arith.constant 0 : index
    %6 = vector.load %arg1[%c0_10, %c0_11, %c0_12, %c0_13] : memref<1x16x16x128xf32, #tpu.memory_space<vmem>>, vector<1x16x16x128xf32>
    %7 = vector.shape_cast %6 : vector<1x16x16x128xf32> to vector<16x16x128xf32>
    %c1_14 = arith.constant 1 : index
    %c1_15 = arith.constant 1 : index
    %c0_16 = arith.constant 0 : index
    %8 = vector.load %arg7[%c1_14, %c1_15, %c0_16] : memref<18x24x128xf32, #tpu.memory_space<vmem>>, vector<16x16x128xf32>
    tpu.vector_store %arg7[%c1_14, %c1_15, %c0_16], %7 {strides = array<i32>} : memref<18x24x128xf32, #tpu.memory_space<vmem>>, vector<16x16x128xf32>,
    %cst_17 = arith.constant 0.000000e+00 : f32
    %9 = vector.broadcast %cst_17 : f32 to vector<256x128xf32>
    %c0_18 = arith.constant 0 : index
    %c0_19 = arith.constant 0 : index
    %c0_20 = arith.constant 0 : index
    %10 = vector.load %arg7[%c0_18, %c0_19, %c0_20] : memref<18x24x128xf32, #tpu.memory_space<vmem>>, vector<16x16x128xf32>
    %11 = vector.shape_cast %10 : vector<16x16x128xf32> to vector<256x128xf32>
    %12 = vector.extract_strided_slice %11 {offsets = [0, 0], sizes = [256, 8], strides = [1, 1]} : vector<256x128xf32> to vector<256x8xf32>
    %13 = arith.truncf %12 : vector<256x8xf32> to vector<256x8xbf16>
    %c0_21 = arith.constant 0 : index
    %c0_22 = arith.constant 0 : index
    %c0_23 = arith.constant 0 : index
    %14 = vector.load %arg2[%c0_21, %c0_22, %c0_23] : memref<9x8x128xbf16, #tpu.memory_space<vmem>>, vector<1x8x128xbf16>
    %15 = vector.shape_cast %14 : vector<1x8x128xbf16> to vector<8x128xbf16>
    %cst_24 = arith.constant dense<0.000000e+00> : vector<256x128xf32>
    %16 = tpu.matmul %13, %15, %cst_24 {dimension_numbers = #tpu.dot_dimension_numbers<[1], [0], [0], [1], [0, 0, 1, 1], [], []>} : vector<256x8xbf16>, vector<8x128xbf16>, vector<256x128xf32> -> vector<256x128xf32>
    %17 = arith.addf %9, %16 : vector<256x128xf32>
    %c0_25 = arith.constant 0 : index
    %c1_26 = arith.constant 1 : index
    %c0_27 = arith.constant 0 : index
    %18 = vector.load %arg7[%c0_25, %c1_26, %c0_27] : memref<18x24x128xf32, #tpu.memory_space<vmem>>, vector<16x16x128xf32>
    %19 = vector.shape_cast %18 : vector<16x16x128xf32> to vector<256x128xf32>
    %20 = vector.extract_strided_slice %19 {offsets = [0, 0], sizes = [256, 8], strides = [1, 1]} : vector<256x128xf32> to vector<256x8xf32>
    %21 = arith.truncf %20 : vector<256x8xf32> to vector<256x8xbf16>
    %c1_28 = arith.constant 1 : index
    %c0_29 = arith.constant 0 : index
    %c0_30 = arith.constant 0 : index
    %22 = vector.load %arg2[%c1_28, %c0_29, %c0_30] : memref<9x8x128xbf16, #tpu.memory_space<vmem>>, vector<1x8x128xbf16>
    %23 = vector.shape_cast %22 : vector<1x8x128xbf16> to vector<8x128xbf16>
    %cst_31 = arith.constant dense<0.000000e+00> : vector<256x128xf32>
    %24 = tpu.matmul %21, %23, %cst_31 {dimension_numbers = #tpu.dot_dimension_numbers<[1], [0], [0], [1], [0, 0, 1, 1], [], []>} : vector<256x8xbf16>, vector<8x128xbf16>, vector<256x128xf32> -> vector<256x128xf32>
    %25 = arith.addf %17, %24 : vector<256x128xf32>
    %c0_32 = arith.constant 0 : index
    %c2 = arith.constant 2 : index
    %c0_33 = arith.constant 0 : index
    %26 = vector.load %arg7[%c0_32, %c2, %c0_33] : memref<18x24x128xf32, #tpu.memory_space<vmem>>, vector<16x16x128xf32>
    %27 = vector.shape_cast %26 : vector<16x16x128xf32> to vector<256x128xf32>
    %28 = vector.extract_strided_slice %27 {offsets = [0, 0], sizes = [256, 8], strides = [1, 1]} : vector<256x128xf32> to vector<256x8xf32>
    %29 = arith.truncf %28 : vector<256x8xf32> to vector<256x8xbf16>
    %c2_34 = arith.constant 2 : index
    %c0_35 = arith.constant 0 : index
    %c0_36 = arith.constant 0 : index
    %30 = vector.load %arg2[%c2_34, %c0_35, %c0_36] : memref<9x8x128xbf16, #tpu.memory_space<vmem>>, vector<1x8x128xbf16>
    %31 = vector.shape_cast %30 : vector<1x8x128xbf16> to vector<8x128xbf16>
    %cst_37 = arith.constant dense<0.000000e+00> : vector<256x128xf32>
    %32 = tpu.matmul %29, %31, %cst_37 {dimension_numbers = #tpu.dot_dimension_numbers<[1], [0], [0], [1], [0, 0, 1, 1], [], []>} : vector<256x8xbf16>, vector<8x128xbf16>, vector<256x128xf32> -> vector<256x128xf32>
    %33 = arith.addf %25, %32 : vector<256x128xf32>
    %c1_38 = arith.constant 1 : index
    %c0_39 = arith.constant 0 : index
    %c0_40 = arith.constant 0 : index
    %34 = vector.load %arg7[%c1_38, %c0_39, %c0_40] : memref<18x24x128xf32, #tpu.memory_space<vmem>>, vector<16x16x128xf32>
    %35 = vector.shape_cast %34 : vector<16x16x128xf32> to vector<256x128xf32>
    %36 = vector.extract_strided_slice %35 {offsets = [0, 0], sizes = [256, 8], strides = [1, 1]} : vector<256x128xf32> to vector<256x8xf32>
    %37 = arith.truncf %36 : vector<256x8xf32> to vector<256x8xbf16>
    %c3 = arith.constant 3 : index
    %c0_41 = arith.constant 0 : index
    %c0_42 = arith.constant 0 : index
    %38 = vector.load %arg2[%c3, %c0_41, %c0_42] : memref<9x8x128xbf16, #tpu.memory_space<vmem>>, vector<1x8x128xbf16>
    %39 = vector.shape_cast %38 : vector<1x8x128xbf16> to vector<8x128xbf16>
    %cst_43 = arith.constant dense<0.000000e+00> : vector<256x128xf32>
    %40 = tpu.matmul %37, %39, %cst_43 {dimension_numbers = #tpu.dot_dimension_numbers<[1], [0], [0], [1], [0, 0, 1, 1], [], []>} : vector<256x8xbf16>, vector<8x128xbf16>, vector<256x128xf32> -> vector<256x128xf32>
    %41 = arith.addf %33, %40 : vector<256x128xf32>
    %c1_44 = arith.constant 1 : index
    %c1_45 = arith.constant 1 : index
    %c0_46 = arith.constant 0 : index
    %42 = vector.load %arg7[%c1_44, %c1_45, %c0_46] : memref<18x24x128xf32, #tpu.memory_space<vmem>>, vector<16x16x128xf32>
    %43 = vector.shape_cast %42 : vector<16x16x128xf32> to vector<256x128xf32>
    %44 = vector.extract_strided_slice %43 {offsets = [0, 0], sizes = [256, 8], strides = [1, 1]} : vector<256x128xf32> to vector<256x8xf32>
    %45 = arith.truncf %44 : vector<256x8xf32> to vector<256x8xbf16>
    %c4 = arith.constant 4 : index
    %c0_47 = arith.constant 0 : index
    %c0_48 = arith.constant 0 : index
    %46 = vector.load %arg2[%c4, %c0_47, %c0_48] : memref<9x8x128xbf16, #tpu.memory_space<vmem>>, vector<1x8x128xbf16>
    %47 = vector.shape_cast %46 : vector<1x8x128xbf16> to vector<8x128xbf16>
    %cst_49 = arith.constant dense<0.000000e+00> : vector<256x128xf32>
    %48 = tpu.matmul %45, %47, %cst_49 {dimension_numbers = #tpu.dot_dimension_numbers<[1], [0], [0], [1], [0, 0, 1, 1], [], []>} : vector<256x8xbf16>, vector<8x128xbf16>, vector<256x128xf32> -> vector<256x128xf32>
    %49 = arith.addf %41, %48 : vector<256x128xf32>
    %c1_50 = arith.constant 1 : index
    %c2_51 = arith.constant 2 : index
    %c0_52 = arith.constant 0 : index
    %50 = vector.load %arg7[%c1_50, %c2_51, %c0_52] : memref<18x24x128xf32, #tpu.memory_space<vmem>>, vector<16x16x128xf32>
    %51 = vector.shape_cast %50 : vector<16x16x128xf32> to vector<256x128xf32>
    %52 = vector.extract_strided_slice %51 {offsets = [0, 0], sizes = [256, 8], strides = [1, 1]} : vector<256x128xf32> to vector<256x8xf32>
    %53 = arith.truncf %52 : vector<256x8xf32> to vector<256x8xbf16>
    %c5 = arith.constant 5 : index
    %c0_53 = arith.constant 0 : index
    %c0_54 = arith.constant 0 : index
    %54 = vector.load %arg2[%c5, %c0_53, %c0_54] : memref<9x8x128xbf16, #tpu.memory_space<vmem>>, vector<1x8x128xbf16>
    %55 = vector.shape_cast %54 : vector<1x8x128xbf16> to vector<8x128xbf16>
    %cst_55 = arith.constant dense<0.000000e+00> : vector<256x128xf32>
    %56 = tpu.matmul %53, %55, %cst_55 {dimension_numbers = #tpu.dot_dimension_numbers<[1], [0], [0], [1], [0, 0, 1, 1], [], []>} : vector<256x8xbf16>, vector<8x128xbf16>, vector<256x128xf32> -> vector<256x128xf32>
    %57 = arith.addf %49, %56 : vector<256x128xf32>
    %c2_56 = arith.constant 2 : index
    %c0_57 = arith.constant 0 : index
    %c0_58 = arith.constant 0 : index
    %58 = vector.load %arg7[%c2_56, %c0_57, %c0_58] : memref<18x24x128xf32, #tpu.memory_space<vmem>>, vector<16x16x128xf32>
    %59 = vector.shape_cast %58 : vector<16x16x128xf32> to vector<256x128xf32>
    %60 = vector.extract_strided_slice %59 {offsets = [0, 0], sizes = [256, 8], strides = [1, 1]} : vector<256x128xf32> to vector<256x8xf32>
    %61 = arith.truncf %60 : vector<256x8xf32> to vector<256x8xbf16>
    %c6 = arith.constant 6 : index
    %c0_59 = arith.constant 0 : index
    %c0_60 = arith.constant 0 : index
    %62 = vector.load %arg2[%c6, %c0_59, %c0_60] : memref<9x8x128xbf16, #tpu.memory_space<vmem>>, vector<1x8x128xbf16>
    %63 = vector.shape_cast %62 : vector<1x8x128xbf16> to vector<8x128xbf16>
    %cst_61 = arith.constant dense<0.000000e+00> : vector<256x128xf32>
    %64 = tpu.matmul %61, %63, %cst_61 {dimension_numbers = #tpu.dot_dimension_numbers<[1], [0], [0], [1], [0, 0, 1, 1], [], []>} : vector<256x8xbf16>, vector<8x128xbf16>, vector<256x128xf32> -> vector<256x128xf32>
    %65 = arith.addf %57, %64 : vector<256x128xf32>
    %c2_62 = arith.constant 2 : index
    %c1_63 = arith.constant 1 : index
    %c0_64 = arith.constant 0 : index
    %66 = vector.load %arg7[%c2_62, %c1_63, %c0_64] : memref<18x24x128xf32, #tpu.memory_space<vmem>>, vector<16x16x128xf32>
    %67 = vector.shape_cast %66 : vector<16x16x128xf32> to vector<256x128xf32>
    %68 = vector.extract_strided_slice %67 {offsets = [0, 0], sizes = [256, 8], strides = [1, 1]} : vector<256x128xf32> to vector<256x8xf32>
    %69 = arith.truncf %68 : vector<256x8xf32> to vector<256x8xbf16>
    %c7 = arith.constant 7 : index
    %c0_65 = arith.constant 0 : index
    %c0_66 = arith.constant 0 : index
    %70 = vector.load %arg2[%c7, %c0_65, %c0_66] : memref<9x8x128xbf16, #tpu.memory_space<vmem>>, vector<1x8x128xbf16>
    %71 = vector.shape_cast %70 : vector<1x8x128xbf16> to vector<8x128xbf16>
    %cst_67 = arith.constant dense<0.000000e+00> : vector<256x128xf32>
    %72 = tpu.matmul %69, %71, %cst_67 {dimension_numbers = #tpu.dot_dimension_numbers<[1], [0], [0], [1], [0, 0, 1, 1], [], []>} : vector<256x8xbf16>, vector<8x128xbf16>, vector<256x128xf32> -> vector<256x128xf32>
    %73 = arith.addf %65, %72 : vector<256x128xf32>
    %c2_68 = arith.constant 2 : index
    %c2_69 = arith.constant 2 : index
    %c0_70 = arith.constant 0 : index
    %74 = vector.load %arg7[%c2_68, %c2_69, %c0_70] : memref<18x24x128xf32, #tpu.memory_space<vmem>>, vector<16x16x128xf32>
    %75 = vector.shape_cast %74 : vector<16x16x128xf32> to vector<256x128xf32>
    %76 = vector.extract_strided_slice %75 {offsets = [0, 0], sizes = [256, 8], strides = [1, 1]} : vector<256x128xf32> to vector<256x8xf32>
    %77 = arith.truncf %76 : vector<256x8xf32> to vector<256x8xbf16>
    %c8 = arith.constant 8 : index
    %c0_71 = arith.constant 0 : index
    %c0_72 = arith.constant 0 : index
    %78 = vector.load %arg2[%c8, %c0_71, %c0_72] : memref<9x8x128xbf16, #tpu.memory_space<vmem>>, vector<1x8x128xbf16>
    %79 = vector.shape_cast %78 : vector<1x8x128xbf16> to vector<8x128xbf16>
    %cst_73 = arith.constant dense<0.000000e+00> : vector<256x128xf32>
    %80 = tpu.matmul %77, %79, %cst_73 {dimension_numbers = #tpu.dot_dimension_numbers<[1], [0], [0], [1], [0, 0, 1, 1], [], []>} : vector<256x8xbf16>, vector<8x128xbf16>, vector<256x128xf32> -> vector<256x128xf32>
    %81 = arith.addf %73, %80 : vector<256x128xf32>
    %c0_74 = arith.constant 0 : index
    %c0_75 = arith.constant 0 : index
    %82 = vector.load %arg3[%c0_74, %c0_75] : memref<1x128xf32, #tpu.memory_space<vmem>>, vector<1x128xf32>
    %83 = vector.broadcast %82 : vector<1x128xf32> to vector<256x128xf32>
    %84 = arith.addf %81, %83 : vector<256x128xf32>
    %cst_76 = arith.constant 0.000000e+00 : f32
    %85 = vector.broadcast %cst_76 : f32 to vector<256x128xf32>
    %86 = arith.maximumf %84, %85 : vector<256x128xf32>
    %87 = vector.shape_cast %86 : vector<256x128xf32> to vector<16x16x128xf32>
    %c1_77 = arith.constant 1 : index
    %c1_78 = arith.constant 1 : index
    %c0_79 = arith.constant 0 : index
    %88 = vector.load %arg7[%c1_77, %c1_78, %c0_79] : memref<18x24x128xf32, #tpu.memory_space<vmem>>, vector<16x16x128xf32>
    tpu.vector_store %arg7[%c1_77, %c1_78, %c0_79], %87 {strides = array<i32>} : memref<18x24x128xf32, #tpu.memory_space<vmem>>, vector<16x16x128xf32>,
    %cst_80 = arith.constant 0.000000e+00 : f32
    %89 = vector.broadcast %cst_80 : f32 to vector<256x128xf32>
    %c0_81 = arith.constant 0 : index
    %c0_82 = arith.constant 0 : index
    %c0_83 = arith.constant 0 : index
    %90 = vector.load %arg7[%c0_81, %c0_82, %c0_83] : memref<18x24x128xf32, #tpu.memory_space<vmem>>, vector<16x16x128xf32>
    %91 = vector.shape_cast %90 : vector<16x16x128xf32> to vector<256x128xf32>
    %92 = vector.extract_strided_slice %91 {offsets = [0, 0], sizes = [256, 8], strides = [1, 1]} : vector<256x128xf32> to vector<256x8xf32>
    %93 = arith.truncf %92 : vector<256x8xf32> to vector<256x8xbf16>
    %c0_84 = arith.constant 0 : index
    %c0_85 = arith.constant 0 : index
    %c0_86 = arith.constant 0 : index
    %94 = vector.load %arg4[%c0_84, %c0_85, %c0_86] : memref<9x8x128xbf16, #tpu.memory_space<vmem>>, vector<1x8x128xbf16>
    %95 = vector.shape_cast %94 : vector<1x8x128xbf16> to vector<8x128xbf16>
    %cst_87 = arith.constant dense<0.000000e+00> : vector<256x128xf32>
    %96 = tpu.matmul %93, %95, %cst_87 {dimension_numbers = #tpu.dot_dimension_numbers<[1], [0], [0], [1], [0, 0, 1, 1], [], []>} : vector<256x8xbf16>, vector<8x128xbf16>, vector<256x128xf32> -> vector<256x128xf32>
    %97 = arith.addf %89, %96 : vector<256x128xf32>
    %c0_88 = arith.constant 0 : index
    %c1_89 = arith.constant 1 : index
    %c0_90 = arith.constant 0 : index
    %98 = vector.load %arg7[%c0_88, %c1_89, %c0_90] : memref<18x24x128xf32, #tpu.memory_space<vmem>>, vector<16x16x128xf32>
    %99 = vector.shape_cast %98 : vector<16x16x128xf32> to vector<256x128xf32>
    %100 = vector.extract_strided_slice %99 {offsets = [0, 0], sizes = [256, 8], strides = [1, 1]} : vector<256x128xf32> to vector<256x8xf32>
    %101 = arith.truncf %100 : vector<256x8xf32> to vector<256x8xbf16>
    %c1_91 = arith.constant 1 : index
    %c0_92 = arith.constant 0 : index
    %c0_93 = arith.constant 0 : index
    %102 = vector.load %arg4[%c1_91, %c0_92, %c0_93] : memref<9x8x128xbf16, #tpu.memory_space<vmem>>, vector<1x8x128xbf16>
    %103 = vector.shape_cast %102 : vector<1x8x128xbf16> to vector<8x128xbf16>
    %cst_94 = arith.constant dense<0.000000e+00> : vector<256x128xf32>
    %104 = tpu.matmul %101, %103, %cst_94 {dimension_numbers = #tpu.dot_dimension_numbers<[1], [0], [0], [1], [0, 0, 1, 1], [], []>} : vector<256x8xbf16>, vector<8x128xbf16>, vector<256x128xf32> -> vector<256x128xf32>
    %105 = arith.addf %97, %104 : vector<256x128xf32>
    %c0_95 = arith.constant 0 : index
    %c2_96 = arith.constant 2 : index
    %c0_97 = arith.constant 0 : index
    %106 = vector.load %arg7[%c0_95, %c2_96, %c0_97] : memref<18x24x128xf32, #tpu.memory_space<vmem>>, vector<16x16x128xf32>
    %107 = vector.shape_cast %106 : vector<16x16x128xf32> to vector<256x128xf32>
    %108 = vector.extract_strided_slice %107 {offsets = [0, 0], sizes = [256, 8], strides = [1, 1]} : vector<256x128xf32> to vector<256x8xf32>
    %109 = arith.truncf %108 : vector<256x8xf32> to vector<256x8xbf16>
    %c2_98 = arith.constant 2 : index
    %c0_99 = arith.constant 0 : index
    %c0_100 = arith.constant 0 : index
    %110 = vector.load %arg4[%c2_98, %c0_99, %c0_100] : memref<9x8x128xbf16, #tpu.memory_space<vmem>>, vector<1x8x128xbf16>
    %111 = vector.shape_cast %110 : vector<1x8x128xbf16> to vector<8x128xbf16>
    %cst_101 = arith.constant dense<0.000000e+00> : vector<256x128xf32>
    %112 = tpu.matmul %109, %111, %cst_101 {dimension_numbers = #tpu.dot_dimension_numbers<[1], [0], [0], [1], [0, 0, 1, 1], [], []>} : vector<256x8xbf16>, vector<8x128xbf16>, vector<256x128xf32> -> vector<256x128xf32>
    %113 = arith.addf %105, %112 : vector<256x128xf32>
    %c1_102 = arith.constant 1 : index
    %c0_103 = arith.constant 0 : index
    %c0_104 = arith.constant 0 : index
    %114 = vector.load %arg7[%c1_102, %c0_103, %c0_104] : memref<18x24x128xf32, #tpu.memory_space<vmem>>, vector<16x16x128xf32>
    %115 = vector.shape_cast %114 : vector<16x16x128xf32> to vector<256x128xf32>
    %116 = vector.extract_strided_slice %115 {offsets = [0, 0], sizes = [256, 8], strides = [1, 1]} : vector<256x128xf32> to vector<256x8xf32>
    %117 = arith.truncf %116 : vector<256x8xf32> to vector<256x8xbf16>
    %c3_105 = arith.constant 3 : index
    %c0_106 = arith.constant 0 : index
    %c0_107 = arith.constant 0 : index
    %118 = vector.load %arg4[%c3_105, %c0_106, %c0_107] : memref<9x8x128xbf16, #tpu.memory_space<vmem>>, vector<1x8x128xbf16>
    %119 = vector.shape_cast %118 : vector<1x8x128xbf16> to vector<8x128xbf16>
    %cst_108 = arith.constant dense<0.000000e+00> : vector<256x128xf32>
    %120 = tpu.matmul %117, %119, %cst_108 {dimension_numbers = #tpu.dot_dimension_numbers<[1], [0], [0], [1], [0, 0, 1, 1], [], []>} : vector<256x8xbf16>, vector<8x128xbf16>, vector<256x128xf32> -> vector<256x128xf32>
    %121 = arith.addf %113, %120 : vector<256x128xf32>
    %c1_109 = arith.constant 1 : index
    %c1_110 = arith.constant 1 : index
    %c0_111 = arith.constant 0 : index
    %122 = vector.load %arg7[%c1_109, %c1_110, %c0_111] : memref<18x24x128xf32, #tpu.memory_space<vmem>>, vector<16x16x128xf32>
    %123 = vector.shape_cast %122 : vector<16x16x128xf32> to vector<256x128xf32>
    %124 = vector.extract_strided_slice %123 {offsets = [0, 0], sizes = [256, 8], strides = [1, 1]} : vector<256x128xf32> to vector<256x8xf32>
    %125 = arith.truncf %124 : vector<256x8xf32> to vector<256x8xbf16>
    %c4_112 = arith.constant 4 : index
    %c0_113 = arith.constant 0 : index
    %c0_114 = arith.constant 0 : index
    %126 = vector.load %arg4[%c4_112, %c0_113, %c0_114] : memref<9x8x128xbf16, #tpu.memory_space<vmem>>, vector<1x8x128xbf16>
    %127 = vector.shape_cast %126 : vector<1x8x128xbf16> to vector<8x128xbf16>
    %cst_115 = arith.constant dense<0.000000e+00> : vector<256x128xf32>
    %128 = tpu.matmul %125, %127, %cst_115 {dimension_numbers = #tpu.dot_dimension_numbers<[1], [0], [0], [1], [0, 0, 1, 1], [], []>} : vector<256x8xbf16>, vector<8x128xbf16>, vector<256x128xf32> -> vector<256x128xf32>
    %129 = arith.addf %121, %128 : vector<256x128xf32>
    %c1_116 = arith.constant 1 : index
    %c2_117 = arith.constant 2 : index
    %c0_118 = arith.constant 0 : index
    %130 = vector.load %arg7[%c1_116, %c2_117, %c0_118] : memref<18x24x128xf32, #tpu.memory_space<vmem>>, vector<16x16x128xf32>
    %131 = vector.shape_cast %130 : vector<16x16x128xf32> to vector<256x128xf32>
    %132 = vector.extract_strided_slice %131 {offsets = [0, 0], sizes = [256, 8], strides = [1, 1]} : vector<256x128xf32> to vector<256x8xf32>
    %133 = arith.truncf %132 : vector<256x8xf32> to vector<256x8xbf16>
    %c5_119 = arith.constant 5 : index
    %c0_120 = arith.constant 0 : index
    %c0_121 = arith.constant 0 : index
    %134 = vector.load %arg4[%c5_119, %c0_120, %c0_121] : memref<9x8x128xbf16, #tpu.memory_space<vmem>>, vector<1x8x128xbf16>
    %135 = vector.shape_cast %134 : vector<1x8x128xbf16> to vector<8x128xbf16>
    %cst_122 = arith.constant dense<0.000000e+00> : vector<256x128xf32>
    %136 = tpu.matmul %133, %135, %cst_122 {dimension_numbers = #tpu.dot_dimension_numbers<[1], [0], [0], [1], [0, 0, 1, 1], [], []>} : vector<256x8xbf16>, vector<8x128xbf16>, vector<256x128xf32> -> vector<256x128xf32>
    %137 = arith.addf %129, %136 : vector<256x128xf32>
    %c2_123 = arith.constant 2 : index
    %c0_124 = arith.constant 0 : index
    %c0_125 = arith.constant 0 : index
    %138 = vector.load %arg7[%c2_123, %c0_124, %c0_125] : memref<18x24x128xf32, #tpu.memory_space<vmem>>, vector<16x16x128xf32>
    %139 = vector.shape_cast %138 : vector<16x16x128xf32> to vector<256x128xf32>
    %140 = vector.extract_strided_slice %139 {offsets = [0, 0], sizes = [256, 8], strides = [1, 1]} : vector<256x128xf32> to vector<256x8xf32>
    %141 = arith.truncf %140 : vector<256x8xf32> to vector<256x8xbf16>
    %c6_126 = arith.constant 6 : index
    %c0_127 = arith.constant 0 : index
    %c0_128 = arith.constant 0 : index
    %142 = vector.load %arg4[%c6_126, %c0_127, %c0_128] : memref<9x8x128xbf16, #tpu.memory_space<vmem>>, vector<1x8x128xbf16>
    %143 = vector.shape_cast %142 : vector<1x8x128xbf16> to vector<8x128xbf16>
    %cst_129 = arith.constant dense<0.000000e+00> : vector<256x128xf32>
    %144 = tpu.matmul %141, %143, %cst_129 {dimension_numbers = #tpu.dot_dimension_numbers<[1], [0], [0], [1], [0, 0, 1, 1], [], []>} : vector<256x8xbf16>, vector<8x128xbf16>, vector<256x128xf32> -> vector<256x128xf32>
    %145 = arith.addf %137, %144 : vector<256x128xf32>
    %c2_130 = arith.constant 2 : index
    %c1_131 = arith.constant 1 : index
    %c0_132 = arith.constant 0 : index
    %146 = vector.load %arg7[%c2_130, %c1_131, %c0_132] : memref<18x24x128xf32, #tpu.memory_space<vmem>>, vector<16x16x128xf32>
    %147 = vector.shape_cast %146 : vector<16x16x128xf32> to vector<256x128xf32>
    %148 = vector.extract_strided_slice %147 {offsets = [0, 0], sizes = [256, 8], strides = [1, 1]} : vector<256x128xf32> to vector<256x8xf32>
    %149 = arith.truncf %148 : vector<256x8xf32> to vector<256x8xbf16>
    %c7_133 = arith.constant 7 : index
    %c0_134 = arith.constant 0 : index
    %c0_135 = arith.constant 0 : index
    %150 = vector.load %arg4[%c7_133, %c0_134, %c0_135] : memref<9x8x128xbf16, #tpu.memory_space<vmem>>, vector<1x8x128xbf16>
    %151 = vector.shape_cast %150 : vector<1x8x128xbf16> to vector<8x128xbf16>
    %cst_136 = arith.constant dense<0.000000e+00> : vector<256x128xf32>
    %152 = tpu.matmul %149, %151, %cst_136 {dimension_numbers = #tpu.dot_dimension_numbers<[1], [0], [0], [1], [0, 0, 1, 1], [], []>} : vector<256x8xbf16>, vector<8x128xbf16>, vector<256x128xf32> -> vector<256x128xf32>
    %153 = arith.addf %145, %152 : vector<256x128xf32>
    %c2_137 = arith.constant 2 : index
    %c2_138 = arith.constant 2 : index
    %c0_139 = arith.constant 0 : index
    %154 = vector.load %arg7[%c2_137, %c2_138, %c0_139] : memref<18x24x128xf32, #tpu.memory_space<vmem>>, vector<16x16x128xf32>
    %155 = vector.shape_cast %154 : vector<16x16x128xf32> to vector<256x128xf32>
    %156 = vector.extract_strided_slice %155 {offsets = [0, 0], sizes = [256, 8], strides = [1, 1]} : vector<256x128xf32> to vector<256x8xf32>
    %157 = arith.truncf %156 : vector<256x8xf32> to vector<256x8xbf16>
    %c8_140 = arith.constant 8 : index
    %c0_141 = arith.constant 0 : index
    %c0_142 = arith.constant 0 : index
    %158 = vector.load %arg4[%c8_140, %c0_141, %c0_142] : memref<9x8x128xbf16, #tpu.memory_space<vmem>>, vector<1x8x128xbf16>
    %159 = vector.shape_cast %158 : vector<1x8x128xbf16> to vector<8x128xbf16>
    %cst_143 = arith.constant dense<0.000000e+00> : vector<256x128xf32>
    %160 = tpu.matmul %157, %159, %cst_143 {dimension_numbers = #tpu.dot_dimension_numbers<[1], [0], [0], [1], [0, 0, 1, 1], [], []>} : vector<256x8xbf16>, vector<8x128xbf16>, vector<256x128xf32> -> vector<256x128xf32>
    %161 = arith.addf %153, %160 : vector<256x128xf32>
    %c0_144 = arith.constant 0 : index
    %c0_145 = arith.constant 0 : index
    %162 = vector.load %arg5[%c0_144, %c0_145] : memref<1x128xf32, #tpu.memory_space<vmem>>, vector<1x128xf32>
    %163 = vector.broadcast %162 : vector<1x128xf32> to vector<256x128xf32>
    %164 = arith.addf %161, %163 : vector<256x128xf32>
    %165 = vector.shape_cast %164 : vector<256x128xf32> to vector<16x16x128xf32>
    %c0_146 = arith.constant 0 : index
    %c0_147 = arith.constant 0 : index
    %c0_148 = arith.constant 0 : index
    %c0_149 = arith.constant 0 : index
    %166 = vector.load %arg1[%c0_146, %c0_147, %c0_148, %c0_149] : memref<1x16x16x128xf32, #tpu.memory_space<vmem>>, vector<1x16x16x128xf32>
    %167 = vector.shape_cast %166 : vector<1x16x16x128xf32> to vector<16x16x128xf32>
    %168 = arith.addf %165, %167 : vector<16x16x128xf32>
    %cst_150 = arith.constant 0.000000e+00 : f32
    %169 = vector.broadcast %cst_150 : f32 to vector<16x16x128xf32>
    %170 = arith.maximumf %168, %169 : vector<16x16x128xf32>
    %c0_151 = arith.constant 0 : index
    %c0_152 = arith.constant 0 : index
    %c0_153 = arith.constant 0 : index
    %c0_154 = arith.constant 0 : index
    %171 = vector.load %arg6[%c0_151, %c0_152, %c0_153, %c0_154] : memref<1x16x16x128xf32, #tpu.memory_space<vmem>>, vector<1x16x16x128xf32>
    %172 = vector.shape_cast %171 : vector<1x16x16x128xf32> to vector<16x16x128xf32>
    %173 = vector.shape_cast %170 : vector<16x16x128xf32> to vector<1x16x16x128xf32>
    tpu.vector_store %arg6[%c0_151, %c0_152, %c0_153, %c0_154], %173 {strides = array<i32>} : memref<1x16x16x128xf32, #tpu.memory_space<vmem>>, vector<1x16x16x128xf32>,
    return
  }
  func.func @transform_0(%arg0: i32) -> (i32, i32, i32, i32) {
    %c0_i32 = arith.constant 0 : i32
    %c0_i32_0 = arith.constant 0 : i32
    %c0_i32_1 = arith.constant 0 : i32
    %c0_i32_2 = arith.constant 0 : i32
    return %arg0, %c0_i32, %c0_i32_0, %c0_i32_1 : i32, i32, i32, i32
  }
  func.func @transform_1(%arg0: i32) -> (i32, i32, i32) {
    %c0_i32 = arith.constant 0 : i32
    %c0_i32_0 = arith.constant 0 : i32
    %c0_i32_1 = arith.constant 0 : i32
    %c0_i32_2 = arith.constant 0 : i32
    return %c0_i32, %c0_i32_0, %c0_i32_1 : i32, i32, i32
  }
  func.func @transform_2(%arg0: i32) -> (i32, i32) {
    %c0_i32 = arith.constant 0 : i32
    %c0_i32_0 = arith.constant 0 : i32
    %c0_i32_1 = arith.constant 0 : i32
    return %c0_i32, %c0_i32_0 : i32, i32
  }
  func.func @transform_3(%arg0: i32) -> (i32, i32, i32) {
    %c0_i32 = arith.constant 0 : i32
    %c0_i32_0 = arith.constant 0 : i32
    %c0_i32_1 = arith.constant 0 : i32
    %c0_i32_2 = arith.constant 0 : i32
    return %c0_i32, %c0_i32_0, %c0_i32_1 : i32, i32, i32
  }
  func.func @transform_4(%arg0: i32) -> (i32, i32) {
    %c0_i32 = arith.constant 0 : i32
    %c0_i32_0 = arith.constant 0 : i32
    %c0_i32_1 = arith.constant 0 : i32
    return %c0_i32, %c0_i32_0 : i32, i32
  }
  func.func @transform_5(%arg0: i32) -> (i32, i32, i32, i32) {
    %c0_i32 = arith.constant 0 : i32
    %c0_i32_0 = arith.constant 0 : i32
    %c0_i32_1 = arith.constant 0 : i32
    %c0_i32_2 = arith.constant 0 : i32
    return %arg0, %c0_i32, %c0_i32_0, %c0_i32_1 : i32, i32, i32, i32
  }
}

</mosaic_0001>

<bundles_post_ra>
// kernel: tpu_custom_call.1
= control target key start
LH: loop header
LB: loop body
LE: loop exit
PB: predicated region body
PF: predicated region fallthrough
CT: control target
= control target key end

     0   :  { %10 = vsyncpa [#allocation4], 0  ;;  %s9171_s0 = inlined_call_operand.hbm [shape: f32[2,16,16,128], index: 0, kind: input, shape index: {}]   ;;  %s9172_s1 = inlined_call_operand.hbm [shape: bf16[9,8,128], index: 1, kind: input, shape index: {}]   ;;  %s9173_s2 = inlined_call_operand.vmem [shape: f32[1,128], index: 2, kind: input, shape index: {}]   ;;  %s9174_s3 = inlined_call_operand.hbm [shape: bf16[9,8,128], index: 3, kind: input, shape index: {}]   ;;  %s9175_s4 = inlined_call_operand.vmem [shape: f32[1,128], index: 4, kind: input, shape index: {}]   ;;  %s9176_s5 = inlined_call_operand.hbm [shape: f32[2,16,16,128], index: 5, kind: output, shape index: {}]  }
   0x1   :  { %12 = vsyncpa [#allocation4 + $0x1], 0 }
   0x2   :  { %13 = vsyncpa [#allocation7], 0 }
   0x3   :  { %14 = vsyncpa [#allocation5], 0 }
   0x4   :  { %16 = vsyncpa [#allocation5 + $0x1], 0  ;;  %s7951_s18 = smov 0   ;;  %s7953_s19 = smov 0  }
   0x5   :  { %s7955_s20 = smov 0   ;;  %s7957_s21 = smov 0  }
   0x6 LB: > { %s7972_s22 = sadd.s32 4294967295, %s7907_s21   ;;  %s5918_s23 = sadd.s32 4294967294, %s7907_s21   ;;  %s7907_s21 = sphi %s7957_s21, %s9196_s21   ;;  %s7903_s20 = sphi %s7955_s20, %s9195_s20   ;;  %s7899_s19 = sphi %s7953_s19, %s9194_s19   ;;  %s7895_s18 = sphi %s7951_s18, %s9193_s18  }
   0x7   : > { %p42_p0 = scmp.ne.s32.totalorder %s7899_s19, %s7895_s18  ;;  %p9177_p1 = scmp.eq.s32.totalorder %s7972_s22, 0 }
   0x8   : > { %p156_p3 = scmp.eq.s32.totalorder %s5918_s23, 1  ;;  %p5919_p5 = scmp.ge.s32.totalorder %s7907_s21, 1 }
   0x9   : > { %p7981_p4 = por %p9177_p1, %p42_p0  ;;  %p163_p7 = scmp.lt.s32.totalorder %s7907_s21, 3 }
   0xa   : > { %p7986_p6 = por %p156_p3, %p42_p0  ;;  %s7909_s27 = smov [#allocation6]  }
   0xb   : > { %s9180_s24 = scalar_select %p7981_p4, 1, 0 }
   0xc   : > { %s9181_s25 = scalar_select %p7986_p6, 1, 0 }
   0xd   : > { %p7991_p8 = pnand %p5919_p5, %p163_p7  ;;  %s175_s28 = sshll.u32 %s7909_s27, 4  ;;  %s7995_s28 = int_to_ptr.vmem [resolvable:$true] %s175_s28 }
   0xe   : > { %s7910_s30 = smov [#allocation8]   ;;  %s7751_s9 = scalar_lea.hbm %s9172_s1, 576 }
   0xf   : > { %p7688_p9 = pneg %p7991_p8  ;;  %s191_s6 = sshll.u32 %s7910_s30, 4  ;;  %s8006_s6 = int_to_ptr.vmem [resolvable:$true] %s191_s6 }
  0x10   : > { %p7752_p12 = scmp.ne.s32.totalorder %s9172_s1, %s7751_s9  ;;  %p7758_p5 = scmp.lt.u32.totalorder %s7751_s9, %s9172_s1 }
  0x11   : > { %p8002_p11 = pnand %p7688_p9, %p9177_p1 }
  0x13   : > { %p7753_p13 = pneg %p8002_p11 }
  0x15   : > { %p7754_p0 = pnand %p7753_p13, %p7752_p12 }
  0x17   : > { %p7755_p3 = pneg %p7754_p0 }
  0x19   : > { %p7760_p7 = pnand %p7758_p5, %p7755_p3 }
  0x1b   : > { %7763 = shalt.err (!%p7760_p7)
}
  0x1c   : > { %s7764_s14 = scalar_lea.vmem %s7995_s28, 576  ;;  %p7772_p2 = scmp.lt.s32.totalorder %s7995_s28, %s7995_s28 }
  0x1d   : > { %p7765_p9 = scmp.ne.s32.totalorder %s7995_s28, %s7764_s14  ;;  %p7773_p12 = scmp.lt.s32.totalorder %s7764_s14, %s7764_s14 }
  0x1f   : > { %p7767_p10 = pnand %p7765_p9, %p7753_p13  ;;  %p7774_p0 = por %p7773_p12, %p7772_p2 }
  0x21   : > { %p7768_p1 = pneg %p7767_p10 }
  0x23   : > { %p7775_p6 = pnand %p7774_p0, %p7768_p1 }
  0x25   : > { %7778 = shalt.err (!%p7775_p6)
}
  0x26   : > { %s7911_s15 = smov 64   ;;  %s7912_s16 = smov 4  }
  0x27   : > { %7691 = dma.hbm_to_vmem [thread:$0]  (!%p8002_p11), %s9172_s1, 576, %s7995_s28, [#allocation7], %s7911_s15, %s7911_s15, %s7912_s16  }
  0x28   : > { %s7779_s7 = scalar_lea.hbm %s9174_s3, 576 }
  0x29   : > { %p7780_p2 = scmp.ne.s32.totalorder %s9174_s3, %s7779_s7  ;;  %p7786_p10 = scmp.lt.u32.totalorder %s7779_s7, %s9174_s3 }
  0x2b   : > { %p7782_p1 = pnand %p7780_p2, %p7753_p13 }
  0x2d   : > { %p7783_p6 = pneg %p7782_p1 }
  0x2f   : > { %p7788_p3 = pnand %p7786_p10, %p7783_p6 }
  0x31   : > { %7791 = shalt.err (!%p7788_p3)
}
  0x32   : > { %s7792_s28 = scalar_lea.vmem %s8006_s6, 576  ;;  %p7800_p12 = scmp.lt.s32.totalorder %s8006_s6, %s8006_s6 }
  0x33   : > { %p7793_p5 = scmp.ne.s32.totalorder %s8006_s6, %s7792_s28  ;;  %p7801_p0 = scmp.lt.s32.totalorder %s7792_s28, %s7792_s28 }
  0x35   : > { %p7795_p7 = pnand %p7793_p5, %p7753_p13  ;;  %p7802_p2 = por %p7801_p0, %p7800_p12 }
  0x37   : > { %p7796_p9 = pneg %p7795_p7 }
  0x39   : > { %p7803_p1 = pnand %p7802_p2, %p7796_p9 }
  0x3b   : > { %7806 = shalt.err (!%p7803_p1)
}
  0x3c   : > { %7694 = dma.hbm_to_vmem [thread:$0]  (!%p8002_p11), %s9174_s3, 576, %s8006_s6, [#allocation7], %s7911_s15, %s7911_s15, %s7912_s16  }
  0x3d   : > { %s8061_s14 = sadd.s32 1, %s7907_s21   ;;  %s29_s29 = sadd.s32 1, %s7903_s20 }
  0x3e   : > { %s26_s17 = ssub.s32 %s7907_s21, %s8061_s14  ;;  %p36_p13 = scmp.ne.s32.totalorder %s7903_s20, %s7899_s19 }
  0x3f   : > { %p27_p6 = scmp.eq.s32.totalorder %s26_s17, 0  ;;  %p37_p10 = scmp.eq.s32.totalorder %s7907_s21, 0 }
  0x40   : > { %p9184_p3 = scmp.eq.s32.totalorder %s7972_s22, 1  ;;  %p7705_p7 = scmp.lt.s32.totalorder %s7907_s21, 2 }
  0x41   : > { %s8077_s27 = scalar_select %p27_p6, %s7903_s20, %s29_s29  }
  0x42   : > { %p8071_p5 = por %p9184_p3, %p36_p13  ;;  %p38_p9 = por %p37_p10, %p36_p13 }
  0x43   : > { %s208_s30 = sand.u32 1, %s7903_s20   ;;  %s6226_s6 = sshll.u32 %s7907_s21, 12 }
  0x44   : > { %s9185_s23 = scalar_select %p8071_p5, 1, 0 }
  0x45   : > { %s5923_s7 = sshll.u32 %s208_s30, 8  ;;  %s8084_s8 = scalar_lea.hbm %s9171_s0, %s6226_s6 }
  0x46   : > { %s212_s9 = scalar_lea.vmem [#allocation3], %s5923_s7  ;;  %p8088_p11 = pnand %p7705_p7, %p38_p9 }
  0x47   : > { %s219_s10 = sshll.u32 %s212_s9, 4  ;;  %s8092_s28 = scalar_lea.sflag [#allocation4], %s208_s30  ;;  %s8086_s10 = int_to_ptr.vmem [resolvable:$true] %s219_s10 }
  0x48   : > { %s7807_s12 = scalar_lea.hbm %s8084_s8, 4096  ;;  %p7809_p0 = pneg %p8088_p11 }
  0x49   : > { %p7808_p12 = scmp.ne.s32.totalorder %s8084_s8, %s7807_s12  ;;  %s7812_s17 = scalar_lea.hbm %s9171_s0, 8192 }
  0x4a   : > { %p7813_p13 = scmp.lt.u32.totalorder %s8084_s8, %s9171_s0  ;;  %p7814_p6 = scmp.lt.u32.totalorder %s7812_s17, %s7807_s12 }
  0x4b   : > { %p7810_p2 = pnand %p7809_p0, %p7808_p12  ;;  %p7816_p3 = scmp.lt.u32.totalorder %s7807_s12, %s8084_s8 }
  0x4c   : > { %p7815_p10 = por %p7814_p6, %p7813_p13 }
  0x4d   : > { %p7811_p1 = pneg %p7810_p2 }
  0x4e   : > { %p7817_p7 = por %p7816_p3, %p7815_p10 }
  0x50   : > { %p7818_p9 = pnand %p7817_p7, %p7811_p1 }
  0x52   : > { %7821 = shalt.err (!%p7818_p9)
}
  0x53   : > { %s7822_s30 = scalar_lea.vmem %s8086_s10, 4096  ;;  %s7913_s15 = smov [#allocation3]  }
  0x54   : > { %p7823_p12 = scmp.ne.s32.totalorder %s8086_s10, %s7822_s30  ;;  %s7827_s16 = sshll.u32 %s7913_s15, 4  ;;  %s7828_s16 = int_to_ptr.vmem [resolvable:$false] %s7827_s16 }
  0x55   : > { %s7829_s9 = scalar_lea.vmem %s7828_s16, 8192  ;;  %p7830_p4 = scmp.lt.s32.totalorder %s8086_s10, %s7828_s16 }
  0x56   : > { %p7825_p2 = pnand %p7823_p12, %p7809_p0  ;;  %p7831_p13 = scmp.lt.s32.totalorder %s7829_s9, %s7822_s30 }
  0x58   : > { %p7826_p5 = pneg %p7825_p2  ;;  %p7832_p6 = por %p7831_p13, %p7830_p4 }
  0x5a   : > { %p7833_p10 = pnand %p7832_p6, %p7826_p5 }
  0x5c   : > { %7836 = shalt.err (!%p7833_p10)
}
  0x5d   : > { %s7914_s12 = smov 128   ;;  %s7915_s13 = smov 8  }
  0x5e   : > { %7698 = dma.hbm_to_vmem [thread:$0]  (!%p8088_p11), %s8084_s8, 4096, %s8086_s10, %s8092_s28, %s7914_s12, %s7914_s12, %s7915_s13  }
  0x5f   : > { %231 = sbr.rel (%p7991_p8) target bundleno = 1656 (0x678), region = 40  ;;  %s8123_s29 = sand.u32 (!%p7991_p8), 1, %s7899_s19  }
  0x60   : > { %s5927_s17 = sshll.u32 (!%p7991_p8), %s8123_s29, 8  ;;  %s234_s7 = scalar_lea.sflag (!%p7991_p8), [#allocation4], %s8123_s29 }
  0x61   : > { %s8129_s6 = scalar_lea.vmem (!%p7991_p8), [#allocation3], %s5927_s17  ;;  %p9187_p4 = scmp.ne.s32.totalorder (!%p7991_p8), %s9180_s24, 0 }
  0x66   : > { %7882 = dma.done.wait (%p9187_p4), %s234_s7, 4096  }
  0x67   : > { %7884 = vsyncadd (%p9187_p4), %s234_s7, 4294963200  ;;  %p9188_p5 = scmp.eq.s32.totalorder %s7972_s22, 0 }
  0x69   : > { %7886 = dma.done.wait (%p9188_p5), [#allocation7], 1152   ;;  %p9189_p8 = pmov %p9188_p5 }
  0x6a   : > { %v7916_v0 = vmov 0.0   ;;  %vm525_vm0 = vcmask 1043456   ;;  %v475_v1 = vld [vmem:[#allocation6 + $0x4] sm:$0xf]  ;;  %v425_v2 = vld [vmem:[#allocation6] sm:$0xf] }
  0x6b   : > { %7888 = vsyncadd (%p9189_p8), [#allocation7], 4294966144  ;;  %273 = vst [vmem:[#allocation2] sm:$0xff] %v7916_v0  ;;  %v313_v3 = vld [vmem:[%s8129_s6] sm:$0xff]  ;;  %7658 = vmatprep.subr.msk.bf16.mxu0 %vm525_vm0, %v475_v1  ;;  %v527_v4 = vsel %vm525_vm0, %v475_v1, 0  ;;  %vm476_vm1 = vcmask 64512  }
  0x6c   : > { %274 = vst [vmem:[#allocation2 + $0x8] sm:$0xff] %v7916_v0  ;;  %275 = vst [vmem:[#allocation2 + $0x10] sm:$0xff] %v7916_v0  ;;  %v314_v7 = vld [vmem:[%s8129_s6 + $0x8] sm:$0xff]  ;;  %6535 = vmatpush3.bf16.msra.mxu0 %v527_v4  ;;  %v315_v10 = vld [vmem:[%s8129_s6 + $0x10] sm:$0xff]  ;;  %v739_v13 = vsel %vm525_vm0, %v425_v2, 0  ;;  %v7917_v54 = vmov 0.0|0.0  }
  0x6d   : > { %277 = vst [vmem:[#allocation2 + $0x198] sm:$0xff] %v7916_v0  ;;  %278 = vst [vmem:[#allocation2 + $0x1a0] sm:$0xff] %v7916_v0  ;;  %v8143_v9 = vpack.c.bf16 %v314_v7, %v313_v3  ;;  %v316_v11 = vld [vmem:[%s8129_s6 + $0x18] sm:$0xff]  ;;  %v317_v12 = vld [vmem:[%s8129_s6 + $0x20] sm:$0xff]  ;;  %7659 = vmatprep.subr.msk.bf16.mxu0 %vm525_vm0, %v425_v2  ;;  %s9030_s11 = scalar_lea.vmem [#allocation9], %s5927_s17  ;;  %s6227_s28 = sshll.u32 %s7972_s22, 12 }
  0x6e   : > { %279 = vst [vmem:[#allocation2 + $0x1a8] sm:$0xff] %v7916_v0  ;;  %281 = vst [vmem:[#allocation2 + $0x18] sm:$0x1] %v7916_v0  ;;  %v8150_v14 = vpack.c.bf16 %v316_v11, %v315_v10  ;;  %v318_v15 = vld [vmem:[%s8129_s6 + $0x28] sm:$0xff]  ;;  %v319_v16 = vld [vmem:[%s8129_s6 + $0x30] sm:$0xff]  ;;  %s5826_s30 = sshll.u32 %s9030_s11, 4  ;;  %s9122_s9 = scalar_lea.hbm %s9176_s5, %s6227_s28  ;;  %s9124_s30 = int_to_ptr.vmem [resolvable:$true] %s5826_s30 }
  0x6f   : > { %282 = vst [vmem:[#allocation2 + $0x30] sm:$0x1] %v7916_v0  ;;  %283 = vst [vmem:[#allocation2 + $0x48] sm:$0x1] %v7916_v0  ;;  %v320_v17 = vld [vmem:[%s8129_s6 + $0x38] sm:$0xff]  ;;  %v321_v18 = vld [vmem:[%s8129_s6 + $0x40] sm:$0xff]  ;;  %v8175_v33 = vpack.c.bf16 %v318_v15, %v317_v12 }
  0x70   : > { %284 = vst [vmem:[#allocation2 + $0x60] sm:$0x1] %v7916_v0  ;;  %285 = vst [vmem:[#allocation2 + $0x78] sm:$0x1] %v7916_v0  ;;  %v322_v19 = vld [vmem:[%s8129_s6 + $0x48] sm:$0xff]  ;;  %v323_v20 = vld [vmem:[%s8129_s6 + $0x50] sm:$0xff]  ;;  %v8180_v37 = vpack.c.bf16 %v320_v17, %v319_v16 }
  0x71   : > { %286 = vst [vmem:[#allocation2 + $0x90] sm:$0x1] %v7916_v0  ;;  %287 = vst [vmem:[#allocation2 + $0xa8] sm:$0x1] %v7916_v0  ;;  %v324_v21 = vld [vmem:[%s8129_s6 + $0x58] sm:$0xff]  ;;  %v325_v22 = vld [vmem:[%s8129_s6 + $0x60] sm:$0xff]  ;;  %v8191_v43 = vpack.c.bf16 %v322_v19, %v321_v18 }
  0x72   : > { %288 = vst [vmem:[#allocation2 + $0xc0] sm:$0x1] %v7916_v0  ;;  %289 = vst [vmem:[#allocation2 + $0xd8] sm:$0x1] %v7916_v0  ;;  %v326_v23 = vld [vmem:[%s8129_s6 + $0x68] sm:$0xff]  ;;  %v327_v24 = vld [vmem:[%s8129_s6 + $0x70] sm:$0xff]  ;;  %v8193_v44 = vpack.c.bf16 %v324_v21, %v323_v20 }
  0x73   : > { %290 = vst [vmem:[#allocation2 + $0xf0] sm:$0x1] %v7916_v0  ;;  %291 = vst [vmem:[#allocation2 + $0x108] sm:$0x1] %v7916_v0  ;;  %v426_v5 = vld [vmem:[#allocation2 + $0x1] sm:$0xff]  ;;  %v427_v6 = vld [vmem:[#allocation2 + $0x9] sm:$0xff]  ;;  %v8199_v45 = vpack.c.bf16 %v326_v23, %v325_v22 }
  0x74   : > { %292 = vst [vmem:[#allocation2 + $0x120] sm:$0x1] %v7916_v0  ;;  %293 = vst [vmem:[#allocation2 + $0x138] sm:$0x1] %v7916_v0  ;;  %v458_v8 = vpack.c.bf16 %v427_v6, %v426_v5  ;;  %v328_v25 = vld [vmem:[%s8129_s6 + $0x78] sm:$0xff]  ;;  %v329_v26 = vld [vmem:[%s8129_s6 + $0x80] sm:$0xff] }
  0x75   : > { %294 = vst [vmem:[#allocation2 + $0x150] sm:$0x1] %v7916_v0  ;;  %295 = vst [vmem:[#allocation2 + $0x168] sm:$0x1] %v7916_v0  ;;  %v330_v27 = vld [vmem:[%s8129_s6 + $0x88] sm:$0xff]  ;;  %v331_v28 = vld [vmem:[%s8129_s6 + $0x90] sm:$0xff]  ;;  %v8201_v46 = vpack.c.bf16 %v328_v25, %v327_v24 }
  0x76   : > { %296 = vst [vmem:[#allocation2 + $0x180] sm:$0x1] %v7916_v0  ;;  %297 = vst [vmem:[#allocation2 + $0x29] sm:$0x1] %v7916_v0  ;;  %6536 = vmatprep.mubr.msk.bf16.mxu0 %vm476_vm1, %v458_v8  ;;  %v332_v29 = vld [vmem:[%s8129_s6 + $0x98] sm:$0xff]  ;;  %v333_v30 = vld [vmem:[%s8129_s6 + $0xa0] sm:$0xff]  ;;  %v8207_v47 = vpack.c.bf16 %v330_v27, %v329_v26 }
  0x77   : > { %298 = vst [vmem:[#allocation2 + $0x41] sm:$0x1] %v7916_v0  ;;  %299 = vst [vmem:[#allocation2 + $0x59] sm:$0x1] %v7916_v0  ;;  %6537 = vmatmul.mubr.msk.bf16.vlgmr.msra.gmra.mrb[0].mxu0 %vm476_vm1, %v8143_v9  ;;  %v334_v31 = vld [vmem:[%s8129_s6 + $0xa8] sm:$0xff]  ;;  %v335_v32 = vld [vmem:[%s8129_s6 + $0xb0] sm:$0xff]  ;;  %v8209_v48 = vpack.c.bf16 %v332_v29, %v331_v28 }
  0x78   : > { %300 = vst [vmem:[#allocation2 + $0x71] sm:$0x1] %v7916_v0  ;;  %301 = vst [vmem:[#allocation2 + $0x89] sm:$0x1] %v7916_v0  ;;  %6569 = vmatpush3.bf16.msra.mxu0 %v739_v13  ;;  %6540 = vmatprep.mubr.msk.bf16.mxu0 %vm476_vm1, %v8150_v14  ;;  %v336_v34 = vld [vmem:[%s8129_s6 + $0xb8] sm:$0xff]  ;;  %v337_v35 = vld [vmem:[%s8129_s6 + $0xc0] sm:$0xff]  ;;  %v8215_v49 = vpack.c.bf16 %v334_v31, %v333_v30 }
  0x79   : > { %302 = vst [vmem:[#allocation2 + $0xa1] sm:$0x1] %v7916_v0  ;;  %303 = vst [vmem:[#allocation2 + $0xb9] sm:$0x1] %v7916_v0  ;;  %v338_v36 = vld [vmem:[%s8129_s6 + $0xc8] sm:$0xff]  ;;  %v339_v38 = vld [vmem:[%s8129_s6 + $0xd0] sm:$0xff]  ;;  %v8217_v50 = vpack.c.bf16 %v336_v34, %v335_v32 }
  0x7a   : > { %304 = vst [vmem:[#allocation2 + $0xd1] sm:$0x1] %v7916_v0  ;;  %305 = vst [vmem:[#allocation2 + $0xe9] sm:$0x1] %v7916_v0  ;;  %v340_v39 = vld [vmem:[%s8129_s6 + $0xd8] sm:$0xff]  ;;  %v341_v40 = vld [vmem:[%s8129_s6 + $0xe0] sm:$0xff]  ;;  %v8223_v51 = vpack.c.bf16 %v338_v36, %v337_v35 }
  0x7b   : > { %306 = vst [vmem:[#allocation2 + $0x101] sm:$0x1] %v7916_v0  ;;  %307 = vst [vmem:[#allocation2 + $0x119] sm:$0x1] %v7916_v0  ;;  %v342_v41 = vld [vmem:[%s8129_s6 + $0xe8] sm:$0xff]  ;;  %v8225_v52 = vpack.c.bf16 %v340_v39, %v339_v38  ;;  %s5813_s22 = scalar_lea.sflag [#allocation5], %s8123_s29 }
  0x7c   : > { %308 = vst [vmem:[#allocation2 + $0x131] sm:$0x1] %v7916_v0  ;;  %309 = vst [vmem:[#allocation2 + $0x149] sm:$0x1] %v7916_v0  ;;  %v951_v42 = vld [vmem:[#allocation6 + $0x8] sm:$0xf]  ;;  %v8231_v53 = vpack.c.bf16 %v342_v41, %v341_v40 }
  0x7d   : > { %310 = vst [vmem:[#allocation2 + $0x161] sm:$0x1] %v7916_v0  ;;  %311 = vst [vmem:[#allocation2 + $0x179] sm:$0x1] %v7916_v0  ;;  %7660 = vmatprep.subr.msk.bf16.mxu0 %vm525_vm0, %v951_v42  ;;  %v1001_v61 = vsel %vm525_vm0, %v951_v42, 0  ;;  %s7837_s12 = scalar_lea.vmem %s9124_s30, 4096 }
  0x7e   : > { %312 = vst [vmem:[#allocation2 + $0x191] sm:$0x1] %v7916_v0  ;;  %345 = vst [vmem:[#allocation2 + $0x19] sm:$0xff] %v313_v3  ;;  %v8242_v62 = vld [vmem:[#allocation6 + $0xc] sm:$0xf]  ;;  %p7838_p11 = scmp.ne.s32.totalorder %s9124_s30, %s7837_s12  ;;  %p9190_p0 = scmp.ne.s32.totalorder %s9185_s23, 0 }
  0x7f   : > { %346 = vst [vmem:[#allocation2 + $0x21] sm:$0xff] %v314_v7  ;;  %347 = vst [vmem:[#allocation2 + $0x31] sm:$0xff] %v315_v10  ;;  %6541 = vmatmul.mubr.msk.bf16.gmra.mrb[4].mxu0 %vm476_vm1, %v8175_v33  ;;  %s7918_s13 = smov [#allocation9]  }
  0x80   : > { %348 = vst [vmem:[#allocation2 + $0x39] sm:$0xff] %v316_v11  ;;  %349 = vst [vmem:[#allocation2 + $0x49] sm:$0xff] %v317_v12  ;;  %6544 = vmatprep.mubr.msk.bf16.mxu0 %vm476_vm1, %v8180_v37  ;;  %p7839_p1 = pnand %p7838_p11, %p9190_p0  ;;  %s7841_s17 = sshll.u32 %s7918_s13, 4  ;;  %s7842_s17 = int_to_ptr.vmem [resolvable:$false] %s7841_s17 }
  0x81   : > { %350 = vst [vmem:[#allocation2 + $0x51] sm:$0xff] %v318_v15  ;;  %351 = vst [vmem:[#allocation2 + $0x61] sm:$0xff] %v319_v16  ;;  %s7843_s7 = scalar_lea.vmem %s7842_s17, 8192  ;;  %p7844_p7 = scmp.lt.s32.totalorder %s9124_s30, %s7842_s17 }
  0x82   : > { %352 = vst [vmem:[#allocation2 + $0x69] sm:$0xff] %v320_v17  ;;  %353 = vst [vmem:[#allocation2 + $0x79] sm:$0xff] %v321_v18  ;;  %p7840_p3 = pneg %p7839_p1  ;;  %p7845_p9 = scmp.lt.s32.totalorder %s7843_s7, %s7837_s12 }
  0x83   : > { %354 = vst [vmem:[#allocation2 + $0x81] sm:$0xff] %v322_v19  ;;  %355 = vst [vmem:[#allocation2 + $0x91] sm:$0xff] %v323_v20 }
  0x84   : > { %356 = vst [vmem:[#allocation2 + $0x99] sm:$0xff] %v324_v21  ;;  %357 = vst [vmem:[#allocation2 + $0xa9] sm:$0xff] %v325_v22  ;;  %p7846_p12 = por %p7845_p9, %p7844_p7 }
  0x85   : > { %358 = vst [vmem:[#allocation2 + $0xb1] sm:$0xff] %v326_v23  ;;  %359 = vst [vmem:[#allocation2 + $0xc1] sm:$0xff] %v327_v24  ;;  %v379_v55 = vld [vmem:[#allocation2 + $0x18] sm:$0xff] }
  0x86   : > { %360 = vst [vmem:[#allocation2 + $0xc9] sm:$0xff] %v328_v25  ;;  %361 = vst [vmem:[#allocation2 + $0xd9] sm:$0xff] %v329_v26  ;;  %v380_v56 = vld [vmem:[#allocation2 + $0x20] sm:$0xff]  ;;  %v381_v57 = vld [vmem:[#allocation2 + $0x30] sm:$0xff]  ;;  %p7847_p2 = pnand %p7846_p12, %p7840_p3 }
  0x87   : > { %362 = vst [vmem:[#allocation2 + $0xe1] sm:$0xff] %v330_v27  ;;  %363 = vst [vmem:[#allocation2 + $0xf1] sm:$0xff] %v331_v28  ;;  %6545 = vmatmul.mubr.msk.bf16.gmra.mrb[8].mxu0 %vm476_vm1, %v8191_v43  ;;  %v382_v58 = vld [vmem:[#allocation2 + $0x38] sm:$0xff]  ;;  %v8237_v59 = vpack.c.bf16 %v380_v56, %v379_v55  ;;  %v383_v63 = vld [vmem:[#allocation2 + $0x48] sm:$0xff] }
  0x88   : > { %364 = vst [vmem:[#allocation2 + $0xf9] sm:$0xff] %v332_v29  ;;  %365 = vst [vmem:[#allocation2 + $0x109] sm:$0xff] %v333_v30  ;;  %6548 = vmatprep.mubr.msk.bf16.mxu0 %vm476_vm1, %v8193_v44  ;;  %v8239_v60 = vpack.c.bf16 %v382_v58, %v381_v57  ;;  %v384_v0 = vld [vmem:[#allocation2 + $0x50] sm:$0xff]  ;;  %v385_v1 = vld [vmem:[#allocation2 + $0x60] sm:$0xff] }
  0x89   : > { %366 = vst [vmem:[#allocation2 + $0x111] sm:$0xff] %v334_v31  ;;  %367 = vst [vmem:[#allocation2 + $0x121] sm:$0xff] %v335_v32  ;;  %v386_v2 = vld [vmem:[#allocation2 + $0x68] sm:$0xff]  ;;  %v8250_v3 = vpack.c.bf16 %v384_v0, %v383_v63  ;;  %v387_v5 = vld [vmem:[#allocation2 + $0x78] sm:$0xff] }
  0x8a   : > { %368 = vst [vmem:[#allocation2 + $0x129] sm:$0xff] %v336_v34  ;;  %369 = vst [vmem:[#allocation2 + $0x139] sm:$0xff] %v337_v35  ;;  %v8252_v4 = vpack.c.bf16 %v386_v2, %v385_v1  ;;  %v388_v6 = vld [vmem:[#allocation2 + $0x80] sm:$0xff]  ;;  %v389_v7 = vld [vmem:[#allocation2 + $0x90] sm:$0xff] }
  0x8b   : > { %370 = vst [vmem:[#allocation2 + $0x141] sm:$0xff] %v338_v36  ;;  %371 = vst [vmem:[#allocation2 + $0x151] sm:$0xff] %v339_v38  ;;  %v390_v8 = vld [vmem:[#allocation2 + $0x98] sm:$0xff]  ;;  %v8258_v10 = vpack.c.bf16 %v388_v6, %v387_v5  ;;  %v391_v12 = vld [vmem:[#allocation2 + $0xa8] sm:$0xff]  ;;  %v1295_v6 = vsel %vm525_vm0, %v8242_v62, 0 }
  0x8c   : > { %372 = vst [vmem:[#allocation2 + $0x159] sm:$0xff] %v340_v39  ;;  %373 = vst [vmem:[#allocation2 + $0x169] sm:$0xff] %v341_v40  ;;  %v8260_v11 = vpack.c.bf16 %v390_v8, %v389_v7  ;;  %v392_v13 = vld [vmem:[#allocation2 + $0xb0] sm:$0xff]  ;;  %v393_v15 = vld [vmem:[#allocation2 + $0xc0] sm:$0xff] }
  0x8d   : > { %374 = vst [vmem:[#allocation2 + $0x171] sm:$0xff] %v342_v41  ;;  %v394_v16 = vld [vmem:[#allocation2 + $0xc8] sm:$0xff]  ;;  %v8266_v17 = vpack.c.bf16 %v392_v13, %v391_v12  ;;  %v395_v19 = vld [vmem:[#allocation2 + $0xd8] sm:$0xff]  ;;  %v8295_v39 = vld [vmem:[%s8129_s6 + $0xf0] sm:$0xff] }
  0x8e   : > { %v8268_v18 = vpack.c.bf16 %v394_v16, %v393_v15  ;;  %v396_v20 = vld [vmem:[#allocation2 + $0xe0] sm:$0xff]  ;;  %v397_v21 = vld [vmem:[#allocation2 + $0xf0] sm:$0xff]  ;;  %v8298_v40 = vld [vmem:[%s8129_s6 + $0xf8] sm:$0xff]  ;;  %375 = vst [vmem:[#allocation2 + $0x181] sm:$0xff] %v8295_v39 }
  0x8f   : > { %6549 = vmatmul.mubr.msk.bf16.gmra.mrb[12].mxu0 %vm476_vm1, %v8199_v45  ;;  %v398_v22 = vld [vmem:[#allocation2 + $0xf8] sm:$0xff]  ;;  %v8274_v23 = vpack.c.bf16 %v396_v20, %v395_v19  ;;  %v399_v25 = vld [vmem:[#allocation2 + $0x108] sm:$0xff]  ;;  %376 = vst [vmem:[#allocation2 + $0x189] sm:$0xff] %v8298_v40  ;;  %v1539_v7 = vld [vmem:[#allocation6 + $0x10] sm:$0xf] }
  0x90   : > { %6552 = vmatprep.mubr.msk.bf16.mxu0 %vm476_vm1, %v8201_v46  ;;  %v8276_v24 = vpack.c.bf16 %v398_v22, %v397_v21  ;;  %v400_v26 = vld [vmem:[#allocation2 + $0x110] sm:$0xff]  ;;  %v401_v27 = vld [vmem:[#allocation2 + $0x120] sm:$0xff] }
  0x91   : > { %v402_v28 = vld [vmem:[#allocation2 + $0x128] sm:$0xff]  ;;  %v8282_v29 = vpack.c.bf16 %v400_v26, %v399_v25  ;;  %v403_v31 = vld [vmem:[#allocation2 + $0x138] sm:$0xff] }
  0x92   : > { %v8284_v30 = vpack.c.bf16 %v402_v28, %v401_v27  ;;  %v404_v32 = vld [vmem:[#allocation2 + $0x140] sm:$0xff]  ;;  %v405_v34 = vld [vmem:[#allocation2 + $0x150] sm:$0xff] }
  0x93   : > { %v406_v35 = vld [vmem:[#allocation2 + $0x158] sm:$0xff]  ;;  %v8290_v36 = vpack.c.bf16 %v404_v32, %v403_v31  ;;  %v407_v41 = vld [vmem:[#allocation2 + $0x168] sm:$0xff] }
  0x94   : > { %v8292_v38 = vpack.c.bf16 %v406_v35, %v405_v34  ;;  %v408_v42 = vld [vmem:[#allocation2 + $0x170] sm:$0xff]  ;;  %v902_v55 = vld [vmem:[#allocation2 + $0x2] sm:$0xff]  ;;  %v907_v1 = vld [vmem:[#allocation2 + $0x3a] sm:$0xff] }
  0x95   : > { %v903_v56 = vld [vmem:[#allocation2 + $0xa] sm:$0xff]  ;;  %v8306_v57 = vpack.c.bf16 %v408_v42, %v407_v41  ;;  %v905_v63 = vld [vmem:[#allocation2 + $0x22] sm:$0xff]  ;;  %v906_v0 = vld [vmem:[#allocation2 + $0x32] sm:$0xff] }
  0x96   : > { %v934_v58 = vpack.c.bf16 %v903_v56, %v902_v55  ;;  %v8313_v5 = vpack.c.bf16 %v907_v1, %v906_v0  ;;  %v908_v8 = vld [vmem:[#allocation2 + $0x4a] sm:$0xff]  ;;  %v909_v12 = vld [vmem:[#allocation2 + $0x52] sm:$0xff]  ;;  %v910_v13 = vld [vmem:[#allocation2 + $0x62] sm:$0xff] }
  0x97   : > { %6553 = vmatmul.mubr.msk.bf16.gmra.mrb[16].mxu0 %vm476_vm1, %v8207_v47  ;;  %v911_v15 = vld [vmem:[#allocation2 + $0x6a] sm:$0xff]  ;;  %v8322_v16 = vpack.c.bf16 %v909_v12, %v908_v8  ;;  %v913_v20 = vld [vmem:[#allocation2 + $0x82] sm:$0xff]  ;;  %v914_v21 = vld [vmem:[#allocation2 + $0x92] sm:$0xff] }
  0x98   : > { %6556 = vmatprep.mubr.msk.bf16.mxu0 %vm476_vm1, %v8209_v48  ;;  %v8324_v19 = vpack.c.bf16 %v911_v15, %v910_v13  ;;  %v915_v22 = vld [vmem:[#allocation2 + $0x9a] sm:$0xff]  ;;  %v916_v27 = vld [vmem:[#allocation2 + $0xaa] sm:$0xff]  ;;  %v917_v28 = vld [vmem:[#allocation2 + $0xb2] sm:$0xff] }
  0x99   : > { %v8332_v26 = vpack.c.bf16 %v915_v22, %v914_v21  ;;  %v918_v31 = vld [vmem:[#allocation2 + $0xc2] sm:$0xff]  ;;  %v919_v32 = vld [vmem:[#allocation2 + $0xca] sm:$0xff]  ;;  %v8338_v34 = vpack.c.bf16 %v917_v28, %v916_v27  ;;  %v920_v41 = vld [vmem:[#allocation2 + $0xda] sm:$0xff] }
  0x9a   : > { %v8340_v35 = vpack.c.bf16 %v919_v32, %v918_v31  ;;  %v921_v42 = vld [vmem:[#allocation2 + $0xe2] sm:$0xff]  ;;  %v922_v55 = vld [vmem:[#allocation2 + $0xf2] sm:$0xff]  ;;  %v923_v56 = vld [vmem:[#allocation2 + $0xfa] sm:$0xff]  ;;  %v1589_v32 = vsel %vm525_vm0, %v1539_v7, 0 }
  0x9b   : > { %v925_v0 = vld [vmem:[#allocation2 + $0x112] sm:$0xff]  ;;  %v926_v1 = vld [vmem:[#allocation2 + $0x122] sm:$0xff]  ;;  %v928_v13 = vld [vmem:[#allocation2 + $0x13a] sm:$0xff] }
  0x9c   : > { %v929_v15 = vld [vmem:[#allocation2 + $0x142] sm:$0xff]  ;;  %v932_v27 = vld [vmem:[#allocation2 + $0x16a] sm:$0xff]  ;;  %v933_v28 = vld [vmem:[#allocation2 + $0x172] sm:$0xff] }
  0x9d   : > { %v8362_v21 = vpack.c.bf16 %v929_v15, %v928_v13  ;;  %v8370_v31 = vpack.c.bf16 %v933_v28, %v932_v27 }
  0x9f   : > { %6557 = vmatmul.mubr.msk.bf16.gmra.mrb[20].mxu0 %vm476_vm1, %v8215_v49 }
  0xa0   : > { %6560 = vmatprep.mubr.msk.bf16.mxu0 %vm476_vm1, %v8217_v50 }
  0xa7   : > { %6561 = vmatmul.mubr.msk.bf16.gmra.mrb[24].mxu0 %vm476_vm1, %v8223_v51 }
  0xa8   : > { %6564 = vmatprep.mubr.msk.bf16.mxu0 %vm476_vm1, %v8225_v52 }
  0xaf   : > { %6565 = vmatmul.mubr.msk.bf16.gmra.mrb[28].mxu0 %vm476_vm1, %v8231_v53 }
  0xb0   : > { %6570 = vmatprep.mubr.msk.bf16.mxu0 %vm476_vm1, %v7917_v54 }
  0xb7   : > { %6571 = vmatmul.mubr.msk.bf16.vlgmr.msra.gmra.mrb[0].mxu0 %vm476_vm1, %v8237_v59 }
  0xb8   : > { %6603 = vmatpush3.bf16.msra.mxu0 %v1001_v61  ;;  %6574 = vmatprep.mubr.msk.bf16.mxu0 %vm476_vm1, %v8239_v60  ;;  %v904_v61 = vld [vmem:[#allocation2 + $0x1a] sm:$0xff] }
  0xb9   : > { %7661 = vmatprep.subr.msk.bf16.mxu0 %vm525_vm0, %v8242_v62  ;;  %v8311_v2 = vpack.c.bf16 %v905_v63, %v904_v61  ;;  %v912_v62 = vld [vmem:[#allocation2 + $0x7a] sm:$0xff]  ;;  %v8348_v61 = vpack.c.bf16 %v923_v56, %v922_v55  ;;  %v924_v63 = vld [vmem:[#allocation2 + $0x10a] sm:$0xff] }
  0xba   : > { %v8330_v25 = vpack.c.bf16 %v913_v20, %v912_v62  ;;  %v8354_v8 = vpack.c.bf16 %v925_v0, %v924_v63  ;;  %v930_v62 = vld [vmem:[#allocation2 + $0x152] sm:$0xff]  ;;  %v931_v20 = vld [vmem:[#allocation2 + $0x15a] sm:$0xff]  ;;  %v2128_v56 = vld [vmem:[#allocation6 + $0x18] sm:$0xf] }
  0xbb   : > { %v8364_v22 = vpack.c.bf16 %v931_v20, %v930_v62 }
  0xbf   : > { %6575 = vmatmul.mubr.msk.bf16.gmra.mrb[4].mxu0 %vm476_vm1, %v8250_v3 }
  0xc0   : > { %6578 = vmatprep.mubr.msk.bf16.mxu0 %vm476_vm1, %v8252_v4 }
  0xc7   : > { %6579 = vmatmul.mubr.msk.bf16.gmra.mrb[8].mxu0 %vm476_vm1, %v8258_v10 }
  0xc8   : > { %6582 = vmatprep.mubr.msk.bf16.mxu0 %vm476_vm1, %v8260_v11 }
  0xcf   : > { %6583 = vmatmul.mubr.msk.bf16.gmra.mrb[12].mxu0 %vm476_vm1, %v8266_v17 }
  0xd0   : > { %6586 = vmatprep.mubr.msk.bf16.mxu0 %vm476_vm1, %v8268_v18 }
  0xd7   : > { %6587 = vmatmul.mubr.msk.bf16.gmra.mrb[16].mxu0 %vm476_vm1, %v8274_v23 }
  0xd8   : > { %6590 = vmatprep.mubr.msk.bf16.mxu0 %vm476_vm1, %v8276_v24 }
  0xdf   : > { %6591 = vmatmul.mubr.msk.bf16.gmra.mrb[20].mxu0 %vm476_vm1, %v8282_v29 }
  0xe0   : > { %6594 = vmatprep.mubr.msk.bf16.mxu0 %vm476_vm1, %v8284_v30 }
  0xe7   : > { %6595 = vmatmul.mubr.msk.bf16.gmra.mrb[24].mxu0 %vm476_vm1, %v8290_v36 }
  0xe8   : > { %6598 = vmatprep.mubr.msk.bf16.mxu0 %vm476_vm1, %v8292_v38 }
  0xef   : > { %6599 = vmatmul.mubr.msk.bf16.gmra.mrb[28].mxu0 %vm476_vm1, %v8306_v57 }
  0xf0   : > { %6604 = vmatprep.mubr.msk.bf16.mxu0 %vm476_vm1, %v934_v58  ;;  %v8346_v58 = vpack.c.bf16 %v921_v42, %v920_v41  ;;  %v1833_v41 = vld [vmem:[#allocation6 + $0x14] sm:$0xf] }
  0xf1   : > { %v1883_v55 = vsel %vm525_vm0, %v1833_v41, 0 }
  0xf7   : > { %6605 = vmatmul.mubr.msk.bf16.vlgmr.msra.gmra.mrb[0].mxu0 %vm476_vm1, %v8311_v2 }
  0xf8   : > { %6637 = vmatpush3.bf16.msra.mxu0 %v1295_v6  ;;  %6608 = vmatprep.mubr.msk.bf16.mxu0 %vm476_vm1, %v8313_v5  ;;  %v927_v6 = vld [vmem:[#allocation2 + $0x12a] sm:$0xff] }
  0xf9   : > { %7662 = vmatprep.subr.msk.bf16.mxu0 %vm525_vm0, %v1539_v7  ;;  %v8356_v12 = vpack.c.bf16 %v927_v6, %v926_v1  ;;  %v1227_v7 = vld [vmem:[#allocation2 + $0x188] sm:$0xff] }
  0xff   : > { %6609 = vmatmul.mubr.msk.bf16.gmra.mrb[4].mxu0 %vm476_vm1, %v8322_v16 }
 0x100   : > { %6612 = vmatprep.mubr.msk.bf16.mxu0 %vm476_vm1, %v8324_v19 }
 0x107   : > { %6613 = vmatmul.mubr.msk.bf16.gmra.mrb[8].mxu0 %vm476_vm1, %v8330_v25 }
 0x108   : > { %6616 = vmatprep.mubr.msk.bf16.mxu0 %vm476_vm1, %v8332_v26 }
 0x10f   : > { %6617 = vmatmul.mubr.msk.bf16.gmra.mrb[12].mxu0 %vm476_vm1, %v8338_v34 }
 0x110   : > { %6620 = vmatprep.mubr.msk.bf16.mxu0 %vm476_vm1, %v8340_v35 }
 0x117   : > { %6621 = vmatmul.mubr.msk.bf16.gmra.mrb[16].mxu0 %vm476_vm1, %v8346_v58 }
 0x118   : > { %6624 = vmatprep.mubr.msk.bf16.mxu0 %vm476_vm1, %v8348_v61 }
 0x11f   : > { %6625 = vmatmul.mubr.msk.bf16.gmra.mrb[20].mxu0 %vm476_vm1, %v8354_v8 }
 0x120   : > { %6628 = vmatprep.mubr.msk.bf16.mxu0 %vm476_vm1, %v8356_v12 }
 0x127   : > { %6629 = vmatmul.mubr.msk.bf16.gmra.mrb[24].mxu0 %vm476_vm1, %v8362_v21 }
 0x128   : > { %6632 = vmatprep.mubr.msk.bf16.mxu0 %vm476_vm1, %v8364_v22 }
 0x12f   : > { %6633 = vmatmul.mubr.msk.bf16.gmra.mrb[28].mxu0 %vm476_vm1, %v8370_v31 }
 0x130   : > { %6638 = vmatprep.mubr.msk.bf16.mxu0 %vm476_vm1, %v8237_v59  ;;  %v1226_v59 = vld [vmem:[#allocation2 + $0x180] sm:$0xff] }
 0x131   : > { %v8406_v42 = vpack.c.bf16 %v1227_v7, %v1226_v59 }
 0x137   : > { %6639 = vmatmul.mubr.msk.bf16.vlgmr.msra.gmra.mrb[0].mxu0 %vm476_vm1, %v8239_v60 }
 0x138   : > { %6671 = vmatpush3.bf16.msra.mxu0 %v1589_v32  ;;  %6642 = vmatprep.mubr.msk.bf16.mxu0 %vm476_vm1, %v8250_v3 }
 0x139   : > { %7663 = vmatprep.subr.msk.bf16.mxu0 %vm525_vm0, %v1833_v41 }
 0x13f   : > { %6643 = vmatmul.mubr.msk.bf16.gmra.mrb[4].mxu0 %vm476_vm1, %v8252_v4 }
 0x140   : > { %6646 = vmatprep.mubr.msk.bf16.mxu0 %vm476_vm1, %v8258_v10 }
 0x147   : > { %6647 = vmatmul.mubr.msk.bf16.gmra.mrb[8].mxu0 %vm476_vm1, %v8260_v11 }
 0x148   : > { %6650 = vmatprep.mubr.msk.bf16.mxu0 %vm476_vm1, %v8266_v17 }
 0x14f   : > { %6651 = vmatmul.mubr.msk.bf16.gmra.mrb[12].mxu0 %vm476_vm1, %v8268_v18 }
 0x150   : > { %6654 = vmatprep.mubr.msk.bf16.mxu0 %vm476_vm1, %v8274_v23 }
 0x157   : > { %6655 = vmatmul.mubr.msk.bf16.gmra.mrb[16].mxu0 %vm476_vm1, %v8276_v24 }
 0x158   : > { %6658 = vmatprep.mubr.msk.bf16.mxu0 %vm476_vm1, %v8282_v29 }
 0x15f   : > { %6659 = vmatmul.mubr.msk.bf16.gmra.mrb[20].mxu0 %vm476_vm1, %v8284_v30 }
 0x160   : > { %6662 = vmatprep.mubr.msk.bf16.mxu0 %vm476_vm1, %v8290_v36 }
 0x167   : > { %6663 = vmatmul.mubr.msk.bf16.gmra.mrb[24].mxu0 %vm476_vm1, %v8292_v38 }
 0x168   : > { %6666 = vmatprep.mubr.msk.bf16.mxu0 %vm476_vm1, %v8306_v57 }
 0x16f   : > { %6667 = vmatmul.mubr.msk.bf16.gmra.mrb[28].mxu0 %vm476_vm1, %v8406_v42 }
 0x170   : > { %6672 = vmatprep.mubr.msk.bf16.mxu0 %vm476_vm1, %v8143_v9  ;;  %v8444_v9 = vpack.c.bf16 %v8298_v40, %v8295_v39 }
 0x177   : > { %6673 = vmatmul.mubr.msk.bf16.vlgmr.msra.gmra.mrb[0].mxu0 %vm476_vm1, %v8150_v14  ;;  %v2178_v14 = vsel %vm525_vm0, %v2128_v56, 0 }
 0x178   : > { %6705 = vmatpush3.bf16.msra.mxu0 %v1883_v55  ;;  %6676 = vmatprep.mubr.msk.bf16.mxu0 %vm476_vm1, %v8175_v33  ;;  %v2422_v33 = vld [vmem:[#allocation6 + $0x1c] sm:$0xf] }
 0x179   : > { %7664 = vmatprep.subr.msk.bf16.mxu0 %vm525_vm0, %v2128_v56  ;;  %v2472_v40 = vsel %vm525_vm0, %v2422_v33, 0 }
 0x17f   : > { %6677 = vmatmul.mubr.msk.bf16.gmra.mrb[4].mxu0 %vm476_vm1, %v8180_v37  ;;  %v1814_v37 = vld [vmem:[#allocation2 + $0x182] sm:$0xff] }
 0x180   : > { %6680 = vmatprep.mubr.msk.bf16.mxu0 %vm476_vm1, %v8191_v43  ;;  %v1815_v43 = vld [vmem:[#allocation2 + $0x18a] sm:$0xff] }
 0x181   : > { %v8480_v39 = vpack.c.bf16 %v1815_v43, %v1814_v37 }
 0x187   : > { %6681 = vmatmul.mubr.msk.bf16.gmra.mrb[8].mxu0 %vm476_vm1, %v8193_v44 }
 0x188   : > { %6684 = vmatprep.mubr.msk.bf16.mxu0 %vm476_vm1, %v8199_v45 }
 0x18f   : > { %6685 = vmatmul.mubr.msk.bf16.gmra.mrb[12].mxu0 %vm476_vm1, %v8201_v46 }
 0x190   : > { %6688 = vmatprep.mubr.msk.bf16.mxu0 %vm476_vm1, %v8207_v47 }
 0x197   : > { %6689 = vmatmul.mubr.msk.bf16.gmra.mrb[16].mxu0 %vm476_vm1, %v8209_v48 }
 0x198   : > { %6692 = vmatprep.mubr.msk.bf16.mxu0 %vm476_vm1, %v8215_v49 }
 0x19f   : > { %6693 = vmatmul.mubr.msk.bf16.gmra.mrb[20].mxu0 %vm476_vm1, %v8217_v50 }
 0x1a0   : > { %6696 = vmatprep.mubr.msk.bf16.mxu0 %vm476_vm1, %v8223_v51 }
 0x1a7   : > { %6697 = vmatmul.mubr.msk.bf16.gmra.mrb[24].mxu0 %vm476_vm1, %v8225_v52 }
 0x1a8   : > { %6700 = vmatprep.mubr.msk.bf16.mxu0 %vm476_vm1, %v8231_v53 }
 0x1af   : > { %6701 = vmatmul.mubr.msk.bf16.gmra.mrb[28].mxu0 %vm476_vm1, %v8444_v9 }
 0x1b0   : > { %6706 = vmatprep.mubr.msk.bf16.mxu0 %vm476_vm1, %v8311_v2  ;;  %v2716_v2 = vld [vmem:[#allocation6 + $0x20] sm:$0xf] }
 0x1b7   : > { %6707 = vmatmul.mubr.msk.bf16.vlgmr.msra.gmra.mrb[0].mxu0 %vm476_vm1, %v8313_v5 }
 0x1b8   : > { %6739 = vmatpush3.bf16.msra.mxu0 %v2178_v14  ;;  %6710 = vmatprep.mubr.msk.bf16.mxu0 %vm476_vm1, %v8322_v16 }
 0x1b9   : > { %7665 = vmatprep.subr.msk.bf16.mxu0 %vm525_vm0, %v2422_v33 }
 0x1bf   : > { %6711 = vmatmul.mubr.msk.bf16.gmra.mrb[4].mxu0 %vm476_vm1, %v8324_v19 }
 0x1c0   : > { %6714 = vmatprep.mubr.msk.bf16.mxu0 %vm476_vm1, %v8330_v25 }
 0x1c7   : > { %6715 = vmatmul.mubr.msk.bf16.gmra.mrb[8].mxu0 %vm476_vm1, %v8332_v26 }
 0x1c8   : > { %6718 = vmatprep.mubr.msk.bf16.mxu0 %vm476_vm1, %v8338_v34 }
 0x1cf   : > { %6719 = vmatmul.mubr.msk.bf16.gmra.mrb[12].mxu0 %vm476_vm1, %v8340_v35 }
 0x1d0   : > { %6722 = vmatprep.mubr.msk.bf16.mxu0 %vm476_vm1, %v8346_v58 }
 0x1d7   : > { %6723 = vmatmul.mubr.msk.bf16.gmra.mrb[16].mxu0 %vm476_vm1, %v8348_v61 }
 0x1d8   : > { %6726 = vmatprep.mubr.msk.bf16.mxu0 %vm476_vm1, %v8354_v8 }
 0x1df   : > { %6727 = vmatmul.mubr.msk.bf16.gmra.mrb[20].mxu0 %vm476_vm1, %v8356_v12 }
 0x1e0   : > { %6730 = vmatprep.mubr.msk.bf16.mxu0 %vm476_vm1, %v8362_v21 }
 0x1e7   : > { %6731 = vmatmul.mubr.msk.bf16.gmra.mrb[24].mxu0 %vm476_vm1, %v8364_v22 }
 0x1e8   : > { %6734 = vmatprep.mubr.msk.bf16.mxu0 %vm476_vm1, %v8370_v31 }
 0x1ef   : > { %6735 = vmatmul.mubr.msk.bf16.gmra.mrb[28].mxu0 %vm476_vm1, %v8480_v39 }
 0x1f0   : > { %6740 = vmatprep.mubr.msk.bf16.mxu0 %vm476_vm1, %v8239_v60  ;;  %v2373_v60 = vld [vmem:[#allocation2 + $0x31] sm:$0xff] }
 0x1f7   : > { %6741 = vmatmul.mubr.msk.bf16.vlgmr.msra.gmra.mrb[0].mxu0 %vm476_vm1, %v8250_v3  ;;  %v2374_v3 = vld [vmem:[#allocation2 + $0x39] sm:$0xff] }
 0x1f8   : > { %6773 = vmatpush3.bf16.msra.mxu0 %v2472_v40  ;;  %6744 = vmatprep.mubr.msk.bf16.mxu0 %vm476_vm1, %v8252_v4  ;;  %v2405_v4 = vpack.c.bf16 %v2374_v3, %v2373_v60 }
 0x1f9   : > { %7666 = vmatprep.subr.msk.bf16.mxu0 %vm525_vm0, %v2716_v2 }
 0x1ff   : > { %6745 = vmatmul.mubr.msk.bf16.gmra.mrb[4].mxu0 %vm476_vm1, %v8258_v10  ;;  %v2375_v10 = vld [vmem:[#allocation2 + $0x49] sm:$0xff] }
 0x200   : > { %6748 = vmatprep.mubr.msk.bf16.mxu0 %vm476_vm1, %v8260_v11  ;;  %v2376_v11 = vld [vmem:[#allocation2 + $0x51] sm:$0xff] }
 0x207   : > { %6749 = vmatmul.mubr.msk.bf16.gmra.mrb[8].mxu0 %vm476_vm1, %v8266_v17  ;;  %v2377_v17 = vld [vmem:[#allocation2 + $0x61] sm:$0xff] }
 0x208   : > { %6752 = vmatprep.mubr.msk.bf16.mxu0 %vm476_vm1, %v8268_v18  ;;  %v2378_v18 = vld [vmem:[#allocation2 + $0x69] sm:$0xff] }
 0x20f   : > { %6753 = vmatmul.mubr.msk.bf16.gmra.mrb[12].mxu0 %vm476_vm1, %v8274_v23  ;;  %v2406_v23 = vpack.c.bf16 %v2376_v11, %v2375_v10 }
 0x210   : > { %6756 = vmatprep.mubr.msk.bf16.mxu0 %vm476_vm1, %v8276_v24  ;;  %v2407_v24 = vpack.c.bf16 %v2378_v18, %v2377_v17 }
 0x217   : > { %6757 = vmatmul.mubr.msk.bf16.gmra.mrb[16].mxu0 %vm476_vm1, %v8282_v29  ;;  %v2766_v29 = vsel %vm525_vm0, %v2716_v2, 0 }
 0x218   : > { %6760 = vmatprep.mubr.msk.bf16.mxu0 %vm476_vm1, %v8284_v30  ;;  %v2379_v30 = vld [vmem:[#allocation2 + $0x79] sm:$0xff] }
 0x21f   : > { %6761 = vmatmul.mubr.msk.bf16.gmra.mrb[20].mxu0 %vm476_vm1, %v8290_v36  ;;  %v2380_v36 = vld [vmem:[#allocation2 + $0x81] sm:$0xff] }
 0x220   : > { %6764 = vmatprep.mubr.msk.bf16.mxu0 %vm476_vm1, %v8292_v38  ;;  %v2408_v38 = vpack.c.bf16 %v2380_v36, %v2379_v30 }
 0x227   : > { %6765 = vmatmul.mubr.msk.bf16.gmra.mrb[24].mxu0 %vm476_vm1, %v8306_v57  ;;  %v3112_v57 = vld [vmem:[#allocation8] sm:$0xf] }
 0x228   : > { %6768 = vmatprep.mubr.msk.bf16.mxu0 %vm476_vm1, %v8406_v42  ;;  %v3424_v15 = vsel %vm525_vm0, %v3112_v57, 0 }
 0x22f   : > { %6769 = vmatmul.mubr.msk.bf16.gmra.mrb[28].mxu0 %vm476_vm1, %v7917_v54 }
 0x230   : > { %6774 = vmatprep.mubr.msk.bf16.mxu0 %vm476_vm1, %v2405_v4 }
 0x237   : > { %6775 = vmatmul.mubr.msk.bf16.vlgmr.msra.gmra.mrb[0].mxu0 %vm476_vm1, %v2406_v23 }
 0x238   : > { %6807 = vmatpush3.bf16.msra.mxu0 %v2766_v29  ;;  %6778 = vmatprep.mubr.msk.bf16.mxu0 %vm476_vm1, %v2407_v24 }
 0x23f   : > { %6779 = vmatmul.mubr.msk.bf16.gmra.mrb[4].mxu0 %vm476_vm1, %v2408_v38 }
 0x240   : > { %6782 = vmatprep.mubr.msk.bf16.mxu0 %vm476_vm1, %v8193_v44  ;;  %v2403_v44 = vld [vmem:[#allocation2 + $0x199] sm:$0xff] }
 0x247   : > { %6783 = vmatmul.mubr.msk.bf16.gmra.mrb[8].mxu0 %vm476_vm1, %v8199_v45  ;;  %v2404_v45 = vld [vmem:[#allocation2 + $0x1a1] sm:$0xff] }
 0x248   : > { %6786 = vmatprep.mubr.msk.bf16.mxu0 %vm476_vm1, %v8201_v46  ;;  %v2420_v46 = vpack.c.bf16 %v2404_v45, %v2403_v44 }
 0x24f   : > { %6787 = vmatmul.mubr.msk.bf16.gmra.mrb[12].mxu0 %vm476_vm1, %v8207_v47  ;;  %v2697_v47 = vld [vmem:[#allocation2 + $0x19a] sm:$0xff] }
 0x250   : > { %6790 = vmatprep.mubr.msk.bf16.mxu0 %vm476_vm1, %v8209_v48  ;;  %v2698_v48 = vld [vmem:[#allocation2 + $0x1a2] sm:$0xff] }
 0x257   : > { %6791 = vmatmul.mubr.msk.bf16.gmra.mrb[16].mxu0 %vm476_vm1, %v8215_v49  ;;  %v2714_v49 = vpack.c.bf16 %v2698_v48, %v2697_v47 }
 0x258   : > { %6794 = vmatprep.mubr.msk.bf16.mxu0 %vm476_vm1, %v8217_v50  ;;  %v3162_v50 = vld [vmem:[#allocation8 + $0x4] sm:$0xf] }
 0x259   : > { %7667 = vmatprep.subr.msk.bf16.mxu1 %vm525_vm0, %v3162_v50 }
 0x25f   : > { %6795 = vmatmul.mubr.msk.bf16.gmra.mrb[20].mxu0 %vm476_vm1, %v8223_v51  ;;  %v3212_v51 = vsel %vm525_vm0, %v3162_v50, 0 }
 0x260   : > { %6798 = vmatprep.mubr.msk.bf16.mxu0 %vm476_vm1, %v8225_v52  ;;  %v3113_v52 = vld [vmem:[#allocation2 + $0x1] sm:$0xff]  ;;  %6841 = vmatpush3.bf16.msra.mxu1 %v3212_v51 }
 0x261   : > { %7668 = vmatprep.subr.msk.bf16.mxu1 %vm525_vm0, %v3112_v57 }
 0x267   : > { %6799 = vmatmul.mubr.msk.bf16.gmra.mrb[24].mxu0 %vm476_vm1, %v8231_v53  ;;  %v3114_v53 = vld [vmem:[#allocation2 + $0x9] sm:$0xff] }
 0x268   : > { %6802 = vmatprep.mubr.msk.bf16.mxu0 %vm476_vm1, %v8444_v9  ;;  %v3145_v54 = vpack.c.bf16 %v3114_v53, %v3113_v52 }
 0x26a   : > { %6842 = vmatprep.mubr.msk.bf16.mxu1 %vm476_vm1, %v3145_v54 }
 0x26f   : > { %6803 = vmatmul.mubr.msk.bf16.gmra.mrb[28].mxu0 %vm476_vm1, %v2420_v46 }
 0x270   : > { %6808 = vmatprep.mubr.msk.bf16.mxu0 %vm476_vm1, %v8313_v5  ;;  %v8584_v5 = vld [vmem:[%s9173_s2] ss:$0 sm:$0xff] }
 0x277   : > { %6809 = vmatmul.mubr.msk.bf16.vlgmr.msra.gmra.mrb[0].mxu0 %vm476_vm1, %v8322_v16 }
 0x278   : > { %6812 = vmatprep.mubr.msk.bf16.mxu0 %vm476_vm1, %v8324_v19 }
 0x27f   : > { %6813 = vmatmul.mubr.msk.bf16.gmra.mrb[4].mxu0 %vm476_vm1, %v8330_v25 }
 0x280   : > { %6816 = vmatprep.mubr.msk.bf16.mxu0 %vm476_vm1, %v8332_v26 }
 0x287   : > { %6817 = vmatmul.mubr.msk.bf16.gmra.mrb[8].mxu0 %vm476_vm1, %v8338_v34 }
 0x288   : > { %6820 = vmatprep.mubr.msk.bf16.mxu0 %vm476_vm1, %v8340_v35 }
 0x28f   : > { %6821 = vmatmul.mubr.msk.bf16.gmra.mrb[12].mxu0 %vm476_vm1, %v8346_v58 }
 0x290   : > { %6824 = vmatprep.mubr.msk.bf16.mxu0 %vm476_vm1, %v8348_v61 }
 0x297   : > { %6825 = vmatmul.mubr.msk.bf16.gmra.mrb[16].mxu0 %vm476_vm1, %v8354_v8 }
 0x298   : > { %6828 = vmatprep.mubr.msk.bf16.mxu0 %vm476_vm1, %v8356_v12 }
 0x29f   : > { %6829 = vmatmul.mubr.msk.bf16.gmra.mrb[20].mxu0 %vm476_vm1, %v8362_v21  ;;  %v8596_v21 = vld [vmem:[#allocation8 + $0x8] sm:$0xf] }
 0x2a0   : > { %6832 = vmatprep.mubr.msk.bf16.mxu0 %vm476_vm1, %v8364_v22 }
 0x2a7   : > { %6833 = vmatmul.mubr.msk.bf16.gmra.mrb[24].mxu0 %vm476_vm1, %v8370_v31 }
 0x2a8   : > { %6836 = vmatprep.mubr.msk.bf16.mxu0 %vm476_vm1, %v8480_v39 }
 0x2af   : > { %6837 = vmatmul.mubr.msk.bf16.gmra.mrb[28].mxu0 %vm476_vm1, %v2714_v49 }
 0x34a   : > { %v6810_v16 = vpop.f32.mrb[0].mxu0 }
 0x34b   : > { %v2970_v19 = vadd.f32 %v6810_v16, %v8584_v5  ;;  %v2802_v25 = vpop.f32.mrb[1].mxu0 }
 0x34c   : > { %v2968_v26 = vadd.f32 %v8584_v5, %v2802_v25  ;;  %v6811_v34 = vpop.f32.mrb[2].mxu0 }
 0x34d   : > { %v3002_v35 = vmax.f32 %v2970_v19, 0.0  ;;  %v2971_v58 = vadd.f32 %v6811_v34, %v8584_v5  ;;  %v2805_v61 = vpop.f32.mrb[3].mxu0 }
 0x34e   : > { %v3000_v63 = vmax.f32 %v2968_v26, 0.0  ;;  %v2969_v0 = vadd.f32 %v8584_v5, %v2805_v61 }
 0x34f   : > { %3034 = vst [vmem:[#allocation2 + $0x31] sm:$0xff] %v3002_v35  ;;  %v3003_v1 = vmax.f32 %v2971_v58, 0.0 }
 0x350   : > { %3032 = vst [vmem:[#allocation2 + $0x19] sm:$0xff] %v3000_v63  ;;  %v3001_v6 = vmax.f32 %v2969_v0, 0.0 }
 0x351   : > { %3035 = vst [vmem:[#allocation2 + $0x39] sm:$0xff] %v3003_v1  ;;  %v8590_v8 = vpack.c.bf16 %v3003_v1, %v3002_v35 }
 0x352   : > { %3033 = vst [vmem:[#allocation2 + $0x21] sm:$0xff] %v3001_v6  ;;  %v6814_v12 = vpop.f32.mrb[4].mxu0  ;;  %v8592_v13 = vpack.c.bf16 %v3001_v6, %v3000_v63 }
 0x353   : > { %v2974_v62 = vadd.f32 %v6814_v12, %v8584_v5  ;;  %v2818_v20 = vpop.f32.mrb[5].mxu0 }
 0x354   : > { %v2972_v22 = vadd.f32 %v8584_v5, %v2818_v20  ;;  %v6815_v27 = vpop.f32.mrb[6].mxu0  ;;  %6843 = vmatmul.mubr.msk.bf16.vlgmr.msra.gmra.mrb[0].mxu1 %vm476_vm1, %v8592_v13 }
 0x355   : > { %v3006_v28 = vmax.f32 %v2974_v62, 0.0  ;;  %v2975_v31 = vadd.f32 %v6815_v27, %v8584_v5  ;;  %v2821_v32 = vpop.f32.mrb[7].mxu0  ;;  %6875 = vmatpush3.bf16.msra.mxu1 %v3424_v15  ;;  %6846 = vmatprep.mubr.msk.bf16.mxu1 %vm476_vm1, %v8590_v8 }
 0x356   : > { %v3004_v41 = vmax.f32 %v2972_v22, 0.0  ;;  %v2973_v59 = vadd.f32 %v8584_v5, %v2821_v32  ;;  %7669 = vmatprep.subr.msk.bf16.mxu1 %vm525_vm0, %v8596_v21 }
 0x357   : > { %3038 = vst [vmem:[#allocation2 + $0x61] sm:$0xff] %v3006_v28  ;;  %v3007_v7 = vmax.f32 %v2975_v31, 0.0 }
 0x358   : > { %3036 = vst [vmem:[#allocation2 + $0x49] sm:$0xff] %v3004_v41  ;;  %v3005_v42 = vmax.f32 %v2973_v59, 0.0 }
 0x359   : > { %3039 = vst [vmem:[#allocation2 + $0x69] sm:$0xff] %v3007_v7  ;;  %v8607_v55 = vpack.c.bf16 %v3007_v7, %v3006_v28 }
 0x35a   : > { %3037 = vst [vmem:[#allocation2 + $0x51] sm:$0xff] %v3005_v42  ;;  %v6818_v56 = vpop.f32.mrb[8].mxu0  ;;  %v8609_v9 = vpack.c.bf16 %v3005_v42, %v3004_v41 }
 0x35b   : > { %v2978_v14 = vadd.f32 %v6818_v56, %v8584_v5  ;;  %v2834_v33 = vpop.f32.mrb[9].mxu0 }
 0x35c   : > { %v2976_v37 = vadd.f32 %v8584_v5, %v2834_v33  ;;  %v6819_v43 = vpop.f32.mrb[10].mxu0  ;;  %6847 = vmatmul.mubr.msk.bf16.gmra.mrb[4].mxu1 %vm476_vm1, %v8609_v9 }
 0x35d   : > { %v3010_v39 = vmax.f32 %v2978_v14, 0.0  ;;  %v2979_v40 = vadd.f32 %v6819_v43, %v8584_v5  ;;  %v2837_v2 = vpop.f32.mrb[11].mxu0  ;;  %6850 = vmatprep.mubr.msk.bf16.mxu1 %vm476_vm1, %v8607_v55 }
 0x35e   : > { %v3008_v60 = vmax.f32 %v2976_v37, 0.0  ;;  %v2977_v3 = vadd.f32 %v8584_v5, %v2837_v2 }
 0x35f   : > { %3042 = vst [vmem:[#allocation2 + $0x91] sm:$0xff] %v3010_v39  ;;  %v3011_v4 = vmax.f32 %v2979_v40, 0.0 }
 0x360   : > { %3040 = vst [vmem:[#allocation2 + $0x79] sm:$0xff] %v3008_v60  ;;  %v3009_v10 = vmax.f32 %v2977_v3, 0.0 }
 0x361   : > { %3043 = vst [vmem:[#allocation2 + $0x99] sm:$0xff] %v3011_v4  ;;  %v8619_v11 = vpack.c.bf16 %v3011_v4, %v3010_v39 }
 0x362   : > { %3041 = vst [vmem:[#allocation2 + $0x81] sm:$0xff] %v3009_v10  ;;  %v6822_v17 = vpop.f32.mrb[12].mxu0  ;;  %v8621_v18 = vpack.c.bf16 %v3009_v10, %v3008_v60 }
 0x363   : > { %v2982_v23 = vadd.f32 %v6822_v17, %v8584_v5  ;;  %v2850_v24 = vpop.f32.mrb[13].mxu0 }
 0x364   : > { %v2980_v29 = vadd.f32 %v8584_v5, %v2850_v24  ;;  %v6823_v30 = vpop.f32.mrb[14].mxu0  ;;  %6851 = vmatmul.mubr.msk.bf16.gmra.mrb[8].mxu1 %vm476_vm1, %v8621_v18 }
 0x365   : > { %v3014_v36 = vmax.f32 %v2982_v23, 0.0  ;;  %v2983_v38 = vadd.f32 %v6823_v30, %v8584_v5  ;;  %v2853_v44 = vpop.f32.mrb[15].mxu0  ;;  %6854 = vmatprep.mubr.msk.bf16.mxu1 %vm476_vm1, %v8619_v11 }
 0x366   : > { %v3012_v45 = vmax.f32 %v2980_v29, 0.0  ;;  %v2981_v46 = vadd.f32 %v8584_v5, %v2853_v44 }
 0x367   : > { %3046 = vst [vmem:[#allocation2 + $0xc1] sm:$0xff] %v3014_v36  ;;  %v3015_v47 = vmax.f32 %v2983_v38, 0.0 }
 0x368   : > { %3044 = vst [vmem:[#allocation2 + $0xa9] sm:$0xff] %v3012_v45  ;;  %v3013_v48 = vmax.f32 %v2981_v46, 0.0 }
 0x369   : > { %3047 = vst [vmem:[#allocation2 + $0xc9] sm:$0xff] %v3015_v47  ;;  %v8631_v49 = vpack.c.bf16 %v3015_v47, %v3014_v36 }
 0x36a   : > { %3045 = vst [vmem:[#allocation2 + $0xb1] sm:$0xff] %v3013_v48  ;;  %v6826_v50 = vpop.f32.mrb[16].mxu0  ;;  %v8633_v51 = vpack.c.bf16 %v3013_v48, %v3012_v45 }
 0x36b   : > { %v2986_v52 = vadd.f32 %v6826_v50, %v8584_v5  ;;  %v2866_v53 = vpop.f32.mrb[17].mxu0  ;;  %v7750_v50 = vld [vmem:[#allocation2] sm:$0xff] }
 0x36c   : > { %v2984_v54 = vadd.f32 %v8584_v5, %v2866_v53  ;;  %v6827_v57 = vpop.f32.mrb[18].mxu0  ;;  %6855 = vmatmul.mubr.msk.bf16.gmra.mrb[12].mxu1 %vm476_vm1, %v8633_v51 }
 0x36d   : > { %v3018_v16 = vmax.f32 %v2986_v52, 0.0  ;;  %v2987_v19 = vadd.f32 %v6827_v57, %v8584_v5  ;;  %v2869_v25 = vpop.f32.mrb[19].mxu0  ;;  %6858 = vmatprep.mubr.msk.bf16.mxu1 %vm476_vm1, %v8631_v49  ;;  %v8683_v52 = vpack.c.bf16 %v7750_v50, %v7750_v50  ;;  %v3069_v57 = vld [vmem:[#allocation2 + $0x38] sm:$0xff]  ;;  %v3588_v50 = vld [vmem:[#allocation2 + $0xa] sm:$0xff] }
 0x36e   : > { %v3016_v26 = vmax.f32 %v2984_v54, 0.0  ;;  %v2985_v34 = vadd.f32 %v8584_v5, %v2869_v25  ;;  %v3686_v25 = vsel %vm525_vm0, %v8596_v21, 0  ;;  %v3072_v21 = vld [vmem:[#allocation2 + $0x60] sm:$0xff] }
 0x36f   : > { %3050 = vst [vmem:[#allocation2 + $0xf1] sm:$0xff] %v3018_v16  ;;  %v3019_v35 = vmax.f32 %v2987_v19, 0.0 }
 0x370   : > { %3048 = vst [vmem:[#allocation2 + $0xd9] sm:$0xff] %v3016_v26  ;;  %v3017_v58 = vmax.f32 %v2985_v34, 0.0 }
 0x371   : > { %3051 = vst [vmem:[#allocation2 + $0xf9] sm:$0xff] %v3019_v35  ;;  %v8643_v61 = vpack.c.bf16 %v3019_v35, %v3018_v16  ;;  %v3066_v16 = vld [vmem:[#allocation2 + $0x18] sm:$0xff]  ;;  %v8699_v35 = vld [vmem:[#allocation8 + $0xc] sm:$0xf] }
 0x372   : > { %3049 = vst [vmem:[#allocation2 + $0xe1] sm:$0xff] %v3017_v58  ;;  %v6830_v63 = vpop.f32.mrb[20].mxu0  ;;  %v8645_v0 = vpack.c.bf16 %v3017_v58, %v3016_v26  ;;  %v3068_v26 = vld [vmem:[#allocation2 + $0x30] sm:$0xff] }
 0x373   : > { %v2990_v1 = vadd.f32 %v6830_v63, %v8584_v5  ;;  %v2882_v6 = vpop.f32.mrb[21].mxu0  ;;  %v8697_v34 = vpack.c.bf16 %v3069_v57, %v3068_v26  ;;  %v3071_v58 = vld [vmem:[#allocation2 + $0x50] sm:$0xff]  ;;  %v3073_v63 = vld [vmem:[#allocation2 + $0x68] sm:$0xff]  ;;  %v3589_v26 = vld [vmem:[#allocation2 + $0x1a] sm:$0xff] }
 0x374   : > { %v2988_v12 = vadd.f32 %v8584_v5, %v2882_v6  ;;  %v6831_v15 = vpop.f32.mrb[22].mxu0  ;;  %6859 = vmatmul.mubr.msk.bf16.gmra.mrb[16].mxu1 %vm476_vm1, %v8645_v0 }
 0x375   : > { %v3022_v62 = vmax.f32 %v2990_v1, 0.0  ;;  %v2991_v20 = vadd.f32 %v6831_v15, %v8584_v5  ;;  %v2885_v22 = vpop.f32.mrb[23].mxu0  ;;  %6862 = vmatprep.mubr.msk.bf16.mxu1 %vm476_vm1, %v8643_v61  ;;  %v3070_v1 = vld [vmem:[#allocation2 + $0x48] sm:$0xff]  ;;  %v3075_v15 = vld [vmem:[#allocation2 + $0x80] sm:$0xff] }
 0x376   : > { %v3020_v27 = vmax.f32 %v2988_v12, 0.0  ;;  %v2989_v28 = vadd.f32 %v8584_v5, %v2885_v22  ;;  %v8707_v6 = vpack.c.bf16 %v3071_v58, %v3070_v1  ;;  %v8709_v12 = vpack.c.bf16 %v3073_v63, %v3072_v21  ;;  %v3590_v58 = vld [vmem:[#allocation2 + $0x22] sm:$0xff]  ;;  %v3591_v63 = vld [vmem:[#allocation2 + $0x32] sm:$0xff]  ;;  %v3592_v1 = vld [vmem:[#allocation2 + $0x3a] sm:$0xff] }
 0x377   : > { %3054 = vst [vmem:[#allocation2 + $0x121] sm:$0xff] %v3022_v62  ;;  %v3023_v31 = vmax.f32 %v2991_v20, 0.0  ;;  %v3074_v20 = vld [vmem:[#allocation2 + $0x78] sm:$0xff]  ;;  %v8760_v21 = vpack.c.bf16 %v3590_v58, %v3589_v26 }
 0x378   : > { %3052 = vst [vmem:[#allocation2 + $0x109] sm:$0xff] %v3020_v27  ;;  %v3021_v32 = vmax.f32 %v2989_v28, 0.0  ;;  %v8715_v22 = vpack.c.bf16 %v3075_v15, %v3074_v20  ;;  %v3980_v15 = vsel %vm525_vm0, %v8699_v35, 0  ;;  %v4224_v20 = vld [vmem:[#allocation8 + $0x10] sm:$0xf] }
 0x379   : > { %3055 = vst [vmem:[#allocation2 + $0x129] sm:$0xff] %v3023_v31  ;;  %v8655_v41 = vpack.c.bf16 %v3023_v31, %v3022_v62  ;;  %v3077_v62 = vld [vmem:[#allocation2 + $0x98] sm:$0xff]  ;;  %v3079_v31 = vld [vmem:[#allocation2 + $0xb0] sm:$0xff] }
 0x37a   : > { %3053 = vst [vmem:[#allocation2 + $0x111] sm:$0xff] %v3021_v32  ;;  %v6834_v59 = vpop.f32.mrb[24].mxu0  ;;  %v8657_v7 = vpack.c.bf16 %v3021_v32, %v3020_v27  ;;  %v3076_v27 = vld [vmem:[#allocation2 + $0x90] sm:$0xff]  ;;  %v3081_v32 = vld [vmem:[#allocation2 + $0xc8] sm:$0xff] }
 0x37b   : > { %v2994_v42 = vadd.f32 %v6834_v59, %v8584_v5  ;;  %v2898_v56 = vpop.f32.mrb[25].mxu0  ;;  %v8717_v28 = vpack.c.bf16 %v3077_v62, %v3076_v27  ;;  %v3078_v59 = vld [vmem:[#allocation2 + $0xa8] sm:$0xff]  ;;  %v8764_v62 = vpack.c.bf16 %v3592_v1, %v3591_v63 }
 0x37c   : > { %v2992_v14 = vadd.f32 %v8584_v5, %v2898_v56  ;;  %v6835_v33 = vpop.f32.mrb[26].mxu0  ;;  %6863 = vmatmul.mubr.msk.bf16.gmra.mrb[20].mxu1 %vm476_vm1, %v8657_v7  ;;  %v3080_v56 = vld [vmem:[#allocation2 + $0xc0] sm:$0xff]  ;;  %v3593_v27 = vld [vmem:[#allocation2 + $0x4a] sm:$0xff] }
 0x37d   : > { %v3026_v37 = vmax.f32 %v2994_v42, 0.0  ;;  %v2995_v43 = vadd.f32 %v6835_v33, %v8584_v5  ;;  %v2901_v39 = vpop.f32.mrb[27].mxu0  ;;  %6866 = vmatprep.mubr.msk.bf16.mxu1 %vm476_vm1, %v8655_v41  ;;  %v8723_v42 = vpack.c.bf16 %v3079_v31, %v3078_v59  ;;  %v3083_v33 = vld [vmem:[#allocation2 + $0xe0] sm:$0xff]  ;;  %v3594_v31 = vld [vmem:[#allocation2 + $0x52] sm:$0xff]  ;;  %v3596_v59 = vld [vmem:[#allocation2 + $0x6a] sm:$0xff] }
 0x37e   : > { %v3024_v40 = vmax.f32 %v2992_v14, 0.0  ;;  %v2993_v2 = vadd.f32 %v8584_v5, %v2901_v39  ;;  %v8725_v14 = vpack.c.bf16 %v3081_v32, %v3080_v56  ;;  %v3595_v32 = vld [vmem:[#allocation2 + $0x62] sm:$0xff]  ;;  %v8771_v56 = vpack.c.bf16 %v3594_v31, %v3593_v27 }
 0x37f   : > { %3058 = vst [vmem:[#allocation2 + $0x151] sm:$0xff] %v3026_v37  ;;  %v8667_v60 = vmax.f32 %v2995_v43, 0.0  ;;  %v3082_v43 = vld [vmem:[#allocation2 + $0xd8] sm:$0xff] }
 0x380   : > { %3056 = vst [vmem:[#allocation2 + $0x139] sm:$0xff] %v3024_v40  ;;  %v3025_v3 = vmax.f32 %v2993_v2, 0.0  ;;  %v8731_v39 = vpack.c.bf16 %v3083_v33, %v3082_v43  ;;  %v8773_v33 = vpack.c.bf16 %v3596_v59, %v3595_v32  ;;  %v3599_v43 = vld [vmem:[#allocation2 + $0x92] sm:$0xff]  ;;  %v3611_v1 = vld [vmem:[#allocation2 + $0x122] sm:$0xff] }
 0x381   : > { %3059 = vst [vmem:[#allocation2 + $0x159] sm:$0xff] %v8667_v60  ;;  %v8671_v4 = vpack.c.bf16 %v8667_v60, %v3026_v37  ;;  %v3085_v37 = vld [vmem:[#allocation2 + $0xf8] sm:$0xff]  ;;  %v3609_v58 = vld [vmem:[#allocation2 + $0x10a] sm:$0xff] }
 0x382   : > { %3057 = vst [vmem:[#allocation2 + $0x141] sm:$0xff] %v3025_v3  ;;  %v6838_v10 = vpop.f32.mrb[28].mxu0  ;;  %v8673_v17 = vpack.c.bf16 %v3025_v3, %v3024_v40  ;;  %v3084_v40 = vld [vmem:[#allocation2 + $0xf0] sm:$0xff] }
 0x383   : > { %v2998_v23 = vadd.f32 %v6838_v10, %v8584_v5  ;;  %v2914_v24 = vpop.f32.mrb[29].mxu0  ;;  %v8733_v2 = vpack.c.bf16 %v3085_v37, %v3084_v40  ;;  %v3087_v3 = vld [vmem:[#allocation2 + $0x110] sm:$0xff]  ;;  %v3089_v10 = vld [vmem:[#allocation2 + $0x128] sm:$0xff]  ;;  %v3600_v40 = vld [vmem:[#allocation2 + $0x9a] sm:$0xff] }
 0x384   : > { %v2996_v29 = vadd.f32 %v8584_v5, %v2914_v24  ;;  %v6839_v30 = vpop.f32.mrb[30].mxu0  ;;  %6867 = vmatmul.mubr.msk.bf16.gmra.mrb[24].mxu1 %vm476_vm1, %v8673_v17  ;;  %v3598_v37 = vld [vmem:[#allocation2 + $0x82] sm:$0xff]  ;;  %v3610_v63 = vld [vmem:[#allocation2 + $0x112] sm:$0xff] }
 0x385   : > { %v3030_v36 = vmax.f32 %v2998_v23, 0.0  ;;  %v2999_v38 = vadd.f32 %v6839_v30, %v8584_v5  ;;  %v2917_v44 = vpop.f32.mrb[31].mxu0  ;;  %6870 = vmatprep.mubr.msk.bf16.mxu1 %vm476_vm1, %v8671_v4  ;;  %v3086_v23 = vld [vmem:[#allocation2 + $0x108] sm:$0xff]  ;;  %v8803_v27 = vpack.c.bf16 %v3610_v63, %v3609_v58  ;;  %v5074_v63 = vld [vmem:[#allocation2 + $0xf9] sm:$0xff] }
 0x386   : > { %v3028_v45 = vmax.f32 %v2996_v29, 0.0  ;;  %v2997_v46 = vadd.f32 %v8584_v5, %v2917_v44  ;;  %v3067_v5 = vld [vmem:[#allocation2 + $0x20] sm:$0xff]  ;;  %v8739_v24 = vpack.c.bf16 %v3087_v3, %v3086_v23  ;;  %v3601_v23 = vld [vmem:[#allocation2 + $0xaa] sm:$0xff] }
 0x387   : > { %3062 = vst [vmem:[#allocation2 + $0x181] sm:$0xff] %v3030_v36  ;;  %v3031_v47 = vmax.f32 %v2999_v38, 0.0  ;;  %v8693_v19 = vpack.c.bf16 %v3067_v5, %v3066_v16  ;;  %v3088_v29 = vld [vmem:[#allocation2 + $0x120] sm:$0xff]  ;;  %v3090_v44 = vld [vmem:[#allocation2 + $0x138] sm:$0xff] }
 0x388   : > { %3060 = vst [vmem:[#allocation2 + $0x169] sm:$0xff] %v3028_v45  ;;  %v3029_v48 = vmax.f32 %v2997_v46, 0.0  ;;  %v8741_v30 = vpack.c.bf16 %v3089_v10, %v3088_v29  ;;  %v3093_v38 = vld [vmem:[#allocation2 + $0x158] sm:$0xff]  ;;  %v3092_v46 = vld [vmem:[#allocation2 + $0x150] sm:$0xff]  ;;  %v8781_v10 = vpack.c.bf16 %v3600_v40, %v3599_v43  ;;  %v5072_v58 = vld [vmem:[#allocation2 + $0xe1] sm:$0xff] }
 0x389   : > { %3063 = vst [vmem:[#allocation2 + $0x189] sm:$0xff] %v3031_v47  ;;  %v8685_v53 = vpack.c.bf16 %v3031_v47, %v3030_v36  ;;  %v3091_v36 = vld [vmem:[#allocation2 + $0x140] sm:$0xff]  ;;  %v8749_v47 = vpack.c.bf16 %v3093_v38, %v3092_v46  ;;  %v3602_v29 = vld [vmem:[#allocation2 + $0xb2] sm:$0xff]  ;;  %v3604_v38 = vld [vmem:[#allocation2 + $0xca] sm:$0xff] }
 0x38a   : > { %3061 = vst [vmem:[#allocation2 + $0x171] sm:$0xff] %v3029_v48  ;;  %v8687_v54 = vpack.c.bf16 %v3029_v48, %v3028_v45  ;;  %v8747_v45 = vpack.c.bf16 %v3091_v36, %v3090_v44  ;;  %v3587_v48 = vld [vmem:[#allocation2 + $0x2] sm:$0xff]  ;;  %v8787_v44 = vpack.c.bf16 %v3602_v29, %v3601_v23  ;;  %v3613_v32 = vld [vmem:[#allocation2 + $0x13a] sm:$0xff] }
 0x38b   : > { %v3619_v16 = vpack.c.bf16 %v3588_v50, %v3587_v48  ;;  %v3603_v36 = vld [vmem:[#allocation2 + $0xc2] sm:$0xff]  ;;  %v3605_v48 = vld [vmem:[#allocation2 + $0xda] sm:$0xff] }
 0x38c   : > { %6871 = vmatmul.mubr.msk.bf16.gmra.mrb[28].mxu1 %vm476_vm1, %v8687_v54  ;;  %v8789_v46 = vpack.c.bf16 %v3604_v38, %v3603_v36  ;;  %v3606_v50 = vld [vmem:[#allocation2 + $0xe2] sm:$0xff]  ;;  %v4274_v38 = vsel %vm525_vm0, %v4224_v20, 0 }
 0x38d   : > { %6876 = vmatprep.mubr.msk.bf16.mxu1 %vm476_vm1, %v8683_v52  ;;  %v3614_v59 = vld [vmem:[#allocation2 + $0x142] sm:$0xff] }
 0x38e   : > { %v8811_v43 = vpack.c.bf16 %v3614_v59, %v3613_v32  ;;  %v5073_v32 = vld [vmem:[#allocation2 + $0xf1] sm:$0xff] }
 0x38f   : > { %v3094_v57 = vld [vmem:[#allocation2 + $0x168] sm:$0xff]  ;;  %v5097_v59 = vpack.c.bf16 %v5074_v63, %v5073_v32  ;;  %v5692_v63 = vld [vmem:[%s8129_s6 + $0x40] sm:$0xff] }
 0x390   : > { %v5695_v32 = vld [vmem:[%s8129_s6 + $0x58] sm:$0xff] }
 0x391   : > { %v3095_v5 = vld [vmem:[#allocation2 + $0x170] sm:$0xff] }
 0x392   : > { %v3617_v23 = vld [vmem:[#allocation2 + $0x16a] sm:$0xff]  ;;  %v3618_v29 = vld [vmem:[#allocation2 + $0x172] sm:$0xff] }
 0x393   : > { %v8819_v36 = vpack.c.bf16 %v3618_v29, %v3617_v23  ;;  %v5075_v23 = vld [vmem:[#allocation2 + $0x109] sm:$0xff] }
 0x394   : > { %6877 = vmatmul.mubr.msk.bf16.vlgmr.msra.gmra.mrb[0].mxu1 %vm476_vm1, %v8693_v19 }
 0x395   : > { %6909 = vmatpush3.bf16.msra.mxu1 %v3686_v25  ;;  %6880 = vmatprep.mubr.msk.bf16.mxu1 %vm476_vm1, %v8697_v34  ;;  %v8755_v25 = vpack.c.bf16 %v3095_v5, %v3094_v57  ;;  %v3607_v5 = vld [vmem:[#allocation2 + $0xf2] sm:$0xff]  ;;  %v3608_v57 = vld [vmem:[#allocation2 + $0xfa] sm:$0xff] }
 0x396   : > { %7670 = vmatprep.subr.msk.bf16.mxu1 %vm525_vm0, %v8699_v35  ;;  %v3597_v35 = vld [vmem:[#allocation2 + $0x7a] sm:$0xff]  ;;  %v8797_v26 = vpack.c.bf16 %v3608_v57, %v3607_v5  ;;  %v4812_v57 = vld [vmem:[#allocation8 + $0x18] sm:$0xf] }
 0x397   : > { %v8779_v3 = vpack.c.bf16 %v3598_v37, %v3597_v35  ;;  %v3615_v35 = vld [vmem:[#allocation2 + $0x152] sm:$0xff]  ;;  %v3616_v37 = vld [vmem:[#allocation2 + $0x15a] sm:$0xff] }
 0x398   : > { %v8813_v40 = vpack.c.bf16 %v3616_v37, %v3615_v35  ;;  %v5076_v35 = vld [vmem:[#allocation2 + $0x111] sm:$0xff]  ;;  %v5078_v37 = vld [vmem:[#allocation2 + $0x129] sm:$0xff] }
 0x399   : > { %v5098_v29 = vpack.c.bf16 %v5076_v35, %v5075_v23  ;;  %v5693_v23 = vld [vmem:[%s8129_s6 + $0x48] sm:$0xff] }
 0x39c   : > { %6881 = vmatmul.mubr.msk.bf16.gmra.mrb[4].mxu1 %vm476_vm1, %v8707_v6 }
 0x39d   : > { %6884 = vmatprep.mubr.msk.bf16.mxu1 %vm476_vm1, %v8709_v12 }
 0x3a4   : > { %6885 = vmatmul.mubr.msk.bf16.gmra.mrb[8].mxu1 %vm476_vm1, %v8715_v22 }
 0x3a5   : > { %6888 = vmatprep.mubr.msk.bf16.mxu1 %vm476_vm1, %v8717_v28 }
 0x3ac   : > { %6889 = vmatmul.mubr.msk.bf16.gmra.mrb[12].mxu1 %vm476_vm1, %v8723_v42 }
 0x3ad   : > { %6892 = vmatprep.mubr.msk.bf16.mxu1 %vm476_vm1, %v8725_v14 }
 0x3b4   : > { %6893 = vmatmul.mubr.msk.bf16.gmra.mrb[16].mxu1 %vm476_vm1, %v8731_v39 }
 0x3b5   : > { %6896 = vmatprep.mubr.msk.bf16.mxu1 %vm476_vm1, %v8733_v2 }
 0x3bc   : > { %6897 = vmatmul.mubr.msk.bf16.gmra.mrb[20].mxu1 %vm476_vm1, %v8739_v24 }
 0x3bd   : > { %6900 = vmatprep.mubr.msk.bf16.mxu1 %vm476_vm1, %v8741_v30 }
 0x3c4   : > { %6901 = vmatmul.mubr.msk.bf16.gmra.mrb[24].mxu1 %vm476_vm1, %v8747_v45 }
 0x3c5   : > { %6904 = vmatprep.mubr.msk.bf16.mxu1 %vm476_vm1, %v8749_v47 }
 0x3cc   : > { %6905 = vmatmul.mubr.msk.bf16.gmra.mrb[28].mxu1 %vm476_vm1, %v8755_v25 }
 0x3cd   : > { %6910 = vmatprep.mubr.msk.bf16.mxu1 %vm476_vm1, %v3619_v16  ;;  %v8795_v16 = vpack.c.bf16 %v3606_v50, %v3605_v48  ;;  %v4518_v48 = vld [vmem:[#allocation8 + $0x14] sm:$0xf] }
 0x3ce   : > { %v4568_v5 = vsel %vm525_vm0, %v4518_v48, 0 }
 0x3d4   : > { %6911 = vmatmul.mubr.msk.bf16.vlgmr.msra.gmra.mrb[0].mxu1 %vm476_vm1, %v8760_v21 }
 0x3d5   : > { %6943 = vmatpush3.bf16.msra.mxu1 %v3980_v15  ;;  %6914 = vmatprep.mubr.msk.bf16.mxu1 %vm476_vm1, %v8764_v62  ;;  %v3612_v15 = vld [vmem:[#allocation2 + $0x12a] sm:$0xff] }
 0x3d6   : > { %7671 = vmatprep.subr.msk.bf16.mxu1 %vm525_vm0, %v4224_v20  ;;  %v8805_v31 = vpack.c.bf16 %v3612_v15, %v3611_v1  ;;  %v3911_v20 = vld [vmem:[#allocation2 + $0x180] sm:$0xff] }
 0x3d7   : > { %v5071_v1 = vld [vmem:[#allocation2 + $0xd9] sm:$0xff] }
 0x3d8   : > { %v5096_v15 = vpack.c.bf16 %v5072_v58, %v5071_v1 }
 0x3dc   : > { %6915 = vmatmul.mubr.msk.bf16.gmra.mrb[4].mxu1 %vm476_vm1, %v8771_v56 }
 0x3dd   : > { %6918 = vmatprep.mubr.msk.bf16.mxu1 %vm476_vm1, %v8773_v33 }
 0x3e4   : > { %6919 = vmatmul.mubr.msk.bf16.gmra.mrb[8].mxu1 %vm476_vm1, %v8779_v3 }
 0x3e5   : > { %6922 = vmatprep.mubr.msk.bf16.mxu1 %vm476_vm1, %v8781_v10 }
 0x3ec   : > { %6923 = vmatmul.mubr.msk.bf16.gmra.mrb[12].mxu1 %vm476_vm1, %v8787_v44 }
 0x3ed   : > { %6926 = vmatprep.mubr.msk.bf16.mxu1 %vm476_vm1, %v8789_v46 }
 0x3f4   : > { %6927 = vmatmul.mubr.msk.bf16.gmra.mrb[16].mxu1 %vm476_vm1, %v8795_v16 }
 0x3f5   : > { %6930 = vmatprep.mubr.msk.bf16.mxu1 %vm476_vm1, %v8797_v26 }
 0x3fc   : > { %6931 = vmatmul.mubr.msk.bf16.gmra.mrb[20].mxu1 %vm476_vm1, %v8803_v27 }
 0x3fd   : > { %6934 = vmatprep.mubr.msk.bf16.mxu1 %vm476_vm1, %v8805_v31 }
 0x404   : > { %6935 = vmatmul.mubr.msk.bf16.gmra.mrb[24].mxu1 %vm476_vm1, %v8811_v43 }
 0x405   : > { %6938 = vmatprep.mubr.msk.bf16.mxu1 %vm476_vm1, %v8813_v40 }
 0x40c   : > { %6939 = vmatmul.mubr.msk.bf16.gmra.mrb[28].mxu1 %vm476_vm1, %v8819_v36 }
 0x40d   : > { %6944 = vmatprep.mubr.msk.bf16.mxu1 %vm476_vm1, %v8693_v19  ;;  %v3912_v19 = vld [vmem:[#allocation2 + $0x188] sm:$0xff] }
 0x40e   : > { %v8855_v50 = vpack.c.bf16 %v3912_v19, %v3911_v20  ;;  %v5081_v19 = vld [vmem:[#allocation2 + $0x151] sm:$0xff] }
 0x40f   : > { %v5101_v20 = vpack.c.bf16 %v8667_v60, %v5081_v19  ;;  %v5381_v60 = vld [vmem:[#allocation2 + $0x19a] sm:$0xff] }
 0x414   : > { %6945 = vmatmul.mubr.msk.bf16.vlgmr.msra.gmra.mrb[0].mxu1 %vm476_vm1, %v8697_v34 }
 0x415   : > { %6977 = vmatpush3.bf16.msra.mxu1 %v4274_v38  ;;  %6948 = vmatprep.mubr.msk.bf16.mxu1 %vm476_vm1, %v8707_v6  ;;  %v5077_v38 = vld [vmem:[#allocation2 + $0x121] sm:$0xff] }
 0x416   : > { %7672 = vmatprep.subr.msk.bf16.mxu1 %vm525_vm0, %v4518_v48  ;;  %v5099_v48 = vpack.c.bf16 %v5078_v37, %v5077_v38 }
 0x41c   : > { %6949 = vmatmul.mubr.msk.bf16.gmra.mrb[4].mxu1 %vm476_vm1, %v8709_v12 }
 0x41d   : > { %6952 = vmatprep.mubr.msk.bf16.mxu1 %vm476_vm1, %v8715_v22 }
 0x424   : > { %6953 = vmatmul.mubr.msk.bf16.gmra.mrb[8].mxu1 %vm476_vm1, %v8717_v28 }
 0x425   : > { %6956 = vmatprep.mubr.msk.bf16.mxu1 %vm476_vm1, %v8723_v42 }
 0x42c   : > { %6957 = vmatmul.mubr.msk.bf16.gmra.mrb[12].mxu1 %vm476_vm1, %v8725_v14 }
 0x42d   : > { %6960 = vmatprep.mubr.msk.bf16.mxu1 %vm476_vm1, %v8731_v39 }
 0x434   : > { %6961 = vmatmul.mubr.msk.bf16.gmra.mrb[16].mxu1 %vm476_vm1, %v8733_v2 }
 0x435   : > { %6964 = vmatprep.mubr.msk.bf16.mxu1 %vm476_vm1, %v8739_v24 }
 0x43c   : > { %6965 = vmatmul.mubr.msk.bf16.gmra.mrb[20].mxu1 %vm476_vm1, %v8741_v30 }
 0x43d   : > { %6968 = vmatprep.mubr.msk.bf16.mxu1 %vm476_vm1, %v8747_v45 }
 0x444   : > { %6969 = vmatmul.mubr.msk.bf16.gmra.mrb[24].mxu1 %vm476_vm1, %v8749_v47 }
 0x445   : > { %6972 = vmatprep.mubr.msk.bf16.mxu1 %vm476_vm1, %v8755_v25 }
 0x44c   : > { %6973 = vmatmul.mubr.msk.bf16.gmra.mrb[28].mxu1 %vm476_vm1, %v8855_v50 }
 0x44d   : > { %6978 = vmatprep.mubr.msk.bf16.mxu1 %vm476_vm1, %v8592_v13  ;;  %v5106_v13 = vld [vmem:[#allocation8 + $0x1c] sm:$0xf] }
 0x454   : > { %6979 = vmatmul.mubr.msk.bf16.vlgmr.msra.gmra.mrb[0].mxu1 %vm476_vm1, %v8590_v8  ;;  %v4862_v8 = vsel %vm525_vm0, %v4812_v57, 0 }
 0x455   : > { %7011 = vmatpush3.bf16.msra.mxu1 %v4568_v5  ;;  %6982 = vmatprep.mubr.msk.bf16.mxu1 %vm476_vm1, %v8609_v9  ;;  %v4500_v9 = vld [vmem:[#allocation2 + $0x18a] sm:$0xff]  ;;  %v5088_v5 = vld [vmem:[#allocation2 + $0x1a1] sm:$0xff] }
 0x456   : > { %7673 = vmatprep.subr.msk.bf16.mxu1 %vm525_vm0, %v4812_v57 }
 0x45c   : > { %6983 = vmatmul.mubr.msk.bf16.gmra.mrb[4].mxu1 %vm476_vm1, %v8607_v55  ;;  %v4499_v55 = vld [vmem:[#allocation2 + $0x182] sm:$0xff] }
 0x45d   : > { %6986 = vmatprep.mubr.msk.bf16.mxu1 %vm476_vm1, %v8621_v18  ;;  %v5156_v18 = vsel %vm525_vm0, %v5106_v13, 0 }
 0x464   : > { %6987 = vmatmul.mubr.msk.bf16.gmra.mrb[8].mxu1 %vm476_vm1, %v8619_v11  ;;  %v8925_v11 = vpack.c.bf16 %v4500_v9, %v4499_v55 }
 0x465   : > { %6990 = vmatprep.mubr.msk.bf16.mxu1 %vm476_vm1, %v8633_v51  ;;  %v5058_v51 = vld [vmem:[#allocation2 + $0x39] sm:$0xff] }
 0x46c   : > { %6991 = vmatmul.mubr.msk.bf16.gmra.mrb[12].mxu1 %vm476_vm1, %v8631_v49  ;;  %v5400_v49 = vld [vmem:[#allocation8 + $0x20] sm:$0xf] }
 0x46d   : > { %6994 = vmatprep.mubr.msk.bf16.mxu1 %vm476_vm1, %v8645_v0 }
 0x474   : > { %6995 = vmatmul.mubr.msk.bf16.gmra.mrb[16].mxu1 %vm476_vm1, %v8643_v61  ;;  %v5057_v61 = vld [vmem:[#allocation2 + $0x31] sm:$0xff] }
 0x475   : > { %6998 = vmatprep.mubr.msk.bf16.mxu1 %vm476_vm1, %v8657_v7  ;;  %v5089_v0 = vpack.c.bf16 %v5058_v51, %v5057_v61  ;;  %v5062_v7 = vld [vmem:[#allocation2 + $0x69] sm:$0xff]  ;;  %v5690_v51 = vld [vmem:[%s8129_s6 + $0x30] sm:$0xff] }
 0x47c   : > { %6999 = vmatmul.mubr.msk.bf16.gmra.mrb[20].mxu1 %vm476_vm1, %v8655_v41  ;;  %v5060_v41 = vld [vmem:[#allocation2 + $0x51] sm:$0xff] }
 0x47d   : > { %7002 = vmatprep.mubr.msk.bf16.mxu1 %vm476_vm1, %v8673_v17 }
 0x484   : > { %7003 = vmatmul.mubr.msk.bf16.gmra.mrb[24].mxu1 %vm476_vm1, %v8671_v4  ;;  %v5059_v4 = vld [vmem:[#allocation2 + $0x49] sm:$0xff] }
 0x485   : > { %7006 = vmatprep.mubr.msk.bf16.mxu1 %vm476_vm1, %v8687_v54 }
 0x48c   : > { %7007 = vmatmul.mubr.msk.bf16.gmra.mrb[28].mxu1 %vm476_vm1, %v8685_v53 }
 0x48d   : > { %7012 = vmatprep.mubr.msk.bf16.mxu1 %vm476_vm1, %v8760_v21 }
 0x494   : > { %7013 = vmatmul.mubr.msk.bf16.vlgmr.msra.gmra.mrb[0].mxu1 %vm476_vm1, %v8764_v62 }
 0x495   : > { %7045 = vmatpush3.bf16.msra.mxu1 %v4862_v8  ;;  %7016 = vmatprep.mubr.msk.bf16.mxu1 %vm476_vm1, %v8771_v56 }
 0x496   : > { %7674 = vmatprep.subr.msk.bf16.mxu1 %vm525_vm0, %v5106_v13 }
 0x49c   : > { %7017 = vmatmul.mubr.msk.bf16.gmra.mrb[4].mxu1 %vm476_vm1, %v8773_v33 }
 0x49d   : > { %7020 = vmatprep.mubr.msk.bf16.mxu1 %vm476_vm1, %v8779_v3 }
 0x4a4   : > { %7021 = vmatmul.mubr.msk.bf16.gmra.mrb[8].mxu1 %vm476_vm1, %v8781_v10 }
 0x4a5   : > { %7024 = vmatprep.mubr.msk.bf16.mxu1 %vm476_vm1, %v8787_v44 }
 0x4ac   : > { %7025 = vmatmul.mubr.msk.bf16.gmra.mrb[12].mxu1 %vm476_vm1, %v8789_v46 }
 0x4ad   : > { %7028 = vmatprep.mubr.msk.bf16.mxu1 %vm476_vm1, %v8795_v16 }
 0x4b4   : > { %7029 = vmatmul.mubr.msk.bf16.gmra.mrb[16].mxu1 %vm476_vm1, %v8797_v26 }
 0x4b5   : > { %7032 = vmatprep.mubr.msk.bf16.mxu1 %vm476_vm1, %v8803_v27 }
 0x4bc   : > { %7033 = vmatmul.mubr.msk.bf16.gmra.mrb[20].mxu1 %vm476_vm1, %v8805_v31 }
 0x4bd   : > { %7036 = vmatprep.mubr.msk.bf16.mxu1 %vm476_vm1, %v8811_v43 }
 0x4c4   : > { %7037 = vmatmul.mubr.msk.bf16.gmra.mrb[24].mxu1 %vm476_vm1, %v8813_v40 }
 0x4c5   : > { %7040 = vmatprep.mubr.msk.bf16.mxu1 %vm476_vm1, %v8819_v36 }
 0x4cc   : > { %7041 = vmatmul.mubr.msk.bf16.gmra.mrb[28].mxu1 %vm476_vm1, %v8925_v11 }
 0x4cd   : > { %7046 = vmatprep.mubr.msk.bf16.mxu1 %vm476_vm1, %v8697_v34  ;;  %v5090_v34 = vpack.c.bf16 %v5060_v41, %v5059_v4  ;;  %v5688_v41 = vld [vmem:[%s8129_s6 + $0x20] sm:$0xff] }
 0x4d4   : > { %7047 = vmatmul.mubr.msk.bf16.vlgmr.msra.gmra.mrb[0].mxu1 %vm476_vm1, %v8707_v6  ;;  %v5450_v6 = vsel %vm525_vm0, %v5400_v49, 0 }
 0x4d5   : > { %7079 = vmatpush3.bf16.msra.mxu1 %v5156_v18  ;;  %7050 = vmatprep.mubr.msk.bf16.mxu1 %vm476_vm1, %v8709_v12  ;;  %v5061_v12 = vld [vmem:[#allocation2 + $0x61] sm:$0xff] }
 0x4d6   : > { %7675 = vmatprep.subr.msk.bf16.mxu1 %vm525_vm0, %v5400_v49 }
 0x4dc   : > { %7051 = vmatmul.mubr.msk.bf16.gmra.mrb[4].mxu1 %vm476_vm1, %v8715_v22  ;;  %v5091_v22 = vpack.c.bf16 %v5062_v7, %v5061_v12 }
 0x4dd   : > { %7054 = vmatprep.mubr.msk.bf16.mxu1 %vm476_vm1, %v8717_v28  ;;  %v5064_v28 = vld [vmem:[#allocation2 + $0x81] sm:$0xff] }
 0x4e4   : > { %7055 = vmatmul.mubr.msk.bf16.gmra.mrb[8].mxu1 %vm476_vm1, %v8723_v42  ;;  %v5066_v42 = vld [vmem:[#allocation2 + $0x99] sm:$0xff] }
 0x4e5   : > { %7058 = vmatprep.mubr.msk.bf16.mxu1 %vm476_vm1, %v8725_v14  ;;  %v5063_v14 = vld [vmem:[#allocation2 + $0x79] sm:$0xff] }
 0x4ec   : > { %7059 = vmatmul.mubr.msk.bf16.gmra.mrb[12].mxu1 %vm476_vm1, %v8731_v39  ;;  %v5092_v39 = vpack.c.bf16 %v5064_v28, %v5063_v14  ;;  %v5689_v28 = vld [vmem:[%s8129_s6 + $0x28] sm:$0xff] }
 0x4ed   : > { %7062 = vmatprep.mubr.msk.bf16.mxu1 %vm476_vm1, %v8733_v2 }
 0x4f4   : > { %7063 = vmatmul.mubr.msk.bf16.gmra.mrb[16].mxu1 %vm476_vm1, %v8739_v24  ;;  %v5068_v24 = vld [vmem:[#allocation2 + $0xb1] sm:$0xff] }
 0x4f5   : > { %7066 = vmatprep.mubr.msk.bf16.mxu1 %vm476_vm1, %v8741_v30  ;;  %v5070_v30 = vld [vmem:[#allocation2 + $0xc9] sm:$0xff] }
 0x4fc   : > { %7067 = vmatmul.mubr.msk.bf16.gmra.mrb[20].mxu1 %vm476_vm1, %v8747_v45  ;;  %v5067_v45 = vld [vmem:[#allocation2 + $0xa9] sm:$0xff] }
 0x4fd   : > { %7070 = vmatprep.mubr.msk.bf16.mxu1 %vm476_vm1, %v8749_v47  ;;  %v5094_v47 = vpack.c.bf16 %v5068_v24, %v5067_v45 }
 0x504   : > { %7071 = vmatmul.mubr.msk.bf16.gmra.mrb[24].mxu1 %vm476_vm1, %v8755_v25  ;;  %v5069_v25 = vld [vmem:[#allocation2 + $0xc1] sm:$0xff] }
 0x505   : > { %7074 = vmatprep.mubr.msk.bf16.mxu1 %vm476_vm1, %v8855_v50  ;;  %v5095_v21 = vpack.c.bf16 %v5070_v30, %v5069_v25  ;;  %v5087_v50 = vld [vmem:[#allocation2 + $0x199] sm:$0xff] }
 0x506   : > { %v5104_v57 = vpack.c.bf16 %v5088_v5, %v5087_v50  ;;  %v5694_v25 = vld [vmem:[%s8129_s6 + $0x50] sm:$0xff] }
 0x50c   : > { %7075 = vmatmul.mubr.msk.bf16.gmra.mrb[28].mxu1 %vm476_vm1, %v8683_v52  ;;  %v5065_v52 = vld [vmem:[#allocation2 + $0x91] sm:$0xff] }
 0x50d   : > { %7080 = vmatprep.mubr.msk.bf16.mxu1 %vm476_vm1, %v5089_v0  ;;  %v5093_v2 = vpack.c.bf16 %v5066_v42, %v5065_v52 }
 0x514   : > { %7081 = vmatmul.mubr.msk.bf16.vlgmr.msra.gmra.mrb[0].mxu1 %vm476_vm1, %v5090_v34  ;;  %v5691_v34 = vld [vmem:[%s8129_s6 + $0x38] sm:$0xff] }
 0x515   : > { %7113 = vmatpush3.bf16.msra.mxu1 %v5450_v6  ;;  %7084 = vmatprep.mubr.msk.bf16.mxu1 %vm476_vm1, %v5091_v22 }
 0x51c   : > { %7085 = vmatmul.mubr.msk.bf16.gmra.mrb[4].mxu1 %vm476_vm1, %v5092_v39 }
 0x51d   : > { %7088 = vmatprep.mubr.msk.bf16.mxu1 %vm476_vm1, %v5093_v2 }
 0x524   : > { %7089 = vmatmul.mubr.msk.bf16.gmra.mrb[8].mxu1 %vm476_vm1, %v5094_v47 }
 0x525   : > { %7092 = vmatprep.mubr.msk.bf16.mxu1 %vm476_vm1, %v5095_v21 }
 0x52c   : > { %7093 = vmatmul.mubr.msk.bf16.gmra.mrb[12].mxu1 %vm476_vm1, %v5096_v15 }
 0x52d   : > { %7096 = vmatprep.mubr.msk.bf16.mxu1 %vm476_vm1, %v5097_v59 }
 0x534   : > { %7097 = vmatmul.mubr.msk.bf16.gmra.mrb[16].mxu1 %vm476_vm1, %v5098_v29 }
 0x535   : > { %7100 = vmatprep.mubr.msk.bf16.mxu1 %vm476_vm1, %v5099_v48 }
 0x53c   : > { %7101 = vmatmul.mubr.msk.bf16.gmra.mrb[20].mxu1 %vm476_vm1, %v8673_v17  ;;  %v5382_v17 = vld [vmem:[#allocation2 + $0x1a2] sm:$0xff] }
 0x53d   : > { %7104 = vmatprep.mubr.msk.bf16.mxu1 %vm476_vm1, %v5101_v20 }
 0x544   : > { %7105 = vmatmul.mubr.msk.bf16.gmra.mrb[24].mxu1 %vm476_vm1, %v8687_v54  ;;  %v9018_v54 = vld [vmem:[%s9175_s4] ss:$0 sm:$0xff] }
 0x545   : > { %7108 = vmatprep.mubr.msk.bf16.mxu1 %vm476_vm1, %v8685_v53  ;;  %v5398_v53 = vpack.c.bf16 %v5382_v17, %v5381_v60  ;;  %v5698_v17 = vld [vmem:[%s8129_s6 + $0x70] sm:$0xff] }
 0x54c   : > { %7109 = vmatmul.mubr.msk.bf16.gmra.mrb[28].mxu1 %vm476_vm1, %v5104_v57 }
 0x54d   : > { %7114 = vmatprep.mubr.msk.bf16.mxu1 %vm476_vm1, %v8764_v62 }
 0x554   : > { %7115 = vmatmul.mubr.msk.bf16.vlgmr.msra.gmra.mrb[0].mxu1 %vm476_vm1, %v8771_v56  ;;  %v5686_v56 = vld [vmem:[%s8129_s6 + $0x10] sm:$0xff] }
 0x555   : > { %7118 = vmatprep.mubr.msk.bf16.mxu1 %vm476_vm1, %v8773_v33 }
 0x55c   : > { %7119 = vmatmul.mubr.msk.bf16.gmra.mrb[4].mxu1 %vm476_vm1, %v8779_v3 }
 0x55d   : > { %7122 = vmatprep.mubr.msk.bf16.mxu1 %vm476_vm1, %v8781_v10  ;;  %v5684_v10 = vld [vmem:[%s8129_s6] sm:$0xff] }
 0x564   : > { %7123 = vmatmul.mubr.msk.bf16.gmra.mrb[8].mxu1 %vm476_vm1, %v8787_v44 }
 0x565   : > { %7126 = vmatprep.mubr.msk.bf16.mxu1 %vm476_vm1, %v8789_v46 }
 0x56c   : > { %7127 = vmatmul.mubr.msk.bf16.gmra.mrb[12].mxu1 %vm476_vm1, %v8795_v16  ;;  %v5687_v16 = vld [vmem:[%s8129_s6 + $0x18] sm:$0xff] }
 0x56d   : > { %7130 = vmatprep.mubr.msk.bf16.mxu1 %vm476_vm1, %v8797_v26 }
 0x574   : > { %7131 = vmatmul.mubr.msk.bf16.gmra.mrb[16].mxu1 %vm476_vm1, %v8803_v27 }
 0x575   : > { %7134 = vmatprep.mubr.msk.bf16.mxu1 %vm476_vm1, %v8805_v31 }
 0x57c   : > { %7135 = vmatmul.mubr.msk.bf16.gmra.mrb[20].mxu1 %vm476_vm1, %v8811_v43  ;;  %v5685_v43 = vld [vmem:[%s8129_s6 + $0x8] sm:$0xff] }
 0x57d   : > { %7138 = vmatprep.mubr.msk.bf16.mxu1 %vm476_vm1, %v8813_v40 }
 0x584   : > { %7139 = vmatmul.mubr.msk.bf16.gmra.mrb[24].mxu1 %vm476_vm1, %v8819_v36 }
 0x585   : > { %7142 = vmatprep.mubr.msk.bf16.mxu1 %vm476_vm1, %v8925_v11 }
 0x58c   : > { %7143 = vmatmul.mubr.msk.bf16.gmra.mrb[28].mxu1 %vm476_vm1, %v5398_v53 }
 0x627   : > { %v7116_v62 = vpop.f32.mrb[0].mxu1 }
 0x628   : > { %v5654_v33 = vadd.f32 %v7116_v62, %v9018_v54  ;;  %v5486_v3 = vpop.f32.mrb[1].mxu1 }
 0x629   : > { %v5652_v44 = vadd.f32 %v9018_v54, %v5486_v3  ;;  %v7117_v46 = vpop.f32.mrb[2].mxu1 }
 0x62a   : > { %v5718_v26 = vadd.f32 %v5686_v56, %v5654_v33  ;;  %v5655_v27 = vadd.f32 %v7117_v46, %v9018_v54  ;;  %v5489_v31 = vpop.f32.mrb[3].mxu1  ;;  %v5696_v56 = vld [vmem:[%s8129_s6 + $0x60] sm:$0xff] }
 0x62b   : > { %v5716_v40 = vadd.f32 %v5684_v10, %v5652_v44  ;;  %v5653_v36 = vadd.f32 %v9018_v54, %v5489_v31  ;;  %v5699_v10 = vld [vmem:[%s8129_s6 + $0x78] sm:$0xff] }
 0x62c   : > { %v5750_v8 = vmax.f32 %v5718_v26, 0.0  ;;  %v5719_v13 = vadd.f32 %v5687_v16, %v5655_v27  ;;  %v5697_v26 = vld [vmem:[%s8129_s6 + $0x68] sm:$0xff] }
 0x62d   : > { %v5748_v55 = vmax.f32 %v5716_v40, 0.0  ;;  %v5717_v9 = vadd.f32 %v5685_v43, %v5653_v36 }
 0x62e   : > { %5782 = vst [vmem:[%s9030_s11 + $0x10] sm:$0xff] %v5750_v8  ;;  %v5751_v11 = vmax.f32 %v5719_v13, 0.0 }
 0x62f   : > { %5780 = vst [vmem:[%s9030_s11] sm:$0xff] %v5748_v55  ;;  %v5749_v18 = vmax.f32 %v5717_v9, 0.0  ;;  %v7120_v49 = vpop.f32.mrb[4].mxu1 }
 0x630   : > { %5783 = vst [vmem:[%s9030_s11 + $0x18] sm:$0xff] %v5751_v11  ;;  %v5658_v61 = vadd.f32 %v7120_v49, %v9018_v54  ;;  %v5502_v0 = vpop.f32.mrb[5].mxu1  ;;  %v5702_v11 = vld [vmem:[%s8129_s6 + $0x90] sm:$0xff] }
 0x631   : > { %5781 = vst [vmem:[%s9030_s11 + $0x8] sm:$0xff] %v5749_v18  ;;  %v5656_v7 = vadd.f32 %v9018_v54, %v5502_v0  ;;  %v7121_v4 = vpop.f32.mrb[6].mxu1 }
 0x632   : > { %v5722_v6 = vadd.f32 %v5690_v51, %v5658_v61  ;;  %v5659_v12 = vadd.f32 %v7121_v4, %v9018_v54  ;;  %v5505_v22 = vpop.f32.mrb[7].mxu1  ;;  %v5700_v51 = vld [vmem:[%s8129_s6 + $0x80] sm:$0xff] }
 0x633   : > { %v5720_v42 = vadd.f32 %v5688_v41, %v5656_v7  ;;  %v5657_v14 = vadd.f32 %v9018_v54, %v5505_v22  ;;  %v5703_v41 = vld [vmem:[%s8129_s6 + $0x98] sm:$0xff] }
 0x634   : > { %v5754_v39 = vmax.f32 %v5722_v6, 0.0  ;;  %v5723_v52 = vadd.f32 %v5691_v34, %v5659_v12  ;;  %v5701_v6 = vld [vmem:[%s8129_s6 + $0x88] sm:$0xff] }
 0x635   : > { %v5752_v2 = vmax.f32 %v5720_v42, 0.0  ;;  %v5721_v24 = vadd.f32 %v5689_v28, %v5657_v14 }
 0x636   : > { %5786 = vst [vmem:[%s9030_s11 + $0x30] sm:$0xff] %v5754_v39  ;;  %v5755_v30 = vmax.f32 %v5723_v52, 0.0 }
 0x637   : > { %5784 = vst [vmem:[%s9030_s11 + $0x20] sm:$0xff] %v5752_v2  ;;  %v5753_v45 = vmax.f32 %v5721_v24, 0.0  ;;  %v7124_v47 = vpop.f32.mrb[8].mxu1 }
 0x638   : > { %5787 = vst [vmem:[%s9030_s11 + $0x38] sm:$0xff] %v5755_v30  ;;  %v5662_v21 = vadd.f32 %v7124_v47, %v9018_v54  ;;  %v5518_v58 = vpop.f32.mrb[9].mxu1  ;;  %v5706_v30 = vld [vmem:[%s8129_s6 + $0xb0] sm:$0xff] }
 0x639   : > { %5785 = vst [vmem:[%s9030_s11 + $0x28] sm:$0xff] %v5753_v45  ;;  %v5660_v1 = vadd.f32 %v9018_v54, %v5518_v58  ;;  %v7125_v15 = vpop.f32.mrb[10].mxu1 }
 0x63a   : > { %v5726_v59 = vadd.f32 %v5694_v25, %v5662_v21  ;;  %v5663_v35 = vadd.f32 %v7125_v15, %v9018_v54  ;;  %v5521_v37 = vpop.f32.mrb[11].mxu1  ;;  %v5704_v25 = vld [vmem:[%s8129_s6 + $0xa0] sm:$0xff] }
 0x63b   : > { %v5724_v29 = vadd.f32 %v5692_v63, %v5660_v1  ;;  %v5661_v38 = vadd.f32 %v9018_v54, %v5521_v37  ;;  %v5707_v63 = vld [vmem:[%s8129_s6 + $0xb8] sm:$0xff] }
 0x63c   : > { %v5758_v48 = vmax.f32 %v5726_v59, 0.0  ;;  %v5727_v19 = vadd.f32 %v5695_v32, %v5663_v35  ;;  %v5705_v59 = vld [vmem:[%s8129_s6 + $0xa8] sm:$0xff] }
 0x63d   : > { %v5756_v20 = vmax.f32 %v5724_v29, 0.0  ;;  %v5725_v50 = vadd.f32 %v5693_v23, %v5661_v38 }
 0x63e   : > { %5790 = vst [vmem:[%s9030_s11 + $0x50] sm:$0xff] %v5758_v48  ;;  %v5759_v5 = vmax.f32 %v5727_v19, 0.0 }
 0x63f   : > { %5788 = vst [vmem:[%s9030_s11 + $0x40] sm:$0xff] %v5756_v20  ;;  %v5757_v57 = vmax.f32 %v5725_v50, 0.0  ;;  %v7128_v60 = vpop.f32.mrb[12].mxu1 }
 0x640   : > { %5791 = vst [vmem:[%s9030_s11 + $0x58] sm:$0xff] %v5759_v5  ;;  %v5666_v53 = vadd.f32 %v7128_v60, %v9018_v54  ;;  %v5534_v62 = vpop.f32.mrb[13].mxu1  ;;  %v5710_v5 = vld [vmem:[%s8129_s6 + $0xd0] sm:$0xff] }
 0x641   : > { %5789 = vst [vmem:[%s9030_s11 + $0x48] sm:$0xff] %v5757_v57  ;;  %v5664_v33 = vadd.f32 %v9018_v54, %v5534_v62  ;;  %v7129_v3 = vpop.f32.mrb[14].mxu1 }
 0x642   : > { %v5730_v44 = vadd.f32 %v5698_v17, %v5666_v53  ;;  %v5667_v46 = vadd.f32 %v7129_v3, %v9018_v54  ;;  %v5537_v16 = vpop.f32.mrb[15].mxu1  ;;  %v5708_v17 = vld [vmem:[%s8129_s6 + $0xc0] sm:$0xff] }
 0x643   : > { %v5728_v27 = vadd.f32 %v5696_v56, %v5664_v33  ;;  %v5665_v31 = vadd.f32 %v9018_v54, %v5537_v16  ;;  %v5711_v56 = vld [vmem:[%s8129_s6 + $0xd8] sm:$0xff] }
 0x644   : > { %v5762_v43 = vmax.f32 %v5730_v44, 0.0  ;;  %v5731_v40 = vadd.f32 %v5699_v10, %v5667_v46  ;;  %v5709_v44 = vld [vmem:[%s8129_s6 + $0xc8] sm:$0xff] }
 0x645   : > { %v5760_v36 = vmax.f32 %v5728_v27, 0.0  ;;  %v5729_v8 = vadd.f32 %v5697_v26, %v5665_v31 }
 0x646   : > { %5794 = vst [vmem:[%s9030_s11 + $0x70] sm:$0xff] %v5762_v43  ;;  %v5763_v13 = vmax.f32 %v5731_v40, 0.0 }
 0x647   : > { %5792 = vst [vmem:[%s9030_s11 + $0x60] sm:$0xff] %v5760_v36  ;;  %v5761_v55 = vmax.f32 %v5729_v8, 0.0  ;;  %v7132_v9 = vpop.f32.mrb[16].mxu1 }
 0x648   : > { %5795 = vst [vmem:[%s9030_s11 + $0x78] sm:$0xff] %v5763_v13  ;;  %v5670_v18 = vadd.f32 %v7132_v9, %v9018_v54  ;;  %v5550_v49 = vpop.f32.mrb[17].mxu1  ;;  %v5714_v13 = vld [vmem:[%s8129_s6 + $0xf0] sm:$0xff] }
 0x649   : > { %5793 = vst [vmem:[%s9030_s11 + $0x68] sm:$0xff] %v5761_v55  ;;  %v5668_v61 = vadd.f32 %v9018_v54, %v5550_v49  ;;  %v7133_v0 = vpop.f32.mrb[18].mxu1 }
 0x64a   : > { %v5734_v7 = vadd.f32 %v5702_v11, %v5670_v18  ;;  %v5671_v4 = vadd.f32 %v7133_v0, %v9018_v54  ;;  %v5553_v34 = vpop.f32.mrb[19].mxu1  ;;  %v5712_v11 = vld [vmem:[%s8129_s6 + $0xe0] sm:$0xff] }
 0x64b   : > { %v5732_v12 = vadd.f32 %v5700_v51, %v5668_v61  ;;  %v5669_v22 = vadd.f32 %v9018_v54, %v5553_v34  ;;  %v5715_v51 = vld [vmem:[%s8129_s6 + $0xf8] sm:$0xff] }
 0x64c   : > { %v5766_v28 = vmax.f32 %v5734_v7, 0.0  ;;  %v5735_v42 = vadd.f32 %v5703_v41, %v5671_v4  ;;  %v5713_v7 = vld [vmem:[%s8129_s6 + $0xe8] sm:$0xff] }
 0x64d   : > { %v5764_v14 = vmax.f32 %v5732_v12, 0.0  ;;  %v5733_v39 = vadd.f32 %v5701_v6, %v5669_v22 }
 0x64e   : > { %5798 = vst [vmem:[%s9030_s11 + $0x90] sm:$0xff] %v5766_v28  ;;  %v5767_v52 = vmax.f32 %v5735_v42, 0.0 }
 0x64f   : > { %5796 = vst [vmem:[%s9030_s11 + $0x80] sm:$0xff] %v5764_v14  ;;  %v5765_v2 = vmax.f32 %v5733_v39, 0.0  ;;  %v7136_v24 = vpop.f32.mrb[20].mxu1 }
 0x650   : > { %5799 = vst [vmem:[%s9030_s11 + $0x98] sm:$0xff] %v5767_v52  ;;  %v5674_v45 = vadd.f32 %v7136_v24, %v9018_v54  ;;  %v5566_v47 = vpop.f32.mrb[21].mxu1 }
 0x651   : > { %5797 = vst [vmem:[%s9030_s11 + $0x88] sm:$0xff] %v5765_v2  ;;  %v5672_v21 = vadd.f32 %v9018_v54, %v5566_v47  ;;  %v7137_v58 = vpop.f32.mrb[22].mxu1 }
 0x652   : > { %v5738_v1 = vadd.f32 %v5706_v30, %v5674_v45  ;;  %v5675_v15 = vadd.f32 %v7137_v58, %v9018_v54  ;;  %v5569_v32 = vpop.f32.mrb[23].mxu1 }
 0x653   : > { %v5736_v35 = vadd.f32 %v5704_v25, %v5672_v21  ;;  %v5673_v37 = vadd.f32 %v9018_v54, %v5569_v32 }
 0x654   : > { %v5770_v23 = vmax.f32 %v5738_v1, 0.0  ;;  %v5739_v29 = vadd.f32 %v5707_v63, %v5675_v15 }
 0x655   : > { %v5768_v38 = vmax.f32 %v5736_v35, 0.0  ;;  %v5737_v48 = vadd.f32 %v5705_v59, %v5673_v37 }
 0x656   : > { %5802 = vst [vmem:[%s9030_s11 + $0xb0] sm:$0xff] %v5770_v23  ;;  %v5771_v19 = vmax.f32 %v5739_v29, 0.0 }
 0x657   : > { %5800 = vst [vmem:[%s9030_s11 + $0xa0] sm:$0xff] %v5768_v38  ;;  %v5769_v20 = vmax.f32 %v5737_v48, 0.0  ;;  %v7140_v50 = vpop.f32.mrb[24].mxu1 }
 0x658   : > { %5803 = vst [vmem:[%s9030_s11 + $0xb8] sm:$0xff] %v5771_v19  ;;  %v5678_v57 = vadd.f32 %v7140_v50, %v9018_v54  ;;  %v5582_v60 = vpop.f32.mrb[25].mxu1 }
 0x659   : > { %5801 = vst [vmem:[%s9030_s11 + $0xa8] sm:$0xff] %v5769_v20  ;;  %v5676_v53 = vadd.f32 %v9018_v54, %v5582_v60  ;;  %v7141_v62 = vpop.f32.mrb[26].mxu1 }
 0x65a   : > { %v5742_v33 = vadd.f32 %v5710_v5, %v5678_v57  ;;  %v5679_v3 = vadd.f32 %v7141_v62, %v9018_v54  ;;  %v5585_v10 = vpop.f32.mrb[27].mxu1 }
 0x65b   : > { %v5740_v46 = vadd.f32 %v5708_v17, %v5676_v53  ;;  %v5677_v16 = vadd.f32 %v9018_v54, %v5585_v10 }
 0x65c   : > { %v5774_v26 = vmax.f32 %v5742_v33, 0.0  ;;  %v5743_v27 = vadd.f32 %v5711_v56, %v5679_v3 }
 0x65d   : > { %v5772_v31 = vmax.f32 %v5740_v46, 0.0  ;;  %v5741_v43 = vadd.f32 %v5709_v44, %v5677_v16 }
 0x65e   : > { %5806 = vst [vmem:[%s9030_s11 + $0xd0] sm:$0xff] %v5774_v26  ;;  %v5775_v40 = vmax.f32 %v5743_v27, 0.0 }
 0x65f   : > { %5804 = vst [vmem:[%s9030_s11 + $0xc0] sm:$0xff] %v5772_v31  ;;  %v5773_v36 = vmax.f32 %v5741_v43, 0.0  ;;  %v7144_v8 = vpop.f32.mrb[28].mxu1 }
 0x660   : > { %5807 = vst [vmem:[%s9030_s11 + $0xd8] sm:$0xff] %v5775_v40  ;;  %v5682_v55 = vadd.f32 %v7144_v8, %v9018_v54  ;;  %v5598_v9 = vpop.f32.mrb[29].mxu1 }
 0x661   : > { %5805 = vst [vmem:[%s9030_s11 + $0xc8] sm:$0xff] %v5773_v36  ;;  %v5680_v18 = vadd.f32 %v9018_v54, %v5598_v9  ;;  %v7145_v49 = vpop.f32.mrb[30].mxu1 }
 0x662   : > { %v5746_v61 = vadd.f32 %v5714_v13, %v5682_v55  ;;  %v5683_v0 = vadd.f32 %v7145_v49, %v9018_v54  ;;  %v5601_v41 = vpop.f32.mrb[31].mxu1 }
 0x663   : > { %v5744_v4 = vadd.f32 %v5712_v11, %v5680_v18  ;;  %v5681_v34 = vadd.f32 %v9018_v54, %v5601_v41 }
 0x664   : > { %v5778_v6 = vmax.f32 %v5746_v61, 0.0  ;;  %v5747_v12 = vadd.f32 %v5715_v51, %v5683_v0 }
 0x665   : > { %v5776_v22 = vmax.f32 %v5744_v4, 0.0  ;;  %v5745_v28 = vadd.f32 %v5713_v7, %v5681_v34 }
 0x666   : > { %5810 = vst [vmem:[%s9030_s11 + $0xf0] sm:$0xff] %v5778_v6  ;;  %v5779_v42 = vmax.f32 %v5747_v12, 0.0 }
 0x667   : > { %5808 = vst [vmem:[%s9030_s11 + $0xe0] sm:$0xff] %v5776_v22  ;;  %v5777_v54 = vmax.f32 %v5745_v28, 0.0 }
 0x668   : > { %5811 = vst [vmem:[%s9030_s11 + $0xf8] sm:$0xff] %v5779_v42 }
 0x669   : > { %5809 = vst [vmem:[%s9030_s11 + $0xe8] sm:$0xff] %v5777_v54 }
 0x66a   : > { %7850 = shalt.err (!%p7847_p2)
}
 0x66b   : > { %s7851_s6 = scalar_lea.hbm %s9122_s9, 4096  ;;  %s7855_s8 = scalar_lea.hbm %s9176_s5, 8192 }
 0x66c   : > { %p7852_p13 = scmp.ne.s32.totalorder %s9122_s9, %s7851_s6  ;;  %p7856_p4 = scmp.lt.u32.totalorder %s9122_s9, %s9176_s5 }
 0x66d   : > { %p7857_p5 = scmp.lt.u32.totalorder %s7855_s8, %s7851_s6  ;;  %p7859_p11 = scmp.lt.u32.totalorder %s7851_s6, %s9122_s9 }
 0x66e   : > { %p7853_p6 = pnand %p7852_p13, %p9190_p0 }
 0x66f   : > { %p7858_p8 = por %p7857_p5, %p7856_p4 }
 0x670   : > { %p7854_p10 = pneg %p7853_p6 }
 0x671   : > { %p7860_p1 = por %p7859_p11, %p7858_p8 }
 0x673   : > { %p7861_p3 = pnand %p7860_p1, %p7854_p10 }
 0x675   : > { %7864 = shalt.err (!%p7861_p3)
}
 0x676   : > { %s7919_s28 = smov 128   ;;  %s7920_s15 = smov 8  }
 0x677   : > { %7686 = dma.vmem_to_hbm [thread:$0]  (%p9190_p0), %s9124_s30, 4096, %s9122_s9, %s5813_s22, %s7919_s28, %s7919_s28, %s7920_s15  }
 0x678 PF: > { %s5841_s16 = sand.u32 1, %s7895_s18   ;;  %p9191_p7 = scmp.ne.s32.totalorder %s9181_s25, 0 }
 0x679   : > { %p9192_p9 = scmp.ge.s32.totalorder %s7907_s21, 2  ;;  %s5842_s12 = scalar_lea.sflag [#allocation5], %s5841_s16 }
 0x67b   : > { %p7700_p12 = pnand %p9192_p9, %p9191_p7 }
 0x67d   : > { %7890 = dma.done.wait (!%p7700_p12), %s5842_s12, 4096  }
 0x67e   : > { %7892 = vsyncadd (!%p7700_p12), %s5842_s12, 4294963200  ;;  %p19_p2 = scmp.ge.s32.totalorder %s8061_s14, 4   ;;  %s9193_s18 = smov %s7899_s19 }
 0x67f   : > { %s9194_s19 = smov %s7903_s20  ;;  %s9195_s20 = smov %s8077_s27 }
 0x680   : > { %s9196_s21 = smov %s8061_s14  ;;  %21 = sbr.rel (!%p19_p2) target bundleno = 6 (0x6), region = 112 }
 0x687   :  { %5847 = vsyncpa [#allocation4], 1 }
 0x688   :  { %5849 = vsyncpa [#allocation4 + $0x1], 1 }
 0x689   :  { %5850 = vsyncpa [#allocation7], 1 }
 0x68a   :  { %5851 = vsyncpa [#allocation5], 1 }
 0x68b   :  { %5853 = vsyncpa [#allocation5 + $0x1], 1 }

// kernel: tpu_custom_call.1
= control target key start
LH: loop header
LB: loop body
LE: loop exit
PB: predicated region body
PF: predicated region fallthrough
CT: control target
= control target key end

     0   :  { %10 = vsyncpa [#allocation4], 0  ;;  %s9171_s0 = inlined_call_operand.hbm [shape: f32[2,16,16,128], index: 0, kind: input, shape index: {}]   ;;  %s9172_s1 = inlined_call_operand.hbm [shape: bf16[9,8,128], index: 1, kind: input, shape index: {}]   ;;  %s9173_s2 = inlined_call_operand.vmem [shape: f32[1,128], index: 2, kind: input, shape index: {}]   ;;  %s9174_s3 = inlined_call_operand.hbm [shape: bf16[9,8,128], index: 3, kind: input, shape index: {}]   ;;  %s9175_s4 = inlined_call_operand.vmem [shape: f32[1,128], index: 4, kind: input, shape index: {}]   ;;  %s9176_s5 = inlined_call_operand.hbm [shape: f32[2,16,16,128], index: 5, kind: output, shape index: {}]  }
   0x1   :  { %12 = vsyncpa [#allocation4 + $0x1], 0 }
   0x2   :  { %13 = vsyncpa [#allocation7], 0 }
   0x3   :  { %14 = vsyncpa [#allocation5], 0 }
   0x4   :  { %16 = vsyncpa [#allocation5 + $0x1], 0  ;;  %s7951_s18 = smov 0   ;;  %s7953_s19 = smov 0  }
   0x5   :  { %s7955_s20 = smov 0   ;;  %s7957_s21 = smov 0  }
   0x6 LB: > { %s7972_s22 = sadd.s32 4294967295, %s7907_s21   ;;  %s5918_s23 = sadd.s32 4294967294, %s7907_s21   ;;  %s7907_s21 = sphi %s7957_s21, %s9196_s21   ;;  %s7903_s20 = sphi %s7955_s20, %s9195_s20   ;;  %s7899_s19 = sphi %s7953_s19, %s9194_s19   ;;  %s7895_s18 = sphi %s7951_s18, %s9193_s18  }
   0x7   : > { %p42_p0 = scmp.ne.s32.totalorder %s7899_s19, %s7895_s18  ;;  %p9177_p1 = scmp.eq.s32.totalorder %s7972_s22, 0 }
   0x8   : > { %p156_p3 = scmp.eq.s32.totalorder %s5918_s23, 1  ;;  %p5919_p5 = scmp.ge.s32.totalorder %s7907_s21, 1 }
   0x9   : > { %p7981_p4 = por %p9177_p1, %p42_p0  ;;  %p163_p7 = scmp.lt.s32.totalorder %s7907_s21, 3 }
   0xa   : > { %p7986_p6 = por %p156_p3, %p42_p0  ;;  %s7909_s27 = smov [#allocation6]  }
   0xb   : > { %s9180_s24 = scalar_select %p7981_p4, 1, 0 }
   0xc   : > { %s9181_s25 = scalar_select %p7986_p6, 1, 0 }
   0xd   : > { %p7991_p8 = pnand %p5919_p5, %p163_p7  ;;  %s175_s28 = sshll.u32 %s7909_s27, 4  ;;  %s7995_s28 = int_to_ptr.vmem [resolvable:$true] %s175_s28 }
   0xe   : > { %s7910_s30 = smov [#allocation8]   ;;  %s7751_s9 = scalar_lea.hbm %s9172_s1, 576 }
   0xf   : > { %p7688_p9 = pneg %p7991_p8  ;;  %s191_s6 = sshll.u32 %s7910_s30, 4  ;;  %s8006_s6 = int_to_ptr.vmem [resolvable:$true] %s191_s6 }
  0x10   : > { %p7752_p12 = scmp.ne.s32.totalorder %s9172_s1, %s7751_s9  ;;  %p7758_p5 = scmp.lt.u32.totalorder %s7751_s9, %s9172_s1 }
  0x11   : > { %p8002_p11 = pnand %p7688_p9, %p9177_p1 }
  0x13   : > { %p7753_p13 = pneg %p8002_p11 }
  0x15   : > { %p7754_p0 = pnand %p7753_p13, %p7752_p12 }
  0x17   : > { %p7755_p3 = pneg %p7754_p0 }
  0x19   : > { %p7760_p7 = pnand %p7758_p5, %p7755_p3 }
  0x1b   : > { %7763 = shalt.err (!%p7760_p7)
}
  0x1c   : > { %s7764_s14 = scalar_lea.vmem %s7995_s28, 576  ;;  %p7772_p2 = scmp.lt.s32.totalorder %s7995_s28, %s7995_s28 }
  0x1d   : > { %p7765_p9 = scmp.ne.s32.totalorder %s7995_s28, %s7764_s14  ;;  %p7773_p12 = scmp.lt.s32.totalorder %s7764_s14, %s7764_s14 }
  0x1f   : > { %p7767_p10 = pnand %p7765_p9, %p7753_p13  ;;  %p7774_p0 = por %p7773_p12, %p7772_p2 }
  0x21   : > { %p7768_p1 = pneg %p7767_p10 }
  0x23   : > { %p7775_p6 = pnand %p7774_p0, %p7768_p1 }
  0x25   : > { %7778 = shalt.err (!%p7775_p6)
}
  0x26   : > { %s7911_s15 = smov 64   ;;  %s7912_s16 = smov 4  }
  0x27   : > { %7691 = dma.hbm_to_vmem [thread:$0]  (!%p8002_p11), %s9172_s1, 576, %s7995_s28, [#allocation7], %s7911_s15, %s7911_s15, %s7912_s16  }
  0x28   : > { %s7779_s7 = scalar_lea.hbm %s9174_s3, 576 }
  0x29   : > { %p7780_p2 = scmp.ne.s32.totalorder %s9174_s3, %s7779_s7  ;;  %p7786_p10 = scmp.lt.u32.totalorder %s7779_s7, %s9174_s3 }
  0x2b   : > { %p7782_p1 = pnand %p7780_p2, %p7753_p13 }
  0x2d   : > { %p7783_p6 = pneg %p7782_p1 }
  0x2f   : > { %p7788_p3 = pnand %p7786_p10, %p7783_p6 }
  0x31   : > { %7791 = shalt.err (!%p7788_p3)
}
  0x32   : > { %s7792_s28 = scalar_lea.vmem %s8006_s6, 576  ;;  %p7800_p12 = scmp.lt.s32.totalorder %s8006_s6, %s8006_s6 }
  0x33   : > { %p7793_p5 = scmp.ne.s32.totalorder %s8006_s6, %s7792_s28  ;;  %p7801_p0 = scmp.lt.s32.totalorder %s7792_s28, %s7792_s28 }
  0x35   : > { %p7795_p7 = pnand %p7793_p5, %p7753_p13  ;;  %p7802_p2 = por %p7801_p0, %p7800_p12 }
  0x37   : > { %p7796_p9 = pneg %p7795_p7 }
  0x39   : > { %p7803_p1 = pnand %p7802_p2, %p7796_p9 }
  0x3b   : > { %7806 = shalt.err (!%p7803_p1)
}
  0x3c   : > { %7694 = dma.hbm_to_vmem [thread:$0]  (!%p8002_p11), %s9174_s3, 576, %s8006_s6, [#allocation7], %s7911_s15, %s7911_s15, %s7912_s16  }
  0x3d   : > { %s8061_s14 = sadd.s32 1, %s7907_s21   ;;  %s29_s29 = sadd.s32 1, %s7903_s20 }
  0x3e   : > { %s26_s17 = ssub.s32 %s7907_s21, %s8061_s14  ;;  %p36_p13 = scmp.ne.s32.totalorder %s7903_s20, %s7899_s19 }
  0x3f   : > { %p27_p6 = scmp.eq.s32.totalorder %s26_s17, 0  ;;  %p37_p10 = scmp.eq.s32.totalorder %s7907_s21, 0 }
  0x40   : > { %p9184_p3 = scmp.eq.s32.totalorder %s7972_s22, 1  ;;  %p7705_p7 = scmp.lt.s32.totalorder %s7907_s21, 2 }
  0x41   : > { %s8077_s27 = scalar_select %p27_p6, %s7903_s20, %s29_s29  }
  0x42   : > { %p8071_p5 = por %p9184_p3, %p36_p13  ;;  %p38_p9 = por %p37_p10, %p36_p13 }
  0x43   : > { %s208_s30 = sand.u32 1, %s7903_s20   ;;  %s6226_s6 = sshll.u32 %s7907_s21, 12 }
  0x44   : > { %s9185_s23 = scalar_select %p8071_p5, 1, 0 }
  0x45   : > { %s5923_s7 = sshll.u32 %s208_s30, 8  ;;  %s8084_s8 = scalar_lea.hbm %s9171_s0, %s6226_s6 }
  0x46   : > { %s212_s9 = scalar_lea.vmem [#allocation3], %s5923_s7  ;;  %p8088_p11 = pnand %p7705_p7, %p38_p9 }
  0x47   : > { %s219_s10 = sshll.u32 %s212_s9, 4  ;;  %s8092_s28 = scalar_lea.sflag [#allocation4], %s208_s30  ;;  %s8086_s10 = int_to_ptr.vmem [resolvable:$true] %s219_s10 }
  0x48   : > { %s7807_s12 = scalar_lea.hbm %s8084_s8, 4096  ;;  %p7809_p0 = pneg %p8088_p11 }
  0x49   : > { %p7808_p12 = scmp.ne.s32.totalorder %s8084_s8, %s7807_s12  ;;  %s7812_s17 = scalar_lea.hbm %s9171_s0, 8192 }
  0x4a   : > { %p7813_p13 = scmp.lt.u32.totalorder %s8084_s8, %s9171_s0  ;;  %p7814_p6 = scmp.lt.u32.totalorder %s7812_s17, %s7807_s12 }
  0x4b   : > { %p7810_p2 = pnand %p7809_p0, %p7808_p12  ;;  %p7816_p3 = scmp.lt.u32.totalorder %s7807_s12, %s8084_s8 }
  0x4c   : > { %p7815_p10 = por %p7814_p6, %p7813_p13 }
  0x4d   : > { %p7811_p1 = pneg %p7810_p2 }
  0x4e   : > { %p7817_p7 = por %p7816_p3, %p7815_p10 }
  0x50   : > { %p7818_p9 = pnand %p7817_p7, %p7811_p1 }
  0x52   : > { %7821 = shalt.err (!%p7818_p9)
}
  0x53   : > { %s7822_s30 = scalar_lea.vmem %s8086_s10, 4096  ;;  %s7913_s15 = smov [#allocation3]  }
  0x54   : > { %p7823_p12 = scmp.ne.s32.totalorder %s8086_s10, %s7822_s30  ;;  %s7827_s16 = sshll.u32 %s7913_s15, 4  ;;  %s7828_s16 = int_to_ptr.vmem [resolvable:$false] %s7827_s16 }
  0x55   : > { %s7829_s9 = scalar_lea.vmem %s7828_s16, 8192  ;;  %p7830_p4 = scmp.lt.s32.totalorder %s8086_s10, %s7828_s16 }
  0x56   : > { %p7825_p2 = pnand %p7823_p12, %p7809_p0  ;;  %p7831_p13 = scmp.lt.s32.totalorder %s7829_s9, %s7822_s30 }
  0x58   : > { %p7826_p5 = pneg %p7825_p2  ;;  %p7832_p6 = por %p7831_p13, %p7830_p4 }
  0x5a   : > { %p7833_p10 = pnand %p7832_p6, %p7826_p5 }
  0x5c   : > { %7836 = shalt.err (!%p7833_p10)
}
  0x5d   : > { %s7914_s12 = smov 128   ;;  %s7915_s13 = smov 8  }
  0x5e   : > { %7698 = dma.hbm_to_vmem [thread:$0]  (!%p8088_p11), %s8084_s8, 4096, %s8086_s10, %s8092_s28, %s7914_s12, %s7914_s12, %s7915_s13  }
  0x5f   : > { %231 = sbr.rel (%p7991_p8) target bundleno = 1656 (0x678), region = 40  ;;  %s8123_s29 = sand.u32 (!%p7991_p8), 1, %s7899_s19  }
  0x60   : > { %s5927_s17 = sshll.u32 (!%p7991_p8), %s8123_s29, 8  ;;  %s234_s7 = scalar_lea.sflag (!%p7991_p8), [#allocation4], %s8123_s29 }
  0x61   : > { %s8129_s6 = scalar_lea.vmem (!%p7991_p8), [#allocation3], %s5927_s17  ;;  %p9187_p4 = scmp.ne.s32.totalorder (!%p7991_p8), %s9180_s24, 0 }
  0x66   : > { %7882 = dma.done.wait (%p9187_p4), %s234_s7, 4096  }
  0x67   : > { %7884 = vsyncadd (%p9187_p4), %s234_s7, 4294963200  ;;  %p9188_p5 = scmp.eq.s32.totalorder %s7972_s22, 0 }
  0x69   : > { %7886 = dma.done.wait (%p9188_p5), [#allocation7], 1152   ;;  %p9189_p8 = pmov %p9188_p5 }
  0x6a   : > { %v7916_v0 = vmov 0.0   ;;  %vm525_vm0 = vcmask 1043456   ;;  %v475_v1 = vld [vmem:[#allocation6 + $0x4] sm:$0xf]  ;;  %v425_v2 = vld [vmem:[#allocation6] sm:$0xf] }
  0x6b   : > { %7888 = vsyncadd (%p9189_p8), [#allocation7], 4294966144  ;;  %273 = vst [vmem:[#allocation2] sm:$0xff] %v7916_v0  ;;  %v313_v3 = vld [vmem:[%s8129_s6] sm:$0xff]  ;;  %7658 = vmatprep.subr.msk.bf16.mxu0 %vm525_vm0, %v475_v1  ;;  %v527_v4 = vsel %vm525_vm0, %v475_v1, 0  ;;  %vm476_vm1 = vcmask 64512  }
  0x6c   : > { %274 = vst [vmem:[#allocation2 + $0x8] sm:$0xff] %v7916_v0  ;;  %275 = vst [vmem:[#allocation2 + $0x10] sm:$0xff] %v7916_v0  ;;  %v314_v7 = vld [vmem:[%s8129_s6 + $0x8] sm:$0xff]  ;;  %6535 = vmatpush3.bf16.msra.mxu0 %v527_v4  ;;  %v315_v10 = vld [vmem:[%s8129_s6 + $0x10] sm:$0xff]  ;;  %v739_v13 = vsel %vm525_vm0, %v425_v2, 0  ;;  %v7917_v54 = vmov 0.0|0.0  }
  0x6d   : > { %277 = vst [vmem:[#allocation2 + $0x198] sm:$0xff] %v7916_v0  ;;  %278 = vst [vmem:[#allocation2 + $0x1a0] sm:$0xff] %v7916_v0  ;;  %v8143_v9 = vpack.c.bf16 %v314_v7, %v313_v3  ;;  %v316_v11 = vld [vmem:[%s8129_s6 + $0x18] sm:$0xff]  ;;  %v317_v12 = vld [vmem:[%s8129_s6 + $0x20] sm:$0xff]  ;;  %7659 = vmatprep.subr.msk.bf16.mxu0 %vm525_vm0, %v425_v2  ;;  %s9030_s11 = scalar_lea.vmem [#allocation9], %s5927_s17  ;;  %s6227_s28 = sshll.u32 %s7972_s22, 12 }
  0x6e   : > { %279 = vst [vmem:[#allocation2 + $0x1a8] sm:$0xff] %v7916_v0  ;;  %281 = vst [vmem:[#allocation2 + $0x18] sm:$0x1] %v7916_v0  ;;  %v8150_v14 = vpack.c.bf16 %v316_v11, %v315_v10  ;;  %v318_v15 = vld [vmem:[%s8129_s6 + $0x28] sm:$0xff]  ;;  %v319_v16 = vld [vmem:[%s8129_s6 + $0x30] sm:$0xff]  ;;  %s5826_s30 = sshll.u32 %s9030_s11, 4  ;;  %s9122_s9 = scalar_lea.hbm %s9176_s5, %s6227_s28  ;;  %s9124_s30 = int_to_ptr.vmem [resolvable:$true] %s5826_s30 }
  0x6f   : > { %282 = vst [vmem:[#allocation2 + $0x30] sm:$0x1] %v7916_v0  ;;  %283 = vst [vmem:[#allocation2 + $0x48] sm:$0x1] %v7916_v0  ;;  %v320_v17 = vld [vmem:[%s8129_s6 + $0x38] sm:$0xff]  ;;  %v321_v18 = vld [vmem:[%s8129_s6 + $0x40] sm:$0xff]  ;;  %v8175_v33 = vpack.c.bf16 %v318_v15, %v317_v12 }
  0x70   : > { %284 = vst [vmem:[#allocation2 + $0x60] sm:$0x1] %v7916_v0  ;;  %285 = vst [vmem:[#allocation2 + $0x78] sm:$0x1] %v7916_v0  ;;  %v322_v19 = vld [vmem:[%s8129_s6 + $0x48] sm:$0xff]  ;;  %v323_v20 = vld [vmem:[%s8129_s6 + $0x50] sm:$0xff]  ;;  %v8180_v37 = vpack.c.bf16 %v320_v17, %v319_v16 }
  0x71   : > { %286 = vst [vmem:[#allocation2 + $0x90] sm:$0x1] %v7916_v0  ;;  %287 = vst [vmem:[#allocation2 + $0xa8] sm:$0x1] %v7916_v0  ;;  %v324_v21 = vld [vmem:[%s8129_s6 + $0x58] sm:$0xff]  ;;  %v325_v22 = vld [vmem:[%s8129_s6 + $0x60] sm:$0xff]  ;;  %v8191_v43 = vpack.c.bf16 %v322_v19, %v321_v18 }
  0x72   : > { %288 = vst [vmem:[#allocation2 + $0xc0] sm:$0x1] %v7916_v0  ;;  %289 = vst [vmem:[#allocation2 + $0xd8] sm:$0x1] %v7916_v0  ;;  %v326_v23 = vld [vmem:[%s8129_s6 + $0x68] sm:$0xff]  ;;  %v327_v24 = vld [vmem:[%s8129_s6 + $0x70] sm:$0xff]  ;;  %v8193_v44 = vpack.c.bf16 %v324_v21, %v323_v20 }
  0x73   : > { %290 = vst [vmem:[#allocation2 + $0xf0] sm:$0x1] %v7916_v0  ;;  %291 = vst [vmem:[#allocation2 + $0x108] sm:$0x1] %v7916_v0  ;;  %v426_v5 = vld [vmem:[#allocation2 + $0x1] sm:$0xff]  ;;  %v427_v6 = vld [vmem:[#allocation2 + $0x9] sm:$0xff]  ;;  %v8199_v45 = vpack.c.bf16 %v326_v23, %v325_v22 }
  0x74   : > { %292 = vst [vmem:[#allocation2 + $0x120] sm:$0x1] %v7916_v0  ;;  %293 = vst [vmem:[#allocation2 + $0x138] sm:$0x1] %v7916_v0  ;;  %v458_v8 = vpack.c.bf16 %v427_v6, %v426_v5  ;;  %v328_v25 = vld [vmem:[%s8129_s6 + $0x78] sm:$0xff]  ;;  %v329_v26 = vld [vmem:[%s8129_s6 + $0x80] sm:$0xff] }
  0x75   : > { %294 = vst [vmem:[#allocation2 + $0x150] sm:$0x1] %v7916_v0  ;;  %295 = vst [vmem:[#allocation2 + $0x168] sm:$0x1] %v7916_v0  ;;  %v330_v27 = vld [vmem:[%s8129_s6 + $0x88] sm:$0xff]  ;;  %v331_v28 = vld [vmem:[%s8129_s6 + $0x90] sm:$0xff]  ;;  %v8201_v46 = vpack.c.bf16 %v328_v25, %v327_v24 }
  0x76   : > { %296 = vst [vmem:[#allocation2 + $0x180] sm:$0x1] %v7916_v0  ;;  %297 = vst [vmem:[#allocation2 + $0x29] sm:$0x1] %v7916_v0  ;;  %6536 = vmatprep.mubr.msk.bf16.mxu0 %vm476_vm1, %v458_v8  ;;  %v332_v29 = vld [vmem:[%s8129_s6 + $0x98] sm:$0xff]  ;;  %v333_v30 = vld [vmem:[%s8129_s6 + $0xa0] sm:$0xff]  ;;  %v8207_v47 = vpack.c.bf16 %v330_v27, %v329_v26 }
  0x77   : > { %298 = vst [vmem:[#allocation2 + $0x41] sm:$0x1] %v7916_v0  ;;  %299 = vst [vmem:[#allocation2 + $0x59] sm:$0x1] %v7916_v0  ;;  %6537 = vmatmul.mubr.msk.bf16.vlgmr.msra.gmra.mrb[0].mxu0 %vm476_vm1, %v8143_v9  ;;  %v334_v31 = vld [vmem:[%s8129_s6 + $0xa8] sm:$0xff]  ;;  %v335_v32 = vld [vmem:[%s8129_s6 + $0xb0] sm:$0xff]  ;;  %v8209_v48 = vpack.c.bf16 %v332_v29, %v331_v28 }
  0x78   : > { %300 = vst [vmem:[#allocation2 + $0x71] sm:$0x1] %v7916_v0  ;;  %301 = vst [vmem:[#allocation2 + $0x89] sm:$0x1] %v7916_v0  ;;  %6569 = vmatpush3.bf16.msra.mxu0 %v739_v13  ;;  %6540 = vmatprep.mubr.msk.bf16.mxu0 %vm476_vm1, %v8150_v14  ;;  %v336_v34 = vld [vmem:[%s8129_s6 + $0xb8] sm:$0xff]  ;;  %v337_v35 = vld [vmem:[%s8129_s6 + $0xc0] sm:$0xff]  ;;  %v8215_v49 = vpack.c.bf16 %v334_v31, %v333_v30 }
  0x79   : > { %302 = vst [vmem:[#allocation2 + $0xa1] sm:$0x1] %v7916_v0  ;;  %303 = vst [vmem:[#allocation2 + $0xb9] sm:$0x1] %v7916_v0  ;;  %v338_v36 = vld [vmem:[%s8129_s6 + $0xc8] sm:$0xff]  ;;  %v339_v38 = vld [vmem:[%s8129_s6 + $0xd0] sm:$0xff]  ;;  %v8217_v50 = vpack.c.bf16 %v336_v34, %v335_v32 }
  0x7a   : > { %304 = vst [vmem:[#allocation2 + $0xd1] sm:$0x1] %v7916_v0  ;;  %305 = vst [vmem:[#allocation2 + $0xe9] sm:$0x1] %v7916_v0  ;;  %v340_v39 = vld [vmem:[%s8129_s6 + $0xd8] sm:$0xff]  ;;  %v341_v40 = vld [vmem:[%s8129_s6 + $0xe0] sm:$0xff]  ;;  %v8223_v51 = vpack.c.bf16 %v338_v36, %v337_v35 }
  0x7b   : > { %306 = vst [vmem:[#allocation2 + $0x101] sm:$0x1] %v7916_v0  ;;  %307 = vst [vmem:[#allocation2 + $0x119] sm:$0x1] %v7916_v0  ;;  %v342_v41 = vld [vmem:[%s8129_s6 + $0xe8] sm:$0xff]  ;;  %v8225_v52 = vpack.c.bf16 %v340_v39, %v339_v38  ;;  %s5813_s22 = scalar_lea.sflag [#allocation5], %s8123_s29 }
  0x7c   : > { %308 = vst [vmem:[#allocation2 + $0x131] sm:$0x1] %v7916_v0  ;;  %309 = vst [vmem:[#allocation2 + $0x149] sm:$0x1] %v7916_v0  ;;  %v951_v42 = vld [vmem:[#allocation6 + $0x8] sm:$0xf]  ;;  %v8231_v53 = vpack.c.bf16 %v342_v41, %v341_v40 }
  0x7d   : > { %310 = vst [vmem:[#allocation2 + $0x161] sm:$0x1] %v7916_v0  ;;  %311 = vst [vmem:[#allocation2 + $0x179] sm:$0x1] %v7916_v0  ;;  %7660 = vmatprep.subr.msk.bf16.mxu0 %vm525_vm0, %v951_v42  ;;  %v1001_v61 = vsel %vm525_vm0, %v951_v42, 0  ;;  %s7837_s12 = scalar_lea.vmem %s9124_s30, 4096 }
  0x7e   : > { %312 = vst [vmem:[#allocation2 + $0x191] sm:$0x1] %v7916_v0  ;;  %345 = vst [vmem:[#allocation2 + $0x19] sm:$0xff] %v313_v3  ;;  %v8242_v62 = vld [vmem:[#allocation6 + $0xc] sm:$0xf]  ;;  %p7838_p11 = scmp.ne.s32.totalorder %s9124_s30, %s7837_s12  ;;  %p9190_p0 = scmp.ne.s32.totalorder %s9185_s23, 0 }
  0x7f   : > { %346 = vst [vmem:[#allocation2 + $0x21] sm:$0xff] %v314_v7  ;;  %347 = vst [vmem:[#allocation2 + $0x31] sm:$0xff] %v315_v10  ;;  %6541 = vmatmul.mubr.msk.bf16.gmra.mrb[4].mxu0 %vm476_vm1, %v8175_v33  ;;  %s7918_s13 = smov [#allocation9]  }
  0x80   : > { %348 = vst [vmem:[#allocation2 + $0x39] sm:$0xff] %v316_v11  ;;  %349 = vst [vmem:[#allocation2 + $0x49] sm:$0xff] %v317_v12  ;;  %6544 = vmatprep.mubr.msk.bf16.mxu0 %vm476_vm1, %v8180_v37  ;;  %p7839_p1 = pnand %p7838_p11, %p9190_p0  ;;  %s7841_s17 = sshll.u32 %s7918_s13, 4  ;;  %s7842_s17 = int_to_ptr.vmem [resolvable:$false] %s7841_s17 }
  0x81   : > { %350 = vst [vmem:[#allocation2 + $0x51] sm:$0xff] %v318_v15  ;;  %351 = vst [vmem:[#allocation2 + $0x61] sm:$0xff] %v319_v16  ;;  %s7843_s7 = scalar_lea.vmem %s7842_s17, 8192  ;;  %p7844_p7 = scmp.lt.s32.totalorder %s9124_s30, %s7842_s17 }
  0x82   : > { %352 = vst [vmem:[#allocation2 + $0x69] sm:$0xff] %v320_v17  ;;  %353 = vst [vmem:[#allocation2 + $0x79] sm:$0xff] %v321_v18  ;;  %p7840_p3 = pneg %p7839_p1  ;;  %p7845_p9 = scmp.lt.s32.totalorder %s7843_s7, %s7837_s12 }
  0x83   : > { %354 = vst [vmem:[#allocation2 + $0x81] sm:$0xff] %v322_v19  ;;  %355 = vst [vmem:[#allocation2 + $0x91] sm:$0xff] %v323_v20 }
  0x84   : > { %356 = vst [vmem:[#allocation2 + $0x99] sm:$0xff] %v324_v21  ;;  %357 = vst [vmem:[#allocation2 + $0xa9] sm:$0xff] %v325_v22  ;;  %p7846_p12 = por %p7845_p9, %p7844_p7 }
  0x85   : > { %358 = vst [vmem:[#allocation2 + $0xb1] sm:$0xff] %v326_v23  ;;  %359 = vst [vmem:[#allocation2 + $0xc1] sm:$0xff] %v327_v24  ;;  %v379_v55 = vld [vmem:[#allocation2 + $0x18] sm:$0xff] }
  0x86   : > { %360 = vst [vmem:[#allocation2 + $0xc9] sm:$0xff] %v328_v25  ;;  %361 = vst [vmem:[#allocation2 + $0xd9] sm:$0xff] %v329_v26  ;;  %v380_v56 = vld [vmem:[#allocation2 + $0x20] sm:$0xff]  ;;  %v381_v57 = vld [vmem:[#allocation2 + $0x30] sm:$0xff]  ;;  %p7847_p2 = pnand %p7846_p12, %p7840_p3 }
  0x87   : > { %362 = vst [vmem:[#allocation2 + $0xe1] sm:$0xff] %v330_v27  ;;  %363 = vst [vmem:[#allocation2 + $0xf1] sm:$0xff] %v331_v28  ;;  %6545 = vmatmul.mubr.msk.bf16.gmra.mrb[8].mxu0 %vm476_vm1, %v8191_v43  ;;  %v382_v58 = vld [vmem:[#allocation2 + $0x38] sm:$0xff]  ;;  %v8237_v59 = vpack.c.bf16 %v380_v56, %v379_v55  ;;  %v383_v63 = vld [vmem:[#allocation2 + $0x48] sm:$0xff] }
  0x88   : > { %364 = vst [vmem:[#allocation2 + $0xf9] sm:$0xff] %v332_v29  ;;  %365 = vst [vmem:[#allocation2 + $0x109] sm:$0xff] %v333_v30  ;;  %6548 = vmatprep.mubr.msk.bf16.mxu0 %vm476_vm1, %v8193_v44  ;;  %v8239_v60 = vpack.c.bf16 %v382_v58, %v381_v57  ;;  %v384_v0 = vld [vmem:[#allocation2 + $0x50] sm:$0xff]  ;;  %v385_v1 = vld [vmem:[#allocation2 + $0x60] sm:$0xff] }
  0x89   : > { %366 = vst [vmem:[#allocation2 + $0x111] sm:$0xff] %v334_v31  ;;  %367 = vst [vmem:[#allocation2 + $0x121] sm:$0xff] %v335_v32  ;;  %v386_v2 = vld [vmem:[#allocation2 + $0x68] sm:$0xff]  ;;  %v8250_v3 = vpack.c.bf16 %v384_v0, %v383_v63  ;;  %v387_v5 = vld [vmem:[#allocation2 + $0x78] sm:$0xff] }
  0x8a   : > { %368 = vst [vmem:[#allocation2 + $0x129] sm:$0xff] %v336_v34  ;;  %369 = vst [vmem:[#allocation2 + $0x139] sm:$0xff] %v337_v35  ;;  %v8252_v4 = vpack.c.bf16 %v386_v2, %v385_v1  ;;  %v388_v6 = vld [vmem:[#allocation2 + $0x80] sm:$0xff]  ;;  %v389_v7 = vld [vmem:[#allocation2 + $0x90] sm:$0xff] }
  0x8b   : > { %370 = vst [vmem:[#allocation2 + $0x141] sm:$0xff] %v338_v36  ;;  %371 = vst [vmem:[#allocation2 + $0x151] sm:$0xff] %v339_v38  ;;  %v390_v8 = vld [vmem:[#allocation2 + $0x98] sm:$0xff]  ;;  %v8258_v10 = vpack.c.bf16 %v388_v6, %v387_v5  ;;  %v391_v12 = vld [vmem:[#allocation2 + $0xa8] sm:$0xff]  ;;  %v1295_v6 = vsel %vm525_vm0, %v8242_v62, 0 }
  0x8c   : > { %372 = vst [vmem:[#allocation2 + $0x159] sm:$0xff] %v340_v39  ;;  %373 = vst [vmem:[#allocation2 + $0x169] sm:$0xff] %v341_v40  ;;  %v8260_v11 = vpack.c.bf16 %v390_v8, %v389_v7  ;;  %v392_v13 = vld [vmem:[#allocation2 + $0xb0] sm:$0xff]  ;;  %v393_v15 = vld [vmem:[#allocation2 + $0xc0] sm:$0xff] }
  0x8d   : > { %374 = vst [vmem:[#allocation2 + $0x171] sm:$0xff] %v342_v41  ;;  %v394_v16 = vld [vmem:[#allocation2 + $0xc8] sm:$0xff]  ;;  %v8266_v17 = vpack.c.bf16 %v392_v13, %v391_v12  ;;  %v395_v19 = vld [vmem:[#allocation2 + $0xd8] sm:$0xff]  ;;  %v8295_v39 = vld [vmem:[%s8129_s6 + $0xf0] sm:$0xff] }
  0x8e   : > { %v8268_v18 = vpack.c.bf16 %v394_v16, %v393_v15  ;;  %v396_v20 = vld [vmem:[#allocation2 + $0xe0] sm:$0xff]  ;;  %v397_v21 = vld [vmem:[#allocation2 + $0xf0] sm:$0xff]  ;;  %v8298_v40 = vld [vmem:[%s8129_s6 + $0xf8] sm:$0xff]  ;;  %375 = vst [vmem:[#allocation2 + $0x181] sm:$0xff] %v8295_v39 }
  0x8f   : > { %6549 = vmatmul.mubr.msk.bf16.gmra.mrb[12].mxu0 %vm476_vm1, %v8199_v45  ;;  %v398_v22 = vld [vmem:[#allocation2 + $0xf8] sm:$0xff]  ;;  %v8274_v23 = vpack.c.bf16 %v396_v20, %v395_v19  ;;  %v399_v25 = vld [vmem:[#allocation2 + $0x108] sm:$0xff]  ;;  %376 = vst [vmem:[#allocation2 + $0x189] sm:$0xff] %v8298_v40  ;;  %v1539_v7 = vld [vmem:[#allocation6 + $0x10] sm:$0xf] }
  0x90   : > { %6552 = vmatprep.mubr.msk.bf16.mxu0 %vm476_vm1, %v8201_v46  ;;  %v8276_v24 = vpack.c.bf16 %v398_v22, %v397_v21  ;;  %v400_v26 = vld [vmem:[#allocation2 + $0x110] sm:$0xff]  ;;  %v401_v27 = vld [vmem:[#allocation2 + $0x120] sm:$0xff] }
  0x91   : > { %v402_v28 = vld [vmem:[#allocation2 + $0x128] sm:$0xff]  ;;  %v8282_v29 = vpack.c.bf16 %v400_v26, %v399_v25  ;;  %v403_v31 = vld [vmem:[#allocation2 + $0x138] sm:$0xff] }
  0x92   : > { %v8284_v30 = vpack.c.bf16 %v402_v28, %v401_v27  ;;  %v404_v32 = vld [vmem:[#allocation2 + $0x140] sm:$0xff]  ;;  %v405_v34 = vld [vmem:[#allocation2 + $0x150] sm:$0xff] }
  0x93   : > { %v406_v35 = vld [vmem:[#allocation2 + $0x158] sm:$0xff]  ;;  %v8290_v36 = vpack.c.bf16 %v404_v32, %v403_v31  ;;  %v407_v41 = vld [vmem:[#allocation2 + $0x168] sm:$0xff] }
  0x94   : > { %v8292_v38 = vpack.c.bf16 %v406_v35, %v405_v34  ;;  %v408_v42 = vld [vmem:[#allocation2 + $0x170] sm:$0xff]  ;;  %v902_v55 = vld [vmem:[#allocation2 + $0x2] sm:$0xff]  ;;  %v907_v1 = vld [vmem:[#allocation2 + $0x3a] sm:$0xff] }
  0x95   : > { %v903_v56 = vld [vmem:[#allocation2 + $0xa] sm:$0xff]  ;;  %v8306_v57 = vpack.c.bf16 %v408_v42, %v407_v41  ;;  %v905_v63 = vld [vmem:[#allocation2 + $0x22] sm:$0xff]  ;;  %v906_v0 = vld [vmem:[#allocation2 + $0x32] sm:$0xff] }
  0x96   : > { %v934_v58 = vpack.c.bf16 %v903_v56, %v902_v55  ;;  %v8313_v5 = vpack.c.bf16 %v907_v1, %v906_v0  ;;  %v908_v8 = vld [vmem:[#allocation2 + $0x4a] sm:$0xff]  ;;  %v909_v12 = vld [vmem:[#allocation2 + $0x52] sm:$0xff]  ;;  %v910_v13 = vld [vmem:[#allocation2 + $0x62] sm:$0xff] }
  0x97   : > { %6553 = vmatmul.mubr.msk.bf16.gmra.mrb[16].mxu0 %vm476_vm1, %v8207_v47  ;;  %v911_v15 = vld [vmem:[#allocation2 + $0x6a] sm:$0xff]  ;;  %v8322_v16 = vpack.c.bf16 %v909_v12, %v908_v8  ;;  %v913_v20 = vld [vmem:[#allocation2 + $0x82] sm:$0xff]  ;;  %v914_v21 = vld [vmem:[#allocation2 + $0x92] sm:$0xff] }
  0x98   : > { %6556 = vmatprep.mubr.msk.bf16.mxu0 %vm476_vm1, %v8209_v48  ;;  %v8324_v19 = vpack.c.bf16 %v911_v15, %v910_v13  ;;  %v915_v22 = vld [vmem:[#allocation2 + $0x9a] sm:$0xff]  ;;  %v916_v27 = vld [vmem:[#allocation2 + $0xaa] sm:$0xff]  ;;  %v917_v28 = vld [vmem:[#allocation2 + $0xb2] sm:$0xff] }
  0x99   : > { %v8332_v26 = vpack.c.bf16 %v915_v22, %v914_v21  ;;  %v918_v31 = vld [vmem:[#allocation2 + $0xc2] sm:$0xff]  ;;  %v919_v32 = vld [vmem:[#allocation2 + $0xca] sm:$0xff]  ;;  %v8338_v34 = vpack.c.bf16 %v917_v28, %v916_v27  ;;  %v920_v41 = vld [vmem:[#allocation2 + $0xda] sm:$0xff] }
  0x9a   : > { %v8340_v35 = vpack.c.bf16 %v919_v32, %v918_v31  ;;  %v921_v42 = vld [vmem:[#allocation2 + $0xe2] sm:$0xff]  ;;  %v922_v55 = vld [vmem:[#allocation2 + $0xf2] sm:$0xff]  ;;  %v923_v56 = vld [vmem:[#allocation2 + $0xfa] sm:$0xff]  ;;  %v1589_v32 = vsel %vm525_vm0, %v1539_v7, 0 }
  0x9b   : > { %v925_v0 = vld [vmem:[#allocation2 + $0x112] sm:$0xff]  ;;  %v926_v1 = vld [vmem:[#allocation2 + $0x122] sm:$0xff]  ;;  %v928_v13 = vld [vmem:[#allocation2 + $0x13a] sm:$0xff] }
  0x9c   : > { %v929_v15 = vld [vmem:[#allocation2 + $0x142] sm:$0xff]  ;;  %v932_v27 = vld [vmem:[#allocation2 + $0x16a] sm:$0xff]  ;;  %v933_v28 = vld [vmem:[#allocation2 + $0x172] sm:$0xff] }
  0x9d   : > { %v8362_v21 = vpack.c.bf16 %v929_v15, %v928_v13  ;;  %v8370_v31 = vpack.c.bf16 %v933_v28, %v932_v27 }
  0x9f   : > { %6557 = vmatmul.mubr.msk.bf16.gmra.mrb[20].mxu0 %vm476_vm1, %v8215_v49 }
  0xa0   : > { %6560 = vmatprep.mubr.msk.bf16.mxu0 %vm476_vm1, %v8217_v50 }
  0xa7   : > { %6561 = vmatmul.mubr.msk.bf16.gmra.mrb[24].mxu0 %vm476_vm1, %v8223_v51 }
  0xa8   : > { %6564 = vmatprep.mubr.msk.bf16.mxu0 %vm476_vm1, %v8225_v52 }
  0xaf   : > { %6565 = vmatmul.mubr.msk.bf16.gmra.mrb[28].mxu0 %vm476_vm1, %v8231_v53 }
  0xb0   : > { %6570 = vmatprep.mubr.msk.bf16.mxu0 %vm476_vm1, %v7917_v54 }
  0xb7   : > { %6571 = vmatmul.mubr.msk.bf16.vlgmr.msra.gmra.mrb[0].mxu0 %vm476_vm1, %v8237_v59 }
  0xb8   : > { %6603 = vmatpush3.bf16.msra.mxu0 %v1001_v61  ;;  %6574 = vmatprep.mubr.msk.bf16.mxu0 %vm476_vm1, %v8239_v60  ;;  %v904_v61 = vld [vmem:[#allocation2 + $0x1a] sm:$0xff] }
  0xb9   : > { %7661 = vmatprep.subr.msk.bf16.mxu0 %vm525_vm0, %v8242_v62  ;;  %v8311_v2 = vpack.c.bf16 %v905_v63, %v904_v61  ;;  %v912_v62 = vld [vmem:[#allocation2 + $0x7a] sm:$0xff]  ;;  %v8348_v61 = vpack.c.bf16 %v923_v56, %v922_v55  ;;  %v924_v63 = vld [vmem:[#allocation2 + $0x10a] sm:$0xff] }
  0xba   : > { %v8330_v25 = vpack.c.bf16 %v913_v20, %v912_v62  ;;  %v8354_v8 = vpack.c.bf16 %v925_v0, %v924_v63  ;;  %v930_v62 = vld [vmem:[#allocation2 + $0x152] sm:$0xff]  ;;  %v931_v20 = vld [vmem:[#allocation2 + $0x15a] sm:$0xff]  ;;  %v2128_v56 = vld [vmem:[#allocation6 + $0x18] sm:$0xf] }
  0xbb   : > { %v8364_v22 = vpack.c.bf16 %v931_v20, %v930_v62 }
  0xbf   : > { %6575 = vmatmul.mubr.msk.bf16.gmra.mrb[4].mxu0 %vm476_vm1, %v8250_v3 }
  0xc0   : > { %6578 = vmatprep.mubr.msk.bf16.mxu0 %vm476_vm1, %v8252_v4 }
  0xc7   : > { %6579 = vmatmul.mubr.msk.bf16.gmra.mrb[8].mxu0 %vm476_vm1, %v8258_v10 }
  0xc8   : > { %6582 = vmatprep.mubr.msk.bf16.mxu0 %vm476_vm1, %v8260_v11 }
  0xcf   : > { %6583 = vmatmul.mubr.msk.bf16.gmra.mrb[12].mxu0 %vm476_vm1, %v8266_v17 }
  0xd0   : > { %6586 = vmatprep.mubr.msk.bf16.mxu0 %vm476_vm1, %v8268_v18 }
  0xd7   : > { %6587 = vmatmul.mubr.msk.bf16.gmra.mrb[16].mxu0 %vm476_vm1, %v8274_v23 }
  0xd8   : > { %6590 = vmatprep.mubr.msk.bf16.mxu0 %vm476_vm1, %v8276_v24 }
  0xdf   : > { %6591 = vmatmul.mubr.msk.bf16.gmra.mrb[20].mxu0 %vm476_vm1, %v8282_v29 }
  0xe0   : > { %6594 = vmatprep.mubr.msk.bf16.mxu0 %vm476_vm1, %v8284_v30 }
  0xe7   : > { %6595 = vmatmul.mubr.msk.bf16.gmra.mrb[24].mxu0 %vm476_vm1, %v8290_v36 }
  0xe8   : > { %6598 = vmatprep.mubr.msk.bf16.mxu0 %vm476_vm1, %v8292_v38 }
  0xef   : > { %6599 = vmatmul.mubr.msk.bf16.gmra.mrb[28].mxu0 %vm476_vm1, %v8306_v57 }
  0xf0   : > { %6604 = vmatprep.mubr.msk.bf16.mxu0 %vm476_vm1, %v934_v58  ;;  %v8346_v58 = vpack.c.bf16 %v921_v42, %v920_v41  ;;  %v1833_v41 = vld [vmem:[#allocation6 + $0x14] sm:$0xf] }
  0xf1   : > { %v1883_v55 = vsel %vm525_vm0, %v1833_v41, 0 }
  0xf7   : > { %6605 = vmatmul.mubr.msk.bf16.vlgmr.msra.gmra.mrb[0].mxu0 %vm476_vm1, %v8311_v2 }
  0xf8   : > { %6637 = vmatpush3.bf16.msra.mxu0 %v1295_v6  ;;  %6608 = vmatprep.mubr.msk.bf16.mxu0 %vm476_vm1, %v8313_v5  ;;  %v927_v6 = vld [vmem:[#allocation2 + $0x12a] sm:$0xff] }
  0xf9   : > { %7662 = vmatprep.subr.msk.bf16.mxu0 %vm525_vm0, %v1539_v7  ;;  %v8356_v12 = vpack.c.bf16 %v927_v6, %v926_v1  ;;  %v1227_v7 = vld [vmem:[#allocation2 + $0x188] sm:$0xff] }
  0xff   : > { %6609 = vmatmul.mubr.msk.bf16.gmra.mrb[4].mxu0 %vm476_vm1, %v8322_v16 }
 0x100   : > { %6612 = vmatprep.mubr.msk.bf16.mxu0 %vm476_vm1, %v8324_v19 }
 0x107   : > { %6613 = vmatmul.mubr.msk.bf16.gmra.mrb[8].mxu0 %vm476_vm1, %v8330_v25 }
 0x108   : > { %6616 = vmatprep.mubr.msk.bf16.mxu0 %vm476_vm1, %v8332_v26 }
 0x10f   : > { %6617 = vmatmul.mubr.msk.bf16.gmra.mrb[12].mxu0 %vm476_vm1, %v8338_v34 }
 0x110   : > { %6620 = vmatprep.mubr.msk.bf16.mxu0 %vm476_vm1, %v8340_v35 }
 0x117   : > { %6621 = vmatmul.mubr.msk.bf16.gmra.mrb[16].mxu0 %vm476_vm1, %v8346_v58 }
 0x118   : > { %6624 = vmatprep.mubr.msk.bf16.mxu0 %vm476_vm1, %v8348_v61 }
 0x11f   : > { %6625 = vmatmul.mubr.msk.bf16.gmra.mrb[20].mxu0 %vm476_vm1, %v8354_v8 }
 0x120   : > { %6628 = vmatprep.mubr.msk.bf16.mxu0 %vm476_vm1, %v8356_v12 }
 0x127   : > { %6629 = vmatmul.mubr.msk.bf16.gmra.mrb[24].mxu0 %vm476_vm1, %v8362_v21 }
 0x128   : > { %6632 = vmatprep.mubr.msk.bf16.mxu0 %vm476_vm1, %v8364_v22 }
 0x12f   : > { %6633 = vmatmul.mubr.msk.bf16.gmra.mrb[28].mxu0 %vm476_vm1, %v8370_v31 }
 0x130   : > { %6638 = vmatprep.mubr.msk.bf16.mxu0 %vm476_vm1, %v8237_v59  ;;  %v1226_v59 = vld [vmem:[#allocation2 + $0x180] sm:$0xff] }
 0x131   : > { %v8406_v42 = vpack.c.bf16 %v1227_v7, %v1226_v59 }
 0x137   : > { %6639 = vmatmul.mubr.msk.bf16.vlgmr.msra.gmra.mrb[0].mxu0 %vm476_vm1, %v8239_v60 }
 0x138   : > { %6671 = vmatpush3.bf16.msra.mxu0 %v1589_v32  ;;  %6642 = vmatprep.mubr.msk.bf16.mxu0 %vm476_vm1, %v8250_v3 }
 0x139   : > { %7663 = vmatprep.subr.msk.bf16.mxu0 %vm525_vm0, %v1833_v41 }
 0x13f   : > { %6643 = vmatmul.mubr.msk.bf16.gmra.mrb[4].mxu0 %vm476_vm1, %v8252_v4 }
 0x140   : > { %6646 = vmatprep.mubr.msk.bf16.mxu0 %vm476_vm1, %v8258_v10 }
 0x147   : > { %6647 = vmatmul.mubr.msk.bf16.gmra.mrb[8].mxu0 %vm476_vm1, %v8260_v11 }
 0x148   : > { %6650 = vmatprep.mubr.msk.bf16.mxu0 %vm476_vm1, %v8266_v17 }
 0x14f   : > { %6651 = vmatmul.mubr.msk.bf16.gmra.mrb[12].mxu0 %vm476_vm1, %v8268_v18 }
 0x150   : > { %6654 = vmatprep.mubr.msk.bf16.mxu0 %vm476_vm1, %v8274_v23 }
 0x157   : > { %6655 = vmatmul.mubr.msk.bf16.gmra.mrb[16].mxu0 %vm476_vm1, %v8276_v24 }
 0x158   : > { %6658 = vmatprep.mubr.msk.bf16.mxu0 %vm476_vm1, %v8282_v29 }
 0x15f   : > { %6659 = vmatmul.mubr.msk.bf16.gmra.mrb[20].mxu0 %vm476_vm1, %v8284_v30 }
 0x160   : > { %6662 = vmatprep.mubr.msk.bf16.mxu0 %vm476_vm1, %v8290_v36 }
 0x167   : > { %6663 = vmatmul.mubr.msk.bf16.gmra.mrb[24].mxu0 %vm476_vm1, %v8292_v38 }
 0x168   : > { %6666 = vmatprep.mubr.msk.bf16.mxu0 %vm476_vm1, %v8306_v57 }
 0x16f   : > { %6667 = vmatmul.mubr.msk.bf16.gmra.mrb[28].mxu0 %vm476_vm1, %v8406_v42 }
 0x170   : > { %6672 = vmatprep.mubr.msk.bf16.mxu0 %vm476_vm1, %v8143_v9  ;;  %v8444_v9 = vpack.c.bf16 %v8298_v40, %v8295_v39 }
 0x177   : > { %6673 = vmatmul.mubr.msk.bf16.vlgmr.msra.gmra.mrb[0].mxu0 %vm476_vm1, %v8150_v14  ;;  %v2178_v14 = vsel %vm525_vm0, %v2128_v56, 0 }
 0x178   : > { %6705 = vmatpush3.bf16.msra.mxu0 %v1883_v55  ;;  %6676 = vmatprep.mubr.msk.bf16.mxu0 %vm476_vm1, %v8175_v33  ;;  %v2422_v33 = vld [vmem:[#allocation6 + $0x1c] sm:$0xf] }
 0x179   : > { %7664 = vmatprep.subr.msk.bf16.mxu0 %vm525_vm0, %v2128_v56  ;;  %v2472_v40 = vsel %vm525_vm0, %v2422_v33, 0 }
 0x17f   : > { %6677 = vmatmul.mubr.msk.bf16.gmra.mrb[4].mxu0 %vm476_vm1, %v8180_v37  ;;  %v1814_v37 = vld [vmem:[#allocation2 + $0x182] sm:$0xff] }
 0x180   : > { %6680 = vmatprep.mubr.msk.bf16.mxu0 %vm476_vm1, %v8191_v43  ;;  %v1815_v43 = vld [vmem:[#allocation2 + $0x18a] sm:$0xff] }
 0x181   : > { %v8480_v39 = vpack.c.bf16 %v1815_v43, %v1814_v37 }
 0x187   : > { %6681 = vmatmul.mubr.msk.bf16.gmra.mrb[8].mxu0 %vm476_vm1, %v8193_v44 }
 0x188   : > { %6684 = vmatprep.mubr.msk.bf16.mxu0 %vm476_vm1, %v8199_v45 }
 0x18f   : > { %6685 = vmatmul.mubr.msk.bf16.gmra.mrb[12].mxu0 %vm476_vm1, %v8201_v46 }
 0x190   : > { %6688 = vmatprep.mubr.msk.bf16.mxu0 %vm476_vm1, %v8207_v47 }
 0x197   : > { %6689 = vmatmul.mubr.msk.bf16.gmra.mrb[16].mxu0 %vm476_vm1, %v8209_v48 }
 0x198   : > { %6692 = vmatprep.mubr.msk.bf16.mxu0 %vm476_vm1, %v8215_v49 }
 0x19f   : > { %6693 = vmatmul.mubr.msk.bf16.gmra.mrb[20].mxu0 %vm476_vm1, %v8217_v50 }
 0x1a0   : > { %6696 = vmatprep.mubr.msk.bf16.mxu0 %vm476_vm1, %v8223_v51 }
 0x1a7   : > { %6697 = vmatmul.mubr.msk.bf16.gmra.mrb[24].mxu0 %vm476_vm1, %v8225_v52 }
 0x1a8   : > { %6700 = vmatprep.mubr.msk.bf16.mxu0 %vm476_vm1, %v8231_v53 }
 0x1af   : > { %6701 = vmatmul.mubr.msk.bf16.gmra.mrb[28].mxu0 %vm476_vm1, %v8444_v9 }
 0x1b0   : > { %6706 = vmatprep.mubr.msk.bf16.mxu0 %vm476_vm1, %v8311_v2  ;;  %v2716_v2 = vld [vmem:[#allocation6 + $0x20] sm:$0xf] }
 0x1b7   : > { %6707 = vmatmul.mubr.msk.bf16.vlgmr.msra.gmra.mrb[0].mxu0 %vm476_vm1, %v8313_v5 }
 0x1b8   : > { %6739 = vmatpush3.bf16.msra.mxu0 %v2178_v14  ;;  %6710 = vmatprep.mubr.msk.bf16.mxu0 %vm476_vm1, %v8322_v16 }
 0x1b9   : > { %7665 = vmatprep.subr.msk.bf16.mxu0 %vm525_vm0, %v2422_v33 }
 0x1bf   : > { %6711 = vmatmul.mubr.msk.bf16.gmra.mrb[4].mxu0 %vm476_vm1, %v8324_v19 }
 0x1c0   : > { %6714 = vmatprep.mubr.msk.bf16.mxu0 %vm476_vm1, %v8330_v25 }
 0x1c7   : > { %6715 = vmatmul.mubr.msk.bf16.gmra.mrb[8].mxu0 %vm476_vm1, %v8332_v26 }
 0x1c8   : > { %6718 = vmatprep.mubr.msk.bf16.mxu0 %vm476_vm1, %v8338_v34 }
 0x1cf   : > { %6719 = vmatmul.mubr.msk.bf16.gmra.mrb[12].mxu0 %vm476_vm1, %v8340_v35 }
 0x1d0   : > { %6722 = vmatprep.mubr.msk.bf16.mxu0 %vm476_vm1, %v8346_v58 }
 0x1d7   : > { %6723 = vmatmul.mubr.msk.bf16.gmra.mrb[16].mxu0 %vm476_vm1, %v8348_v61 }
 0x1d8   : > { %6726 = vmatprep.mubr.msk.bf16.mxu0 %vm476_vm1, %v8354_v8 }
 0x1df   : > { %6727 = vmatmul.mubr.msk.bf16.gmra.mrb[20].mxu0 %vm476_vm1, %v8356_v12 }
 0x1e0   : > { %6730 = vmatprep.mubr.msk.bf16.mxu0 %vm476_vm1, %v8362_v21 }
 0x1e7   : > { %6731 = vmatmul.mubr.msk.bf16.gmra.mrb[24].mxu0 %vm476_vm1, %v8364_v22 }
 0x1e8   : > { %6734 = vmatprep.mubr.msk.bf16.mxu0 %vm476_vm1, %v8370_v31 }
 0x1ef   : > { %6735 = vmatmul.mubr.msk.bf16.gmra.mrb[28].mxu0 %vm476_vm1, %v8480_v39 }
 0x1f0   : > { %6740 = vmatprep.mubr.msk.bf16.mxu0 %vm476_vm1, %v8239_v60  ;;  %v2373_v60 = vld [vmem:[#allocation2 + $0x31] sm:$0xff] }
 0x1f7   : > { %6741 = vmatmul.mubr.msk.bf16.vlgmr.msra.gmra.mrb[0].mxu0 %vm476_vm1, %v8250_v3  ;;  %v2374_v3 = vld [vmem:[#allocation2 + $0x39] sm:$0xff] }
 0x1f8   : > { %6773 = vmatpush3.bf16.msra.mxu0 %v2472_v40  ;;  %6744 = vmatprep.mubr.msk.bf16.mxu0 %vm476_vm1, %v8252_v4  ;;  %v2405_v4 = vpack.c.bf16 %v2374_v3, %v2373_v60 }
 0x1f9   : > { %7666 = vmatprep.subr.msk.bf16.mxu0 %vm525_vm0, %v2716_v2 }
 0x1ff   : > { %6745 = vmatmul.mubr.msk.bf16.gmra.mrb[4].mxu0 %vm476_vm1, %v8258_v10  ;;  %v2375_v10 = vld [vmem:[#allocation2 + $0x49] sm:$0xff] }
 0x200   : > { %6748 = vmatprep.mubr.msk.bf16.mxu0 %vm476_vm1, %v8260_v11  ;;  %v2376_v11 = vld [vmem:[#allocation2 + $0x51] sm:$0xff] }
 0x207   : > { %6749 = vmatmul.mubr.msk.bf16.gmra.mrb[8].mxu0 %vm476_vm1, %v8266_v17  ;;  %v2377_v17 = vld [vmem:[#allocation2 + $0x61] sm:$0xff] }
 0x208   : > { %6752 = vmatprep.mubr.msk.bf16.mxu0 %vm476_vm1, %v8268_v18  ;;  %v2378_v18 = vld [vmem:[#allocation2 + $0x69] sm:$0xff] }
 0x20f   : > { %6753 = vmatmul.mubr.msk.bf16.gmra.mrb[12].mxu0 %vm476_vm1, %v8274_v23  ;;  %v2406_v23 = vpack.c.bf16 %v2376_v11, %v2375_v10 }
 0x210   : > { %6756 = vmatprep.mubr.msk.bf16.mxu0 %vm476_vm1, %v8276_v24  ;;  %v2407_v24 = vpack.c.bf16 %v2378_v18, %v2377_v17 }
 0x217   : > { %6757 = vmatmul.mubr.msk.bf16.gmra.mrb[16].mxu0 %vm476_vm1, %v8282_v29  ;;  %v2766_v29 = vsel %vm525_vm0, %v2716_v2, 0 }
 0x218   : > { %6760 = vmatprep.mubr.msk.bf16.mxu0 %vm476_vm1, %v8284_v30  ;;  %v2379_v30 = vld [vmem:[#allocation2 + $0x79] sm:$0xff] }
 0x21f   : > { %6761 = vmatmul.mubr.msk.bf16.gmra.mrb[20].mxu0 %vm476_vm1, %v8290_v36  ;;  %v2380_v36 = vld [vmem:[#allocation2 + $0x81] sm:$0xff] }
 0x220   : > { %6764 = vmatprep.mubr.msk.bf16.mxu0 %vm476_vm1, %v8292_v38  ;;  %v2408_v38 = vpack.c.bf16 %v2380_v36, %v2379_v30 }
 0x227   : > { %6765 = vmatmul.mubr.msk.bf16.gmra.mrb[24].mxu0 %vm476_vm1, %v8306_v57  ;;  %v3112_v57 = vld [vmem:[#allocation8] sm:$0xf] }
 0x228   : > { %6768 = vmatprep.mubr.msk.bf16.mxu0 %vm476_vm1, %v8406_v42  ;;  %v3424_v15 = vsel %vm525_vm0, %v3112_v57, 0 }
 0x22f   : > { %6769 = vmatmul.mubr.msk.bf16.gmra.mrb[28].mxu0 %vm476_vm1, %v7917_v54 }
 0x230   : > { %6774 = vmatprep.mubr.msk.bf16.mxu0 %vm476_vm1, %v2405_v4 }
 0x237   : > { %6775 = vmatmul.mubr.msk.bf16.vlgmr.msra.gmra.mrb[0].mxu0 %vm476_vm1, %v2406_v23 }
 0x238   : > { %6807 = vmatpush3.bf16.msra.mxu0 %v2766_v29  ;;  %6778 = vmatprep.mubr.msk.bf16.mxu0 %vm476_vm1, %v2407_v24 }
 0x23f   : > { %6779 = vmatmul.mubr.msk.bf16.gmra.mrb[4].mxu0 %vm476_vm1, %v2408_v38 }
 0x240   : > { %6782 = vmatprep.mubr.msk.bf16.mxu0 %vm476_vm1, %v8193_v44  ;;  %v2403_v44 = vld [vmem:[#allocation2 + $0x199] sm:$0xff] }
 0x247   : > { %6783 = vmatmul.mubr.msk.bf16.gmra.mrb[8].mxu0 %vm476_vm1, %v8199_v45  ;;  %v2404_v45 = vld [vmem:[#allocation2 + $0x1a1] sm:$0xff] }
 0x248   : > { %6786 = vmatprep.mubr.msk.bf16.mxu0 %vm476_vm1, %v8201_v46  ;;  %v2420_v46 = vpack.c.bf16 %v2404_v45, %v2403_v44 }
 0x24f   : > { %6787 = vmatmul.mubr.msk.bf16.gmra.mrb[12].mxu0 %vm476_vm1, %v8207_v47  ;;  %v2697_v47 = vld [vmem:[#allocation2 + $0x19a] sm:$0xff] }
 0x250   : > { %6790 = vmatprep.mubr.msk.bf16.mxu0 %vm476_vm1, %v8209_v48  ;;  %v2698_v48 = vld [vmem:[#allocation2 + $0x1a2] sm:$0xff] }
 0x257   : > { %6791 = vmatmul.mubr.msk.bf16.gmra.mrb[16].mxu0 %vm476_vm1, %v8215_v49  ;;  %v2714_v49 = vpack.c.bf16 %v2698_v48, %v2697_v47 }
 0x258   : > { %6794 = vmatprep.mubr.msk.bf16.mxu0 %vm476_vm1, %v8217_v50  ;;  %v3162_v50 = vld [vmem:[#allocation8 + $0x4] sm:$0xf] }
 0x259   : > { %7667 = vmatprep.subr.msk.bf16.mxu1 %vm525_vm0, %v3162_v50 }
 0x25f   : > { %6795 = vmatmul.mubr.msk.bf16.gmra.mrb[20].mxu0 %vm476_vm1, %v8223_v51  ;;  %v3212_v51 = vsel %vm525_vm0, %v3162_v50, 0 }
 0x260   : > { %6798 = vmatprep.mubr.msk.bf16.mxu0 %vm476_vm1, %v8225_v52  ;;  %v3113_v52 = vld [vmem:[#allocation2 + $0x1] sm:$0xff]  ;;  %6841 = vmatpush3.bf16.msra.mxu1 %v3212_v51 }
 0x261   : > { %7668 = vmatprep.subr.msk.bf16.mxu1 %vm525_vm0, %v3112_v57 }
 0x267   : > { %6799 = vmatmul.mubr.msk.bf16.gmra.mrb[24].mxu0 %vm476_vm1, %v8231_v53  ;;  %v3114_v53 = vld [vmem:[#allocation2 + $0x9] sm:$0xff] }
 0x268   : > { %6802 = vmatprep.mubr.msk.bf16.mxu0 %vm476_vm1, %v8444_v9  ;;  %v3145_v54 = vpack.c.bf16 %v3114_v53, %v3113_v52 }
 0x26a   : > { %6842 = vmatprep.mubr.msk.bf16.mxu1 %vm476_vm1, %v3145_v54 }
 0x26f   : > { %6803 = vmatmul.mubr.msk.bf16.gmra.mrb[28].mxu0 %vm476_vm1, %v2420_v46 }
 0x270   : > { %6808 = vmatprep.mubr.msk.bf16.mxu0 %vm476_vm1, %v8313_v5  ;;  %v8584_v5 = vld [vmem:[%s9173_s2] ss:$0 sm:$0xff] }
 0x277   : > { %6809 = vmatmul.mubr.msk.bf16.vlgmr.msra.gmra.mrb[0].mxu0 %vm476_vm1, %v8322_v16 }
 0x278   : > { %6812 = vmatprep.mubr.msk.bf16.mxu0 %vm476_vm1, %v8324_v19 }
 0x27f   : > { %6813 = vmatmul.mubr.msk.bf16.gmra.mrb[4].mxu0 %vm476_vm1, %v8330_v25 }
 0x280   : > { %6816 = vmatprep.mubr.msk.bf16.mxu0 %vm476_vm1, %v8332_v26 }
 0x287   : > { %6817 = vmatmul.mubr.msk.bf16.gmra.mrb[8].mxu0 %vm476_vm1, %v8338_v34 }
 0x288   : > { %6820 = vmatprep.mubr.msk.bf16.mxu0 %vm476_vm1, %v8340_v35 }
 0x28f   : > { %6821 = vmatmul.mubr.msk.bf16.gmra.mrb[12].mxu0 %vm476_vm1, %v8346_v58 }
 0x290   : > { %6824 = vmatprep.mubr.msk.bf16.mxu0 %vm476_vm1, %v8348_v61 }
 0x297   : > { %6825 = vmatmul.mubr.msk.bf16.gmra.mrb[16].mxu0 %vm476_vm1, %v8354_v8 }
 0x298   : > { %6828 = vmatprep.mubr.msk.bf16.mxu0 %vm476_vm1, %v8356_v12 }
 0x29f   : > { %6829 = vmatmul.mubr.msk.bf16.gmra.mrb[20].mxu0 %vm476_vm1, %v8362_v21  ;;  %v8596_v21 = vld [vmem:[#allocation8 + $0x8] sm:$0xf] }
 0x2a0   : > { %6832 = vmatprep.mubr.msk.bf16.mxu0 %vm476_vm1, %v8364_v22 }
 0x2a7   : > { %6833 = vmatmul.mubr.msk.bf16.gmra.mrb[24].mxu0 %vm476_vm1, %v8370_v31 }
 0x2a8   : > { %6836 = vmatprep.mubr.msk.bf16.mxu0 %vm476_vm1, %v8480_v39 }
 0x2af   : > { %6837 = vmatmul.mubr.msk.bf16.gmra.mrb[28].mxu0 %vm476_vm1, %v2714_v49 }
 0x34a   : > { %v6810_v16 = vpop.f32.mrb[0].mxu0 }
 0x34b   : > { %v2970_v19 = vadd.f32 %v6810_v16, %v8584_v5  ;;  %v2802_v25 = vpop.f32.mrb[1].mxu0 }
 0x34c   : > { %v2968_v26 = vadd.f32 %v8584_v5, %v2802_v25  ;;  %v6811_v34 = vpop.f32.mrb[2].mxu0 }
 0x34d   : > { %v3002_v35 = vmax.f32 %v2970_v19, 0.0  ;;  %v2971_v58 = vadd.f32 %v6811_v34, %v8584_v5  ;;  %v2805_v61 = vpop.f32.mrb[3].mxu0 }
 0x34e   : > { %v3000_v63 = vmax.f32 %v2968_v26, 0.0  ;;  %v2969_v0 = vadd.f32 %v8584_v5, %v2805_v61 }
 0x34f   : > { %3034 = vst [vmem:[#allocation2 + $0x31] sm:$0xff] %v3002_v35  ;;  %v3003_v1 = vmax.f32 %v2971_v58, 0.0 }
 0x350   : > { %3032 = vst [vmem:[#allocation2 + $0x19] sm:$0xff] %v3000_v63  ;;  %v3001_v6 = vmax.f32 %v2969_v0, 0.0 }
 0x351   : > { %3035 = vst [vmem:[#allocation2 + $0x39] sm:$0xff] %v3003_v1  ;;  %v8590_v8 = vpack.c.bf16 %v3003_v1, %v3002_v35 }
 0x352   : > { %3033 = vst [vmem:[#allocation2 + $0x21] sm:$0xff] %v3001_v6  ;;  %v6814_v12 = vpop.f32.mrb[4].mxu0  ;;  %v8592_v13 = vpack.c.bf16 %v3001_v6, %v3000_v63 }
 0x353   : > { %v2974_v62 = vadd.f32 %v6814_v12, %v8584_v5  ;;  %v2818_v20 = vpop.f32.mrb[5].mxu0 }
 0x354   : > { %v2972_v22 = vadd.f32 %v8584_v5, %v2818_v20  ;;  %v6815_v27 = vpop.f32.mrb[6].mxu0  ;;  %6843 = vmatmul.mubr.msk.bf16.vlgmr.msra.gmra.mrb[0].mxu1 %vm476_vm1, %v8592_v13 }
 0x355   : > { %v3006_v28 = vmax.f32 %v2974_v62, 0.0  ;;  %v2975_v31 = vadd.f32 %v6815_v27, %v8584_v5  ;;  %v2821_v32 = vpop.f32.mrb[7].mxu0  ;;  %6875 = vmatpush3.bf16.msra.mxu1 %v3424_v15  ;;  %6846 = vmatprep.mubr.msk.bf16.mxu1 %vm476_vm1, %v8590_v8 }
 0x356   : > { %v3004_v41 = vmax.f32 %v2972_v22, 0.0  ;;  %v2973_v59 = vadd.f32 %v8584_v5, %v2821_v32  ;;  %7669 = vmatprep.subr.msk.bf16.mxu1 %vm525_vm0, %v8596_v21 }
 0x357   : > { %3038 = vst [vmem:[#allocation2 + $0x61] sm:$0xff] %v3006_v28  ;;  %v3007_v7 = vmax.f32 %v2975_v31, 0.0 }
 0x358   : > { %3036 = vst [vmem:[#allocation2 + $0x49] sm:$0xff] %v3004_v41  ;;  %v3005_v42 = vmax.f32 %v2973_v59, 0.0 }
 0x359   : > { %3039 = vst [vmem:[#allocation2 + $0x69] sm:$0xff] %v3007_v7  ;;  %v8607_v55 = vpack.c.bf16 %v3007_v7, %v3006_v28 }
 0x35a   : > { %3037 = vst [vmem:[#allocation2 + $0x51] sm:$0xff] %v3005_v42  ;;  %v6818_v56 = vpop.f32.mrb[8].mxu0  ;;  %v8609_v9 = vpack.c.bf16 %v3005_v42, %v3004_v41 }
 0x35b   : > { %v2978_v14 = vadd.f32 %v6818_v56, %v8584_v5  ;;  %v2834_v33 = vpop.f32.mrb[9].mxu0 }
 0x35c   : > { %v2976_v37 = vadd.f32 %v8584_v5, %v2834_v33  ;;  %v6819_v43 = vpop.f32.mrb[10].mxu0  ;;  %6847 = vmatmul.mubr.msk.bf16.gmra.mrb[4].mxu1 %vm476_vm1, %v8609_v9 }
 0x35d   : > { %v3010_v39 = vmax.f32 %v2978_v14, 0.0  ;;  %v2979_v40 = vadd.f32 %v6819_v43, %v8584_v5  ;;  %v2837_v2 = vpop.f32.mrb[11].mxu0  ;;  %6850 = vmatprep.mubr.msk.bf16.mxu1 %vm476_vm1, %v8607_v55 }
 0x35e   : > { %v3008_v60 = vmax.f32 %v2976_v37, 0.0  ;;  %v2977_v3 = vadd.f32 %v8584_v5, %v2837_v2 }
 0x35f   : > { %3042 = vst [vmem:[#allocation2 + $0x91] sm:$0xff] %v3010_v39  ;;  %v3011_v4 = vmax.f32 %v2979_v40, 0.0 }
 0x360   : > { %3040 = vst [vmem:[#allocation2 + $0x79] sm:$0xff] %v3008_v60  ;;  %v3009_v10 = vmax.f32 %v2977_v3, 0.0 }
 0x361   : > { %3043 = vst [vmem:[#allocation2 + $0x99] sm:$0xff] %v3011_v4  ;;  %v8619_v11 = vpack.c.bf16 %v3011_v4, %v3010_v39 }
 0x362   : > { %3041 = vst [vmem:[#allocation2 + $0x81] sm:$0xff] %v3009_v10  ;;  %v6822_v17 = vpop.f32.mrb[12].mxu0  ;;  %v8621_v18 = vpack.c.bf16 %v3009_v10, %v3008_v60 }
 0x363   : > { %v2982_v23 = vadd.f32 %v6822_v17, %v8584_v5  ;;  %v2850_v24 = vpop.f32.mrb[13].mxu0 }
 0x364   : > { %v2980_v29 = vadd.f32 %v8584_v5, %v2850_v24  ;;  %v6823_v30 = vpop.f32.mrb[14].mxu0  ;;  %6851 = vmatmul.mubr.msk.bf16.gmra.mrb[8].mxu1 %vm476_vm1, %v8621_v18 }
 0x365   : > { %v3014_v36 = vmax.f32 %v2982_v23, 0.0  ;;  %v2983_v38 = vadd.f32 %v6823_v30, %v8584_v5  ;;  %v2853_v44 = vpop.f32.mrb[15].mxu0  ;;  %6854 = vmatprep.mubr.msk.bf16.mxu1 %vm476_vm1, %v8619_v11 }
 0x366   : > { %v3012_v45 = vmax.f32 %v2980_v29, 0.0  ;;  %v2981_v46 = vadd.f32 %v8584_v5, %v2853_v44 }
 0x367   : > { %3046 = vst [vmem:[#allocation2 + $0xc1] sm:$0xff] %v3014_v36  ;;  %v3015_v47 = vmax.f32 %v2983_v38, 0.0 }
 0x368   : > { %3044 = vst [vmem:[#allocation2 + $0xa9] sm:$0xff] %v3012_v45  ;;  %v3013_v48 = vmax.f32 %v2981_v46, 0.0 }
 0x369   : > { %3047 = vst [vmem:[#allocation2 + $0xc9] sm:$0xff] %v3015_v47  ;;  %v8631_v49 = vpack.c.bf16 %v3015_v47, %v3014_v36 }
 0x36a   : > { %3045 = vst [vmem:[#allocation2 + $0xb1] sm:$0xff] %v3013_v48  ;;  %v6826_v50 = vpop.f32.mrb[16].mxu0  ;;  %v8633_v51 = vpack.c.bf16 %v3013_v48, %v3012_v45 }
 0x36b   : > { %v2986_v52 = vadd.f32 %v6826_v50, %v8584_v5  ;;  %v2866_v53 = vpop.f32.mrb[17].mxu0  ;;  %v7750_v50 = vld [vmem:[#allocation2] sm:$0xff] }
 0x36c   : > { %v2984_v54 = vadd.f32 %v8584_v5, %v2866_v53  ;;  %v6827_v57 = vpop.f32.mrb[18].mxu0  ;;  %6855 = vmatmul.mubr.msk.bf16.gmra.mrb[12].mxu1 %vm476_vm1, %v8633_v51 }
 0x36d   : > { %v3018_v16 = vmax.f32 %v2986_v52, 0.0  ;;  %v2987_v19 = vadd.f32 %v6827_v57, %v8584_v5  ;;  %v2869_v25 = vpop.f32.mrb[19].mxu0  ;;  %6858 = vmatprep.mubr.msk.bf16.mxu1 %vm476_vm1, %v8631_v49  ;;  %v8683_v52 = vpack.c.bf16 %v7750_v50, %v7750_v50  ;;  %v3069_v57 = vld [vmem:[#allocation2 + $0x38] sm:$0xff]  ;;  %v3588_v50 = vld [vmem:[#allocation2 + $0xa] sm:$0xff] }
 0x36e   : > { %v3016_v26 = vmax.f32 %v2984_v54, 0.0  ;;  %v2985_v34 = vadd.f32 %v8584_v5, %v2869_v25  ;;  %v3686_v25 = vsel %vm525_vm0, %v8596_v21, 0  ;;  %v3072_v21 = vld [vmem:[#allocation2 + $0x60] sm:$0xff] }
 0x36f   : > { %3050 = vst [vmem:[#allocation2 + $0xf1] sm:$0xff] %v3018_v16  ;;  %v3019_v35 = vmax.f32 %v2987_v19, 0.0 }
 0x370   : > { %3048 = vst [vmem:[#allocation2 + $0xd9] sm:$0xff] %v3016_v26  ;;  %v3017_v58 = vmax.f32 %v2985_v34, 0.0 }
 0x371   : > { %3051 = vst [vmem:[#allocation2 + $0xf9] sm:$0xff] %v3019_v35  ;;  %v8643_v61 = vpack.c.bf16 %v3019_v35, %v3018_v16  ;;  %v3066_v16 = vld [vmem:[#allocation2 + $0x18] sm:$0xff]  ;;  %v8699_v35 = vld [vmem:[#allocation8 + $0xc] sm:$0xf] }
 0x372   : > { %3049 = vst [vmem:[#allocation2 + $0xe1] sm:$0xff] %v3017_v58  ;;  %v6830_v63 = vpop.f32.mrb[20].mxu0  ;;  %v8645_v0 = vpack.c.bf16 %v3017_v58, %v3016_v26  ;;  %v3068_v26 = vld [vmem:[#allocation2 + $0x30] sm:$0xff] }
 0x373   : > { %v2990_v1 = vadd.f32 %v6830_v63, %v8584_v5  ;;  %v2882_v6 = vpop.f32.mrb[21].mxu0  ;;  %v8697_v34 = vpack.c.bf16 %v3069_v57, %v3068_v26  ;;  %v3071_v58 = vld [vmem:[#allocation2 + $0x50] sm:$0xff]  ;;  %v3073_v63 = vld [vmem:[#allocation2 + $0x68] sm:$0xff]  ;;  %v3589_v26 = vld [vmem:[#allocation2 + $0x1a] sm:$0xff] }
 0x374   : > { %v2988_v12 = vadd.f32 %v8584_v5, %v2882_v6  ;;  %v6831_v15 = vpop.f32.mrb[22].mxu0  ;;  %6859 = vmatmul.mubr.msk.bf16.gmra.mrb[16].mxu1 %vm476_vm1, %v8645_v0 }
 0x375   : > { %v3022_v62 = vmax.f32 %v2990_v1, 0.0  ;;  %v2991_v20 = vadd.f32 %v6831_v15, %v8584_v5  ;;  %v2885_v22 = vpop.f32.mrb[23].mxu0  ;;  %6862 = vmatprep.mubr.msk.bf16.mxu1 %vm476_vm1, %v8643_v61  ;;  %v3070_v1 = vld [vmem:[#allocation2 + $0x48] sm:$0xff]  ;;  %v3075_v15 = vld [vmem:[#allocation2 + $0x80] sm:$0xff] }
 0x376   : > { %v3020_v27 = vmax.f32 %v2988_v12, 0.0  ;;  %v2989_v28 = vadd.f32 %v8584_v5, %v2885_v22  ;;  %v8707_v6 = vpack.c.bf16 %v3071_v58, %v3070_v1  ;;  %v8709_v12 = vpack.c.bf16 %v3073_v63, %v3072_v21  ;;  %v3590_v58 = vld [vmem:[#allocation2 + $0x22] sm:$0xff]  ;;  %v3591_v63 = vld [vmem:[#allocation2 + $0x32] sm:$0xff]  ;;  %v3592_v1 = vld [vmem:[#allocation2 + $0x3a] sm:$0xff] }
 0x377   : > { %3054 = vst [vmem:[#allocation2 + $0x121] sm:$0xff] %v3022_v62  ;;  %v3023_v31 = vmax.f32 %v2991_v20, 0.0  ;;  %v3074_v20 = vld [vmem:[#allocation2 + $0x78] sm:$0xff]  ;;  %v8760_v21 = vpack.c.bf16 %v3590_v58, %v3589_v26 }
 0x378   : > { %3052 = vst [vmem:[#allocation2 + $0x109] sm:$0xff] %v3020_v27  ;;  %v3021_v32 = vmax.f32 %v2989_v28, 0.0  ;;  %v8715_v22 = vpack.c.bf16 %v3075_v15, %v3074_v20  ;;  %v3980_v15 = vsel %vm525_vm0, %v8699_v35, 0  ;;  %v4224_v20 = vld [vmem:[#allocation8 + $0x10] sm:$0xf] }
 0x379   : > { %3055 = vst [vmem:[#allocation2 + $0x129] sm:$0xff] %v3023_v31  ;;  %v8655_v41 = vpack.c.bf16 %v3023_v31, %v3022_v62  ;;  %v3077_v62 = vld [vmem:[#allocation2 + $0x98] sm:$0xff]  ;;  %v3079_v31 = vld [vmem:[#allocation2 + $0xb0] sm:$0xff] }
 0x37a   : > { %3053 = vst [vmem:[#allocation2 + $0x111] sm:$0xff] %v3021_v32  ;;  %v6834_v59 = vpop.f32.mrb[24].mxu0  ;;  %v8657_v7 = vpack.c.bf16 %v3021_v32, %v3020_v27  ;;  %v3076_v27 = vld [vmem:[#allocation2 + $0x90] sm:$0xff]  ;;  %v3081_v32 = vld [vmem:[#allocation2 + $0xc8] sm:$0xff] }
 0x37b   : > { %v2994_v42 = vadd.f32 %v6834_v59, %v8584_v5  ;;  %v2898_v56 = vpop.f32.mrb[25].mxu0  ;;  %v8717_v28 = vpack.c.bf16 %v3077_v62, %v3076_v27  ;;  %v3078_v59 = vld [vmem:[#allocation2 + $0xa8] sm:$0xff]  ;;  %v8764_v62 = vpack.c.bf16 %v3592_v1, %v3591_v63 }
 0x37c   : > { %v2992_v14 = vadd.f32 %v8584_v5, %v2898_v56  ;;  %v6835_v33 = vpop.f32.mrb[26].mxu0  ;;  %6863 = vmatmul.mubr.msk.bf16.gmra.mrb[20].mxu1 %vm476_vm1, %v8657_v7  ;;  %v3080_v56 = vld [vmem:[#allocation2 + $0xc0] sm:$0xff]  ;;  %v3593_v27 = vld [vmem:[#allocation2 + $0x4a] sm:$0xff] }
 0x37d   : > { %v3026_v37 = vmax.f32 %v2994_v42, 0.0  ;;  %v2995_v43 = vadd.f32 %v6835_v33, %v8584_v5  ;;  %v2901_v39 = vpop.f32.mrb[27].mxu0  ;;  %6866 = vmatprep.mubr.msk.bf16.mxu1 %vm476_vm1, %v8655_v41  ;;  %v8723_v42 = vpack.c.bf16 %v3079_v31, %v3078_v59  ;;  %v3083_v33 = vld [vmem:[#allocation2 + $0xe0] sm:$0xff]  ;;  %v3594_v31 = vld [vmem:[#allocation2 + $0x52] sm:$0xff]  ;;  %v3596_v59 = vld [vmem:[#allocation2 + $0x6a] sm:$0xff] }
 0x37e   : > { %v3024_v40 = vmax.f32 %v2992_v14, 0.0  ;;  %v2993_v2 = vadd.f32 %v8584_v5, %v2901_v39  ;;  %v8725_v14 = vpack.c.bf16 %v3081_v32, %v3080_v56  ;;  %v3595_v32 = vld [vmem:[#allocation2 + $0x62] sm:$0xff]  ;;  %v8771_v56 = vpack.c.bf16 %v3594_v31, %v3593_v27 }
 0x37f   : > { %3058 = vst [vmem:[#allocation2 + $0x151] sm:$0xff] %v3026_v37  ;;  %v8667_v60 = vmax.f32 %v2995_v43, 0.0  ;;  %v3082_v43 = vld [vmem:[#allocation2 + $0xd8] sm:$0xff] }
 0x380   : > { %3056 = vst [vmem:[#allocation2 + $0x139] sm:$0xff] %v3024_v40  ;;  %v3025_v3 = vmax.f32 %v2993_v2, 0.0  ;;  %v8731_v39 = vpack.c.bf16 %v3083_v33, %v3082_v43  ;;  %v8773_v33 = vpack.c.bf16 %v3596_v59, %v3595_v32  ;;  %v3599_v43 = vld [vmem:[#allocation2 + $0x92] sm:$0xff]  ;;  %v3611_v1 = vld [vmem:[#allocation2 + $0x122] sm:$0xff] }
 0x381   : > { %3059 = vst [vmem:[#allocation2 + $0x159] sm:$0xff] %v8667_v60  ;;  %v8671_v4 = vpack.c.bf16 %v8667_v60, %v3026_v37  ;;  %v3085_v37 = vld [vmem:[#allocation2 + $0xf8] sm:$0xff]  ;;  %v3609_v58 = vld [vmem:[#allocation2 + $0x10a] sm:$0xff] }
 0x382   : > { %3057 = vst [vmem:[#allocation2 + $0x141] sm:$0xff] %v3025_v3  ;;  %v6838_v10 = vpop.f32.mrb[28].mxu0  ;;  %v8673_v17 = vpack.c.bf16 %v3025_v3, %v3024_v40  ;;  %v3084_v40 = vld [vmem:[#allocation2 + $0xf0] sm:$0xff] }
 0x383   : > { %v2998_v23 = vadd.f32 %v6838_v10, %v8584_v5  ;;  %v2914_v24 = vpop.f32.mrb[29].mxu0  ;;  %v8733_v2 = vpack.c.bf16 %v3085_v37, %v3084_v40  ;;  %v3087_v3 = vld [vmem:[#allocation2 + $0x110] sm:$0xff]  ;;  %v3089_v10 = vld [vmem:[#allocation2 + $0x128] sm:$0xff]  ;;  %v3600_v40 = vld [vmem:[#allocation2 + $0x9a] sm:$0xff] }
 0x384   : > { %v2996_v29 = vadd.f32 %v8584_v5, %v2914_v24  ;;  %v6839_v30 = vpop.f32.mrb[30].mxu0  ;;  %6867 = vmatmul.mubr.msk.bf16.gmra.mrb[24].mxu1 %vm476_vm1, %v8673_v17  ;;  %v3598_v37 = vld [vmem:[#allocation2 + $0x82] sm:$0xff]  ;;  %v3610_v63 = vld [vmem:[#allocation2 + $0x112] sm:$0xff] }
 0x385   : > { %v3030_v36 = vmax.f32 %v2998_v23, 0.0  ;;  %v2999_v38 = vadd.f32 %v6839_v30, %v8584_v5  ;;  %v2917_v44 = vpop.f32.mrb[31].mxu0  ;;  %6870 = vmatprep.mubr.msk.bf16.mxu1 %vm476_vm1, %v8671_v4  ;;  %v3086_v23 = vld [vmem:[#allocation2 + $0x108] sm:$0xff]  ;;  %v8803_v27 = vpack.c.bf16 %v3610_v63, %v3609_v58  ;;  %v5074_v63 = vld [vmem:[#allocation2 + $0xf9] sm:$0xff] }
 0x386   : > { %v3028_v45 = vmax.f32 %v2996_v29, 0.0  ;;  %v2997_v46 = vadd.f32 %v8584_v5, %v2917_v44  ;;  %v3067_v5 = vld [vmem:[#allocation2 + $0x20] sm:$0xff]  ;;  %v8739_v24 = vpack.c.bf16 %v3087_v3, %v3086_v23  ;;  %v3601_v23 = vld [vmem:[#allocation2 + $0xaa] sm:$0xff] }
 0x387   : > { %3062 = vst [vmem:[#allocation2 + $0x181] sm:$0xff] %v3030_v36  ;;  %v3031_v47 = vmax.f32 %v2999_v38, 0.0  ;;  %v8693_v19 = vpack.c.bf16 %v3067_v5, %v3066_v16  ;;  %v3088_v29 = vld [vmem:[#allocation2 + $0x120] sm:$0xff]  ;;  %v3090_v44 = vld [vmem:[#allocation2 + $0x138] sm:$0xff] }
 0x388   : > { %3060 = vst [vmem:[#allocation2 + $0x169] sm:$0xff] %v3028_v45  ;;  %v3029_v48 = vmax.f32 %v2997_v46, 0.0  ;;  %v8741_v30 = vpack.c.bf16 %v3089_v10, %v3088_v29  ;;  %v3093_v38 = vld [vmem:[#allocation2 + $0x158] sm:$0xff]  ;;  %v3092_v46 = vld [vmem:[#allocation2 + $0x150] sm:$0xff]  ;;  %v8781_v10 = vpack.c.bf16 %v3600_v40, %v3599_v43  ;;  %v5072_v58 = vld [vmem:[#allocation2 + $0xe1] sm:$0xff] }
 0x389   : > { %3063 = vst [vmem:[#allocation2 + $0x189] sm:$0xff] %v3031_v47  ;;  %v8685_v53 = vpack.c.bf16 %v3031_v47, %v3030_v36  ;;  %v3091_v36 = vld [vmem:[#allocation2 + $0x140] sm:$0xff]  ;;  %v8749_v47 = vpack.c.bf16 %v3093_v38, %v3092_v46  ;;  %v3602_v29 = vld [vmem:[#allocation2 + $0xb2] sm:$0xff]  ;;  %v3604_v38 = vld [vmem:[#allocation2 + $0xca] sm:$0xff] }
 0x38a   : > { %3061 = vst [vmem:[#allocation2 + $0x171] sm:$0xff] %v3029_v48  ;;  %v8687_v54 = vpack.c.bf16 %v3029_v48, %v3028_v45  ;;  %v8747_v45 = vpack.c.bf16 %v3091_v36, %v3090_v44  ;;  %v3587_v48 = vld [vmem:[#allocation2 + $0x2] sm:$0xff]  ;;  %v8787_v44 = vpack.c.bf16 %v3602_v29, %v3601_v23  ;;  %v3613_v32 = vld [vmem:[#allocation2 + $0x13a] sm:$0xff] }
 0x38b   : > { %v3619_v16 = vpack.c.bf16 %v3588_v50, %v3587_v48  ;;  %v3603_v36 = vld [vmem:[#allocation2 + $0xc2] sm:$0xff]  ;;  %v3605_v48 = vld [vmem:[#allocation2 + $0xda] sm:$0xff] }
 0x38c   : > { %6871 = vmatmul.mubr.msk.bf16.gmra.mrb[28].mxu1 %vm476_vm1, %v8687_v54  ;;  %v8789_v46 = vpack.c.bf16 %v3604_v38, %v3603_v36  ;;  %v3606_v50 = vld [vmem:[#allocation2 + $0xe2] sm:$0xff]  ;;  %v4274_v38 = vsel %vm525_vm0, %v4224_v20, 0 }
 0x38d   : > { %6876 = vmatprep.mubr.msk.bf16.mxu1 %vm476_vm1, %v8683_v52  ;;  %v3614_v59 = vld [vmem:[#allocation2 + $0x142] sm:$0xff] }
 0x38e   : > { %v8811_v43 = vpack.c.bf16 %v3614_v59, %v3613_v32  ;;  %v5073_v32 = vld [vmem:[#allocation2 + $0xf1] sm:$0xff] }
 0x38f   : > { %v3094_v57 = vld [vmem:[#allocation2 + $0x168] sm:$0xff]  ;;  %v5097_v59 = vpack.c.bf16 %v5074_v63, %v5073_v32  ;;  %v5692_v63 = vld [vmem:[%s8129_s6 + $0x40] sm:$0xff] }
 0x390   : > { %v5695_v32 = vld [vmem:[%s8129_s6 + $0x58] sm:$0xff] }
 0x391   : > { %v3095_v5 = vld [vmem:[#allocation2 + $0x170] sm:$0xff] }
 0x392   : > { %v3617_v23 = vld [vmem:[#allocation2 + $0x16a] sm:$0xff]  ;;  %v3618_v29 = vld [vmem:[#allocation2 + $0x172] sm:$0xff] }
 0x393   : > { %v8819_v36 = vpack.c.bf16 %v3618_v29, %v3617_v23  ;;  %v5075_v23 = vld [vmem:[#allocation2 + $0x109] sm:$0xff] }
 0x394   : > { %6877 = vmatmul.mubr.msk.bf16.vlgmr.msra.gmra.mrb[0].mxu1 %vm476_vm1, %v8693_v19 }
 0x395   : > { %6909 = vmatpush3.bf16.msra.mxu1 %v3686_v25  ;;  %6880 = vmatprep.mubr.msk.bf16.mxu1 %vm476_vm1, %v8697_v34  ;;  %v8755_v25 = vpack.c.bf16 %v3095_v5, %v3094_v57  ;;  %v3607_v5 = vld [vmem:[#allocation2 + $0xf2] sm:$0xff]  ;;  %v3608_v57 = vld [vmem:[#allocation2 + $0xfa] sm:$0xff] }
 0x396   : > { %7670 = vmatprep.subr.msk.bf16.mxu1 %vm525_vm0, %v8699_v35  ;;  %v3597_v35 = vld [vmem:[#allocation2 + $0x7a] sm:$0xff]  ;;  %v8797_v26 = vpack.c.bf16 %v3608_v57, %v3607_v5  ;;  %v4812_v57 = vld [vmem:[#allocation8 + $0x18] sm:$0xf] }
 0x397   : > { %v8779_v3 = vpack.c.bf16 %v3598_v37, %v3597_v35  ;;  %v3615_v35 = vld [vmem:[#allocation2 + $0x152] sm:$0xff]  ;;  %v3616_v37 = vld [vmem:[#allocation2 + $0x15a] sm:$0xff] }
 0x398   : > { %v8813_v40 = vpack.c.bf16 %v3616_v37, %v3615_v35  ;;  %v5076_v35 = vld [vmem:[#allocation2 + $0x111] sm:$0xff]  ;;  %v5078_v37 = vld [vmem:[#allocation2 + $0x129] sm:$0xff] }
 0x399   : > { %v5098_v29 = vpack.c.bf16 %v5076_v35, %v5075_v23  ;;  %v5693_v23 = vld [vmem:[%s8129_s6 + $0x48] sm:$0xff] }
 0x39c   : > { %6881 = vmatmul.mubr.msk.bf16.gmra.mrb[4].mxu1 %vm476_vm1, %v8707_v6 }
 0x39d   : > { %6884 = vmatprep.mubr.msk.bf16.mxu1 %vm476_vm1, %v8709_v12 }
 0x3a4   : > { %6885 = vmatmul.mubr.msk.bf16.gmra.mrb[8].mxu1 %vm476_vm1, %v8715_v22 }
 0x3a5   : > { %6888 = vmatprep.mubr.msk.bf16.mxu1 %vm476_vm1, %v8717_v28 }
 0x3ac   : > { %6889 = vmatmul.mubr.msk.bf16.gmra.mrb[12].mxu1 %vm476_vm1, %v8723_v42 }
 0x3ad   : > { %6892 = vmatprep.mubr.msk.bf16.mxu1 %vm476_vm1, %v8725_v14 }
 0x3b4   : > { %6893 = vmatmul.mubr.msk.bf16.gmra.mrb[16].mxu1 %vm476_vm1, %v8731_v39 }
 0x3b5   : > { %6896 = vmatprep.mubr.msk.bf16.mxu1 %vm476_vm1, %v8733_v2 }
 0x3bc   : > { %6897 = vmatmul.mubr.msk.bf16.gmra.mrb[20].mxu1 %vm476_vm1, %v8739_v24 }
 0x3bd   : > { %6900 = vmatprep.mubr.msk.bf16.mxu1 %vm476_vm1, %v8741_v30 }
 0x3c4   : > { %6901 = vmatmul.mubr.msk.bf16.gmra.mrb[24].mxu1 %vm476_vm1, %v8747_v45 }
 0x3c5   : > { %6904 = vmatprep.mubr.msk.bf16.mxu1 %vm476_vm1, %v8749_v47 }
 0x3cc   : > { %6905 = vmatmul.mubr.msk.bf16.gmra.mrb[28].mxu1 %vm476_vm1, %v8755_v25 }
 0x3cd   : > { %6910 = vmatprep.mubr.msk.bf16.mxu1 %vm476_vm1, %v3619_v16  ;;  %v8795_v16 = vpack.c.bf16 %v3606_v50, %v3605_v48  ;;  %v4518_v48 = vld [vmem:[#allocation8 + $0x14] sm:$0xf] }
 0x3ce   : > { %v4568_v5 = vsel %vm525_vm0, %v4518_v48, 0 }
 0x3d4   : > { %6911 = vmatmul.mubr.msk.bf16.vlgmr.msra.gmra.mrb[0].mxu1 %vm476_vm1, %v8760_v21 }
 0x3d5   : > { %6943 = vmatpush3.bf16.msra.mxu1 %v3980_v15  ;;  %6914 = vmatprep.mubr.msk.bf16.mxu1 %vm476_vm1, %v8764_v62  ;;  %v3612_v15 = vld [vmem:[#allocation2 + $0x12a] sm:$0xff] }
 0x3d6   : > { %7671 = vmatprep.subr.msk.bf16.mxu1 %vm525_vm0, %v4224_v20  ;;  %v8805_v31 = vpack.c.bf16 %v3612_v15, %v3611_v1  ;;  %v3911_v20 = vld [vmem:[#allocation2 + $0x180] sm:$0xff] }
 0x3d7   : > { %v5071_v1 = vld [vmem:[#allocation2 + $0xd9] sm:$0xff] }
 0x3d8   : > { %v5096_v15 = vpack.c.bf16 %v5072_v58, %v5071_v1 }
 0x3dc   : > { %6915 = vmatmul.mubr.msk.bf16.gmra.mrb[4].mxu1 %vm476_vm1, %v8771_v56 }
 0x3dd   : > { %6918 = vmatprep.mubr.msk.bf16.mxu1 %vm476_vm1, %v8773_v33 }
 0x3e4   : > { %6919 = vmatmul.mubr.msk.bf16.gmra.mrb[8].mxu1 %vm476_vm1, %v8779_v3 }
 0x3e5   : > { %6922 = vmatprep.mubr.msk.bf16.mxu1 %vm476_vm1, %v8781_v10 }
 0x3ec   : > { %6923 = vmatmul.mubr.msk.bf16.gmra.mrb[12].mxu1 %vm476_vm1, %v8787_v44 }
 0x3ed   : > { %6926 = vmatprep.mubr.msk.bf16.mxu1 %vm476_vm1, %v8789_v46 }
 0x3f4   : > { %6927 = vmatmul.mubr.msk.bf16.gmra.mrb[16].mxu1 %vm476_vm1, %v8795_v16 }
 0x3f5   : > { %6930 = vmatprep.mubr.msk.bf16.mxu1 %vm476_vm1, %v8797_v26 }
 0x3fc   : > { %6931 = vmatmul.mubr.msk.bf16.gmra.mrb[20].mxu1 %vm476_vm1, %v8803_v27 }
 0x3fd   : > { %6934 = vmatprep.mubr.msk.bf16.mxu1 %vm476_vm1, %v8805_v31 }
 0x404   : > { %6935 = vmatmul.mubr.msk.bf16.gmra.mrb[24].mxu1 %vm476_vm1, %v8811_v43 }
 0x405   : > { %6938 = vmatprep.mubr.msk.bf16.mxu1 %vm476_vm1, %v8813_v40 }
 0x40c   : > { %6939 = vmatmul.mubr.msk.bf16.gmra.mrb[28].mxu1 %vm476_vm1, %v8819_v36 }
 0x40d   : > { %6944 = vmatprep.mubr.msk.bf16.mxu1 %vm476_vm1, %v8693_v19  ;;  %v3912_v19 = vld [vmem:[#allocation2 + $0x188] sm:$0xff] }
 0x40e   : > { %v8855_v50 = vpack.c.bf16 %v3912_v19, %v3911_v20  ;;  %v5081_v19 = vld [vmem:[#allocation2 + $0x151] sm:$0xff] }
 0x40f   : > { %v5101_v20 = vpack.c.bf16 %v8667_v60, %v5081_v19  ;;  %v5381_v60 = vld [vmem:[#allocation2 + $0x19a] sm:$0xff] }
 0x414   : > { %6945 = vmatmul.mubr.msk.bf16.vlgmr.msra.gmra.mrb[0].mxu1 %vm476_vm1, %v8697_v34 }
 0x415   : > { %6977 = vmatpush3.bf16.msra.mxu1 %v4274_v38  ;;  %6948 = vmatprep.mubr.msk.bf16.mxu1 %vm476_vm1, %v8707_v6  ;;  %v5077_v38 = vld [vmem:[#allocation2 + $0x121] sm:$0xff] }
 0x416   : > { %7672 = vmatprep.subr.msk.bf16.mxu1 %vm525_vm0, %v4518_v48  ;;  %v5099_v48 = vpack.c.bf16 %v5078_v37, %v5077_v38 }
 0x41c   : > { %6949 = vmatmul.mubr.msk.bf16.gmra.mrb[4].mxu1 %vm476_vm1, %v8709_v12 }
 0x41d   : > { %6952 = vmatprep.mubr.msk.bf16.mxu1 %vm476_vm1, %v8715_v22 }
 0x424   : > { %6953 = vmatmul.mubr.msk.bf16.gmra.mrb[8].mxu1 %vm476_vm1, %v8717_v28 }
 0x425   : > { %6956 = vmatprep.mubr.msk.bf16.mxu1 %vm476_vm1, %v8723_v42 }
 0x42c   : > { %6957 = vmatmul.mubr.msk.bf16.gmra.mrb[12].mxu1 %vm476_vm1, %v8725_v14 }
 0x42d   : > { %6960 = vmatprep.mubr.msk.bf16.mxu1 %vm476_vm1, %v8731_v39 }
 0x434   : > { %6961 = vmatmul.mubr.msk.bf16.gmra.mrb[16].mxu1 %vm476_vm1, %v8733_v2 }
 0x435   : > { %6964 = vmatprep.mubr.msk.bf16.mxu1 %vm476_vm1, %v8739_v24 }
 0x43c   : > { %6965 = vmatmul.mubr.msk.bf16.gmra.mrb[20].mxu1 %vm476_vm1, %v8741_v30 }
 0x43d   : > { %6968 = vmatprep.mubr.msk.bf16.mxu1 %vm476_vm1, %v8747_v45 }
 0x444   : > { %6969 = vmatmul.mubr.msk.bf16.gmra.mrb[24].mxu1 %vm476_vm1, %v8749_v47 }
 0x445   : > { %6972 = vmatprep.mubr.msk.bf16.mxu1 %vm476_vm1, %v8755_v25 }
 0x44c   : > { %6973 = vmatmul.mubr.msk.bf16.gmra.mrb[28].mxu1 %vm476_vm1, %v8855_v50 }
 0x44d   : > { %6978 = vmatprep.mubr.msk.bf16.mxu1 %vm476_vm1, %v8592_v13  ;;  %v5106_v13 = vld [vmem:[#allocation8 + $0x1c] sm:$0xf] }
 0x454   : > { %6979 = vmatmul.mubr.msk.bf16.vlgmr.msra.gmra.mrb[0].mxu1 %vm476_vm1, %v8590_v8  ;;  %v4862_v8 = vsel %vm525_vm0, %v4812_v57, 0 }
 0x455   : > { %7011 = vmatpush3.bf16.msra.mxu1 %v4568_v5  ;;  %6982 = vmatprep.mubr.msk.bf16.mxu1 %vm476_vm1, %v8609_v9  ;;  %v4500_v9 = vld [vmem:[#allocation2 + $0x18a] sm:$0xff]  ;;  %v5088_v5 = vld [vmem:[#allocation2 + $0x1a1] sm:$0xff] }
 0x456   : > { %7673 = vmatprep.subr.msk.bf16.mxu1 %vm525_vm0, %v4812_v57 }
 0x45c   : > { %6983 = vmatmul.mubr.msk.bf16.gmra.mrb[4].mxu1 %vm476_vm1, %v8607_v55  ;;  %v4499_v55 = vld [vmem:[#allocation2 + $0x182] sm:$0xff] }
 0x45d   : > { %6986 = vmatprep.mubr.msk.bf16.mxu1 %vm476_vm1, %v8621_v18  ;;  %v5156_v18 = vsel %vm525_vm0, %v5106_v13, 0 }
 0x464   : > { %6987 = vmatmul.mubr.msk.bf16.gmra.mrb[8].mxu1 %vm476_vm1, %v8619_v11  ;;  %v8925_v11 = vpack.c.bf16 %v4500_v9, %v4499_v55 }
 0x465   : > { %6990 = vmatprep.mubr.msk.bf16.mxu1 %vm476_vm1, %v8633_v51  ;;  %v5058_v51 = vld [vmem:[#allocation2 + $0x39] sm:$0xff] }
 0x46c   : > { %6991 = vmatmul.mubr.msk.bf16.gmra.mrb[12].mxu1 %vm476_vm1, %v8631_v49  ;;  %v5400_v49 = vld [vmem:[#allocation8 + $0x20] sm:$0xf] }
 0x46d   : > { %6994 = vmatprep.mubr.msk.bf16.mxu1 %vm476_vm1, %v8645_v0 }
 0x474   : > { %6995 = vmatmul.mubr.msk.bf16.gmra.mrb[16].mxu1 %vm476_vm1, %v8643_v61  ;;  %v5057_v61 = vld [vmem:[#allocation2 + $0x31] sm:$0xff] }
 0x475   : > { %6998 = vmatprep.mubr.msk.bf16.mxu1 %vm476_vm1, %v8657_v7  ;;  %v5089_v0 = vpack.c.bf16 %v5058_v51, %v5057_v61  ;;  %v5062_v7 = vld [vmem:[#allocation2 + $0x69] sm:$0xff]  ;;  %v5690_v51 = vld [vmem:[%s8129_s6 + $0x30] sm:$0xff] }
 0x47c   : > { %6999 = vmatmul.mubr.msk.bf16.gmra.mrb[20].mxu1 %vm476_vm1, %v8655_v41  ;;  %v5060_v41 = vld [vmem:[#allocation2 + $0x51] sm:$0xff] }
 0x47d   : > { %7002 = vmatprep.mubr.msk.bf16.mxu1 %vm476_vm1, %v8673_v17 }
 0x484   : > { %7003 = vmatmul.mubr.msk.bf16.gmra.mrb[24].mxu1 %vm476_vm1, %v8671_v4  ;;  %v5059_v4 = vld [vmem:[#allocation2 + $0x49] sm:$0xff] }
 0x485   : > { %7006 = vmatprep.mubr.msk.bf16.mxu1 %vm476_vm1, %v8687_v54 }
 0x48c   : > { %7007 = vmatmul.mubr.msk.bf16.gmra.mrb[28].mxu1 %vm476_vm1, %v8685_v53 }
 0x48d   : > { %7012 = vmatprep.mubr.msk.bf16.mxu1 %vm476_vm1, %v8760_v21 }
 0x494   : > { %7013 = vmatmul.mubr.msk.bf16.vlgmr.msra.gmra.mrb[0].mxu1 %vm476_vm1, %v8764_v62 }
 0x495   : > { %7045 = vmatpush3.bf16.msra.mxu1 %v4862_v8  ;;  %7016 = vmatprep.mubr.msk.bf16.mxu1 %vm476_vm1, %v8771_v56 }
 0x496   : > { %7674 = vmatprep.subr.msk.bf16.mxu1 %vm525_vm0, %v5106_v13 }
 0x49c   : > { %7017 = vmatmul.mubr.msk.bf16.gmra.mrb[4].mxu1 %vm476_vm1, %v8773_v33 }
 0x49d   : > { %7020 = vmatprep.mubr.msk.bf16.mxu1 %vm476_vm1, %v8779_v3 }
 0x4a4   : > { %7021 = vmatmul.mubr.msk.bf16.gmra.mrb[8].mxu1 %vm476_vm1, %v8781_v10 }
 0x4a5   : > { %7024 = vmatprep.mubr.msk.bf16.mxu1 %vm476_vm1, %v8787_v44 }
 0x4ac   : > { %7025 = vmatmul.mubr.msk.bf16.gmra.mrb[12].mxu1 %vm476_vm1, %v8789_v46 }
 0x4ad   : > { %7028 = vmatprep.mubr.msk.bf16.mxu1 %vm476_vm1, %v8795_v16 }
 0x4b4   : > { %7029 = vmatmul.mubr.msk.bf16.gmra.mrb[16].mxu1 %vm476_vm1, %v8797_v26 }
 0x4b5   : > { %7032 = vmatprep.mubr.msk.bf16.mxu1 %vm476_vm1, %v8803_v27 }
 0x4bc   : > { %7033 = vmatmul.mubr.msk.bf16.gmra.mrb[20].mxu1 %vm476_vm1, %v8805_v31 }
 0x4bd   : > { %7036 = vmatprep.mubr.msk.bf16.mxu1 %vm476_vm1, %v8811_v43 }
 0x4c4   : > { %7037 = vmatmul.mubr.msk.bf16.gmra.mrb[24].mxu1 %vm476_vm1, %v8813_v40 }
 0x4c5   : > { %7040 = vmatprep.mubr.msk.bf16.mxu1 %vm476_vm1, %v8819_v36 }
 0x4cc   : > { %7041 = vmatmul.mubr.msk.bf16.gmra.mrb[28].mxu1 %vm476_vm1, %v8925_v11 }
 0x4cd   : > { %7046 = vmatprep.mubr.msk.bf16.mxu1 %vm476_vm1, %v8697_v34  ;;  %v5090_v34 = vpack.c.bf16 %v5060_v41, %v5059_v4  ;;  %v5688_v41 = vld [vmem:[%s8129_s6 + $0x20] sm:$0xff] }
 0x4d4   : > { %7047 = vmatmul.mubr.msk.bf16.vlgmr.msra.gmra.mrb[0].mxu1 %vm476_vm1, %v8707_v6  ;;  %v5450_v6 = vsel %vm525_vm0, %v5400_v49, 0 }
 0x4d5   : > { %7079 = vmatpush3.bf16.msra.mxu1 %v5156_v18  ;;  %7050 = vmatprep.mubr.msk.bf16.mxu1 %vm476_vm1, %v8709_v12  ;;  %v5061_v12 = vld [vmem:[#allocation2 + $0x61] sm:$0xff] }
 0x4d6   : > { %7675 = vmatprep.subr.msk.bf16.mxu1 %vm525_vm0, %v5400_v49 }
 0x4dc   : > { %7051 = vmatmul.mubr.msk.bf16.gmra.mrb[4].mxu1 %vm476_vm1, %v8715_v22  ;;  %v5091_v22 = vpack.c.bf16 %v5062_v7, %v5061_v12 }
 0x4dd   : > { %7054 = vmatprep.mubr.msk.bf16.mxu1 %vm476_vm1, %v8717_v28  ;;  %v5064_v28 = vld [vmem:[#allocation2 + $0x81] sm:$0xff] }
 0x4e4   : > { %7055 = vmatmul.mubr.msk.bf16.gmra.mrb[8].mxu1 %vm476_vm1, %v8723_v42  ;;  %v5066_v42 = vld [vmem:[#allocation2 + $0x99] sm:$0xff] }
 0x4e5   : > { %7058 = vmatprep.mubr.msk.bf16.mxu1 %vm476_vm1, %v8725_v14  ;;  %v5063_v14 = vld [vmem:[#allocation2 + $0x79] sm:$0xff] }
 0x4ec   : > { %7059 = vmatmul.mubr.msk.bf16.gmra.mrb[12].mxu1 %vm476_vm1, %v8731_v39  ;;  %v5092_v39 = vpack.c.bf16 %v5064_v28, %v5063_v14  ;;  %v5689_v28 = vld [vmem:[%s8129_s6 + $0x28] sm:$0xff] }
 0x4ed   : > { %7062 = vmatprep.mubr.msk.bf16.mxu1 %vm476_vm1, %v8733_v2 }
 0x4f4   : > { %7063 = vmatmul.mubr.msk.bf16.gmra.mrb[16].mxu1 %vm476_vm1, %v8739_v24  ;;  %v5068_v24 = vld [vmem:[#allocation2 + $0xb1] sm:$0xff] }
 0x4f5   : > { %7066 = vmatprep.mubr.msk.bf16.mxu1 %vm476_vm1, %v8741_v30  ;;  %v5070_v30 = vld [vmem:[#allocation2 + $0xc9] sm:$0xff] }
 0x4fc   : > { %7067 = vmatmul.mubr.msk.bf16.gmra.mrb[20].mxu1 %vm476_vm1, %v8747_v45  ;;  %v5067_v45 = vld [vmem:[#allocation2 + $0xa9] sm:$0xff] }
 0x4fd   : > { %7070 = vmatprep.mubr.msk.bf16.mxu1 %vm476_vm1, %v8749_v47  ;;  %v5094_v47 = vpack.c.bf16 %v5068_v24, %v5067_v45 }
 0x504   : > { %7071 = vmatmul.mubr.msk.bf16.gmra.mrb[24].mxu1 %vm476_vm1, %v8755_v25  ;;  %v5069_v25 = vld [vmem:[#allocation2 + $0xc1] sm:$0xff] }
 0x505   : > { %7074 = vmatprep.mubr.msk.bf16.mxu1 %vm476_vm1, %v8855_v50  ;;  %v5095_v21 = vpack.c.bf16 %v5070_v30, %v5069_v25  ;;  %v5087_v50 = vld [vmem:[#allocation2 + $0x199] sm:$0xff] }
 0x506   : > { %v5104_v57 = vpack.c.bf16 %v5088_v5, %v5087_v50  ;;  %v5694_v25 = vld [vmem:[%s8129_s6 + $0x50] sm:$0xff] }
 0x50c   : > { %7075 = vmatmul.mubr.msk.bf16.gmra.mrb[28].mxu1 %vm476_vm1, %v8683_v52  ;;  %v5065_v52 = vld [vmem:[#allocation2 + $0x91] sm:$0xff] }
 0x50d   : > { %7080 = vmatprep.mubr.msk.bf16.mxu1 %vm476_vm1, %v5089_v0  ;;  %v5093_v2 = vpack.c.bf16 %v5066_v42, %v5065_v52 }
 0x514   : > { %7081 = vmatmul.mubr.msk.bf16.vlgmr.msra.gmra.mrb[0].mxu1 %vm476_vm1, %v5090_v34  ;;  %v5691_v34 = vld [vmem:[%s8129_s6 + $0x38] sm:$0xff] }
 0x515   : > { %7113 = vmatpush3.bf16.msra.mxu1 %v5450_v6  ;;  %7084 = vmatprep.mubr.msk.bf16.mxu1 %vm476_vm1, %v5091_v22 }
 0x51c   : > { %7085 = vmatmul.mubr.msk.bf16.gmra.mrb[4].mxu1 %vm476_vm1, %v5092_v39 }
 0x51d   : > { %7088 = vmatprep.mubr.msk.bf16.mxu1 %vm476_vm1, %v5093_v2 }
 0x524   : > { %7089 = vmatmul.mubr.msk.bf16.gmra.mrb[8].mxu1 %vm476_vm1, %v5094_v47 }
 0x525   : > { %7092 = vmatprep.mubr.msk.bf16.mxu1 %vm476_vm1, %v5095_v21 }
 0x52c   : > { %7093 = vmatmul.mubr.msk.bf16.gmra.mrb[12].mxu1 %vm476_vm1, %v5096_v15 }
 0x52d   : > { %7096 = vmatprep.mubr.msk.bf16.mxu1 %vm476_vm1, %v5097_v59 }
 0x534   : > { %7097 = vmatmul.mubr.msk.bf16.gmra.mrb[16].mxu1 %vm476_vm1, %v5098_v29 }
 0x535   : > { %7100 = vmatprep.mubr.msk.bf16.mxu1 %vm476_vm1, %v5099_v48 }
 0x53c   : > { %7101 = vmatmul.mubr.msk.bf16.gmra.mrb[20].mxu1 %vm476_vm1, %v8673_v17  ;;  %v5382_v17 = vld [vmem:[#allocation2 + $0x1a2] sm:$0xff] }
 0x53d   : > { %7104 = vmatprep.mubr.msk.bf16.mxu1 %vm476_vm1, %v5101_v20 }
 0x544   : > { %7105 = vmatmul.mubr.msk.bf16.gmra.mrb[24].mxu1 %vm476_vm1, %v8687_v54  ;;  %v9018_v54 = vld [vmem:[%s9175_s4] ss:$0 sm:$0xff] }
 0x545   : > { %7108 = vmatprep.mubr.msk.bf16.mxu1 %vm476_vm1, %v8685_v53  ;;  %v5398_v53 = vpack.c.bf16 %v5382_v17, %v5381_v60  ;;  %v5698_v17 = vld [vmem:[%s8129_s6 + $0x70] sm:$0xff] }
 0x54c   : > { %7109 = vmatmul.mubr.msk.bf16.gmra.mrb[28].mxu1 %vm476_vm1, %v5104_v57 }
 0x54d   : > { %7114 = vmatprep.mubr.msk.bf16.mxu1 %vm476_vm1, %v8764_v62 }
 0x554   : > { %7115 = vmatmul.mubr.msk.bf16.vlgmr.msra.gmra.mrb[0].mxu1 %vm476_vm1, %v8771_v56  ;;  %v5686_v56 = vld [vmem:[%s8129_s6 + $0x10] sm:$0xff] }
 0x555   : > { %7118 = vmatprep.mubr.msk.bf16.mxu1 %vm476_vm1, %v8773_v33 }
 0x55c   : > { %7119 = vmatmul.mubr.msk.bf16.gmra.mrb[4].mxu1 %vm476_vm1, %v8779_v3 }
 0x55d   : > { %7122 = vmatprep.mubr.msk.bf16.mxu1 %vm476_vm1, %v8781_v10  ;;  %v5684_v10 = vld [vmem:[%s8129_s6] sm:$0xff] }
 0x564   : > { %7123 = vmatmul.mubr.msk.bf16.gmra.mrb[8].mxu1 %vm476_vm1, %v8787_v44 }
 0x565   : > { %7126 = vmatprep.mubr.msk.bf16.mxu1 %vm476_vm1, %v8789_v46 }
 0x56c   : > { %7127 = vmatmul.mubr.msk.bf16.gmra.mrb[12].mxu1 %vm476_vm1, %v8795_v16  ;;  %v5687_v16 = vld [vmem:[%s8129_s6 + $0x18] sm:$0xff] }
 0x56d   : > { %7130 = vmatprep.mubr.msk.bf16.mxu1 %vm476_vm1, %v8797_v26 }
 0x574   : > { %7131 = vmatmul.mubr.msk.bf16.gmra.mrb[16].mxu1 %vm476_vm1, %v8803_v27 }
 0x575   : > { %7134 = vmatprep.mubr.msk.bf16.mxu1 %vm476_vm1, %v8805_v31 }
 0x57c   : > { %7135 = vmatmul.mubr.msk.bf16.gmra.mrb[20].mxu1 %vm476_vm1, %v8811_v43  ;;  %v5685_v43 = vld [vmem:[%s8129_s6 + $0x8] sm:$0xff] }
 0x57d   : > { %7138 = vmatprep.mubr.msk.bf16.mxu1 %vm476_vm1, %v8813_v40 }
 0x584   : > { %7139 = vmatmul.mubr.msk.bf16.gmra.mrb[24].mxu1 %vm476_vm1, %v8819_v36 }
 0x585   : > { %7142 = vmatprep.mubr.msk.bf16.mxu1 %vm476_vm1, %v8925_v11 }
 0x58c   : > { %7143 = vmatmul.mubr.msk.bf16.gmra.mrb[28].mxu1 %vm476_vm1, %v5398_v53 }
 0x627   : > { %v7116_v62 = vpop.f32.mrb[0].mxu1 }
 0x628   : > { %v5654_v33 = vadd.f32 %v7116_v62, %v9018_v54  ;;  %v5486_v3 = vpop.f32.mrb[1].mxu1 }
 0x629   : > { %v5652_v44 = vadd.f32 %v9018_v54, %v5486_v3  ;;  %v7117_v46 = vpop.f32.mrb[2].mxu1 }
 0x62a   : > { %v5718_v26 = vadd.f32 %v5686_v56, %v5654_v33  ;;  %v5655_v27 = vadd.f32 %v7117_v46, %v9018_v54  ;;  %v5489_v31 = vpop.f32.mrb[3].mxu1  ;;  %v5696_v56 = vld [vmem:[%s8129_s6 + $0x60] sm:$0xff] }
 0x62b   : > { %v5716_v40 = vadd.f32 %v5684_v10, %v5652_v44  ;;  %v5653_v36 = vadd.f32 %v9018_v54, %v5489_v31  ;;  %v5699_v10 = vld [vmem:[%s8129_s6 + $0x78] sm:$0xff] }
 0x62c   : > { %v5750_v8 = vmax.f32 %v5718_v26, 0.0  ;;  %v5719_v13 = vadd.f32 %v5687_v16, %v5655_v27  ;;  %v5697_v26 = vld [vmem:[%s8129_s6 + $0x68] sm:$0xff] }
 0x62d   : > { %v5748_v55 = vmax.f32 %v5716_v40, 0.0  ;;  %v5717_v9 = vadd.f32 %v5685_v43, %v5653_v36 }
 0x62e   : > { %5782 = vst [vmem:[%s9030_s11 + $0x10] sm:$0xff] %v5750_v8  ;;  %v5751_v11 = vmax.f32 %v5719_v13, 0.0 }
 0x62f   : > { %5780 = vst [vmem:[%s9030_s11] sm:$0xff] %v5748_v55  ;;  %v5749_v18 = vmax.f32 %v5717_v9, 0.0  ;;  %v7120_v49 = vpop.f32.mrb[4].mxu1 }
 0x630   : > { %5783 = vst [vmem:[%s9030_s11 + $0x18] sm:$0xff] %v5751_v11  ;;  %v5658_v61 = vadd.f32 %v7120_v49, %v9018_v54  ;;  %v5502_v0 = vpop.f32.mrb[5].mxu1  ;;  %v5702_v11 = vld [vmem:[%s8129_s6 + $0x90] sm:$0xff] }
 0x631   : > { %5781 = vst [vmem:[%s9030_s11 + $0x8] sm:$0xff] %v5749_v18  ;;  %v5656_v7 = vadd.f32 %v9018_v54, %v5502_v0  ;;  %v7121_v4 = vpop.f32.mrb[6].mxu1 }
 0x632   : > { %v5722_v6 = vadd.f32 %v5690_v51, %v5658_v61  ;;  %v5659_v12 = vadd.f32 %v7121_v4, %v9018_v54  ;;  %v5505_v22 = vpop.f32.mrb[7].mxu1  ;;  %v5700_v51 = vld [vmem:[%s8129_s6 + $0x80] sm:$0xff] }
 0x633   : > { %v5720_v42 = vadd.f32 %v5688_v41, %v5656_v7  ;;  %v5657_v14 = vadd.f32 %v9018_v54, %v5505_v22  ;;  %v5703_v41 = vld [vmem:[%s8129_s6 + $0x98] sm:$0xff] }
 0x634   : > { %v5754_v39 = vmax.f32 %v5722_v6, 0.0  ;;  %v5723_v52 = vadd.f32 %v5691_v34, %v5659_v12  ;;  %v5701_v6 = vld [vmem:[%s8129_s6 + $0x88] sm:$0xff] }
 0x635   : > { %v5752_v2 = vmax.f32 %v5720_v42, 0.0  ;;  %v5721_v24 = vadd.f32 %v5689_v28, %v5657_v14 }
 0x636   : > { %5786 = vst [vmem:[%s9030_s11 + $0x30] sm:$0xff] %v5754_v39  ;;  %v5755_v30 = vmax.f32 %v5723_v52, 0.0 }
 0x637   : > { %5784 = vst [vmem:[%s9030_s11 + $0x20] sm:$0xff] %v5752_v2  ;;  %v5753_v45 = vmax.f32 %v5721_v24, 0.0  ;;  %v7124_v47 = vpop.f32.mrb[8].mxu1 }
 0x638   : > { %5787 = vst [vmem:[%s9030_s11 + $0x38] sm:$0xff] %v5755_v30  ;;  %v5662_v21 = vadd.f32 %v7124_v47, %v9018_v54  ;;  %v5518_v58 = vpop.f32.mrb[9].mxu1  ;;  %v5706_v30 = vld [vmem:[%s8129_s6 + $0xb0] sm:$0xff] }
 0x639   : > { %5785 = vst [vmem:[%s9030_s11 + $0x28] sm:$0xff] %v5753_v45  ;;  %v5660_v1 = vadd.f32 %v9018_v54, %v5518_v58  ;;  %v7125_v15 = vpop.f32.mrb[10].mxu1 }
 0x63a   : > { %v5726_v59 = vadd.f32 %v5694_v25, %v5662_v21  ;;  %v5663_v35 = vadd.f32 %v7125_v15, %v9018_v54  ;;  %v5521_v37 = vpop.f32.mrb[11].mxu1  ;;  %v5704_v25 = vld [vmem:[%s8129_s6 + $0xa0] sm:$0xff] }
 0x63b   : > { %v5724_v29 = vadd.f32 %v5692_v63, %v5660_v1  ;;  %v5661_v38 = vadd.f32 %v9018_v54, %v5521_v37  ;;  %v5707_v63 = vld [vmem:[%s8129_s6 + $0xb8] sm:$0xff] }
 0x63c   : > { %v5758_v48 = vmax.f32 %v5726_v59, 0.0  ;;  %v5727_v19 = vadd.f32 %v5695_v32, %v5663_v35  ;;  %v5705_v59 = vld [vmem:[%s8129_s6 + $0xa8] sm:$0xff] }
 0x63d   : > { %v5756_v20 = vmax.f32 %v5724_v29, 0.0  ;;  %v5725_v50 = vadd.f32 %v5693_v23, %v5661_v38 }
 0x63e   : > { %5790 = vst [vmem:[%s9030_s11 + $0x50] sm:$0xff] %v5758_v48  ;;  %v5759_v5 = vmax.f32 %v5727_v19, 0.0 }
 0x63f   : > { %5788 = vst [vmem:[%s9030_s11 + $0x40] sm:$0xff] %v5756_v20  ;;  %v5757_v57 = vmax.f32 %v5725_v50, 0.0  ;;  %v7128_v60 = vpop.f32.mrb[12].mxu1 }
 0x640   : > { %5791 = vst [vmem:[%s9030_s11 + $0x58] sm:$0xff] %v5759_v5  ;;  %v5666_v53 = vadd.f32 %v7128_v60, %v9018_v54  ;;  %v5534_v62 = vpop.f32.mrb[13].mxu1  ;;  %v5710_v5 = vld [vmem:[%s8129_s6 + $0xd0] sm:$0xff] }
 0x641   : > { %5789 = vst [vmem:[%s9030_s11 + $0x48] sm:$0xff] %v5757_v57  ;;  %v5664_v33 = vadd.f32 %v9018_v54, %v5534_v62  ;;  %v7129_v3 = vpop.f32.mrb[14].mxu1 }
 0x642   : > { %v5730_v44 = vadd.f32 %v5698_v17, %v5666_v53  ;;  %v5667_v46 = vadd.f32 %v7129_v3, %v9018_v54  ;;  %v5537_v16 = vpop.f32.mrb[15].mxu1  ;;  %v5708_v17 = vld [vmem:[%s8129_s6 + $0xc0] sm:$0xff] }
 0x643   : > { %v5728_v27 = vadd.f32 %v5696_v56, %v5664_v33  ;;  %v5665_v31 = vadd.f32 %v9018_v54, %v5537_v16  ;;  %v5711_v56 = vld [vmem:[%s8129_s6 + $0xd8] sm:$0xff] }
 0x644   : > { %v5762_v43 = vmax.f32 %v5730_v44, 0.0  ;;  %v5731_v40 = vadd.f32 %v5699_v10, %v5667_v46  ;;  %v5709_v44 = vld [vmem:[%s8129_s6 + $0xc8] sm:$0xff] }
 0x645   : > { %v5760_v36 = vmax.f32 %v5728_v27, 0.0  ;;  %v5729_v8 = vadd.f32 %v5697_v26, %v5665_v31 }
 0x646   : > { %5794 = vst [vmem:[%s9030_s11 + $0x70] sm:$0xff] %v5762_v43  ;;  %v5763_v13 = vmax.f32 %v5731_v40, 0.0 }
 0x647   : > { %5792 = vst [vmem:[%s9030_s11 + $0x60] sm:$0xff] %v5760_v36  ;;  %v5761_v55 = vmax.f32 %v5729_v8, 0.0  ;;  %v7132_v9 = vpop.f32.mrb[16].mxu1 }
 0x648   : > { %5795 = vst [vmem:[%s9030_s11 + $0x78] sm:$0xff] %v5763_v13  ;;  %v5670_v18 = vadd.f32 %v7132_v9, %v9018_v54  ;;  %v5550_v49 = vpop.f32.mrb[17].mxu1  ;;  %v5714_v13 = vld [vmem:[%s8129_s6 + $0xf0] sm:$0xff] }
 0x649   : > { %5793 = vst [vmem:[%s9030_s11 + $0x68] sm:$0xff] %v5761_v55  ;;  %v5668_v61 = vadd.f32 %v9018_v54, %v5550_v49  ;;  %v7133_v0 = vpop.f32.mrb[18].mxu1 }
 0x64a   : > { %v5734_v7 = vadd.f32 %v5702_v11, %v5670_v18  ;;  %v5671_v4 = vadd.f32 %v7133_v0, %v9018_v54  ;;  %v5553_v34 = vpop.f32.mrb[19].mxu1  ;;  %v5712_v11 = vld [vmem:[%s8129_s6 + $0xe0] sm:$0xff] }
 0x64b   : > { %v5732_v12 = vadd.f32 %v5700_v51, %v5668_v61  ;;  %v5669_v22 = vadd.f32 %v9018_v54, %v5553_v34  ;;  %v5715_v51 = vld [vmem:[%s8129_s6 + $0xf8] sm:$0xff] }
 0x64c   : > { %v5766_v28 = vmax.f32 %v5734_v7, 0.0  ;;  %v5735_v42 = vadd.f32 %v5703_v41, %v5671_v4  ;;  %v5713_v7 = vld [vmem:[%s8129_s6 + $0xe8] sm:$0xff] }
 0x64d   : > { %v5764_v14 = vmax.f32 %v5732_v12, 0.0  ;;  %v5733_v39 = vadd.f32 %v5701_v6, %v5669_v22 }
 0x64e   : > { %5798 = vst [vmem:[%s9030_s11 + $0x90] sm:$0xff] %v5766_v28  ;;  %v5767_v52 = vmax.f32 %v5735_v42, 0.0 }
 0x64f   : > { %5796 = vst [vmem:[%s9030_s11 + $0x80] sm:$0xff] %v5764_v14  ;;  %v5765_v2 = vmax.f32 %v5733_v39, 0.0  ;;  %v7136_v24 = vpop.f32.mrb[20].mxu1 }
 0x650   : > { %5799 = vst [vmem:[%s9030_s11 + $0x98] sm:$0xff] %v5767_v52  ;;  %v5674_v45 = vadd.f32 %v7136_v24, %v9018_v54  ;;  %v5566_v47 = vpop.f32.mrb[21].mxu1 }
 0x651   : > { %5797 = vst [vmem:[%s9030_s11 + $0x88] sm:$0xff] %v5765_v2  ;;  %v5672_v21 = vadd.f32 %v9018_v54, %v5566_v47  ;;  %v7137_v58 = vpop.f32.mrb[22].mxu1 }
 0x652   : > { %v5738_v1 = vadd.f32 %v5706_v30, %v5674_v45  ;;  %v5675_v15 = vadd.f32 %v7137_v58, %v9018_v54  ;;  %v5569_v32 = vpop.f32.mrb[23].mxu1 }
 0x653   : > { %v5736_v35 = vadd.f32 %v5704_v25, %v5672_v21  ;;  %v5673_v37 = vadd.f32 %v9018_v54, %v5569_v32 }
 0x654   : > { %v5770_v23 = vmax.f32 %v5738_v1, 0.0  ;;  %v5739_v29 = vadd.f32 %v5707_v63, %v5675_v15 }
 0x655   : > { %v5768_v38 = vmax.f32 %v5736_v35, 0.0  ;;  %v5737_v48 = vadd.f32 %v5705_v59, %v5673_v37 }
 0x656   : > { %5802 = vst [vmem:[%s9030_s11 + $0xb0] sm:$0xff] %v5770_v23  ;;  %v5771_v19 = vmax.f32 %v5739_v29, 0.0 }
 0x657   : > { %5800 = vst [vmem:[%s9030_s11 + $0xa0] sm:$0xff] %v5768_v38  ;;  %v5769_v20 = vmax.f32 %v5737_v48, 0.0  ;;  %v7140_v50 = vpop.f32.mrb[24].mxu1 }
 0x658   : > { %5803 = vst [vmem:[%s9030_s11 + $0xb8] sm:$0xff] %v5771_v19  ;;  %v5678_v57 = vadd.f32 %v7140_v50, %v9018_v54  ;;  %v5582_v60 = vpop.f32.mrb[25].mxu1 }
 0x659   : > { %5801 = vst [vmem:[%s9030_s11 + $0xa8] sm:$0xff] %v5769_v20  ;;  %v5676_v53 = vadd.f32 %v9018_v54, %v5582_v60  ;;  %v7141_v62 = vpop.f32.mrb[26].mxu1 }
 0x65a   : > { %v5742_v33 = vadd.f32 %v5710_v5, %v5678_v57  ;;  %v5679_v3 = vadd.f32 %v7141_v62, %v9018_v54  ;;  %v5585_v10 = vpop.f32.mrb[27].mxu1 }
 0x65b   : > { %v5740_v46 = vadd.f32 %v5708_v17, %v5676_v53  ;;  %v5677_v16 = vadd.f32 %v9018_v54, %v5585_v10 }
 0x65c   : > { %v5774_v26 = vmax.f32 %v5742_v33, 0.0  ;;  %v5743_v27 = vadd.f32 %v5711_v56, %v5679_v3 }
 0x65d   : > { %v5772_v31 = vmax.f32 %v5740_v46, 0.0  ;;  %v5741_v43 = vadd.f32 %v5709_v44, %v5677_v16 }
 0x65e   : > { %5806 = vst [vmem:[%s9030_s11 + $0xd0] sm:$0xff] %v5774_v26  ;;  %v5775_v40 = vmax.f32 %v5743_v27, 0.0 }
 0x65f   : > { %5804 = vst [vmem:[%s9030_s11 + $0xc0] sm:$0xff] %v5772_v31  ;;  %v5773_v36 = vmax.f32 %v5741_v43, 0.0  ;;  %v7144_v8 = vpop.f32.mrb[28].mxu1 }
 0x660   : > { %5807 = vst [vmem:[%s9030_s11 + $0xd8] sm:$0xff] %v5775_v40  ;;  %v5682_v55 = vadd.f32 %v7144_v8, %v9018_v54  ;;  %v5598_v9 = vpop.f32.mrb[29].mxu1 }
 0x661   : > { %5805 = vst [vmem:[%s9030_s11 + $0xc8] sm:$0xff] %v5773_v36  ;;  %v5680_v18 = vadd.f32 %v9018_v54, %v5598_v9  ;;  %v7145_v49 = vpop.f32.mrb[30].mxu1 }
 0x662   : > { %v5746_v61 = vadd.f32 %v5714_v13, %v5682_v55  ;;  %v5683_v0 = vadd.f32 %v7145_v49, %v9018_v54  ;;  %v5601_v41 = vpop.f32.mrb[31].mxu1 }
 0x663   : > { %v5744_v4 = vadd.f32 %v5712_v11, %v5680_v18  ;;  %v5681_v34 = vadd.f32 %v9018_v54, %v5601_v41 }
 0x664   : > { %v5778_v6 = vmax.f32 %v5746_v61, 0.0  ;;  %v5747_v12 = vadd.f32 %v5715_v51, %v5683_v0 }
 0x665   : > { %v5776_v22 = vmax.f32 %v5744_v4, 0.0  ;;  %v5745_v28 = vadd.f32 %v5713_v7, %v5681_v34 }
 0x666   : > { %5810 = vst [vmem:[%s9030_s11 + $0xf0] sm:$0xff] %v5778_v6  ;;  %v5779_v42 = vmax.f32 %v5747_v12, 0.0 }
 0x667   : > { %5808 = vst [vmem:[%s9030_s11 + $0xe0] sm:$0xff] %v5776_v22  ;;  %v5777_v54 = vmax.f32 %v5745_v28, 0.0 }
 0x668   : > { %5811 = vst [vmem:[%s9030_s11 + $0xf8] sm:$0xff] %v5779_v42 }
 0x669   : > { %5809 = vst [vmem:[%s9030_s11 + $0xe8] sm:$0xff] %v5777_v54 }
 0x66a   : > { %7850 = shalt.err (!%p7847_p2)
}
 0x66b   : > { %s7851_s6 = scalar_lea.hbm %s9122_s9, 4096  ;;  %s7855_s8 = scalar_lea.hbm %s9176_s5, 8192 }
 0x66c   : > { %p7852_p13 = scmp.ne.s32.totalorder %s9122_s9, %s7851_s6  ;;  %p7856_p4 = scmp.lt.u32.totalorder %s9122_s9, %s9176_s5 }
 0x66d   : > { %p7857_p5 = scmp.lt.u32.totalorder %s7855_s8, %s7851_s6  ;;  %p7859_p11 = scmp.lt.u32.totalorder %s7851_s6, %s9122_s9 }
 0x66e   : > { %p7853_p6 = pnand %p7852_p13, %p9190_p0 }
 0x66f   : > { %p7858_p8 = por %p7857_p5, %p7856_p4 }
 0x670   : > { %p7854_p10 = pneg %p7853_p6 }
 0x671   : > { %p7860_p1 = por %p7859_p11, %p7858_p8 }
 0x673   : > { %p7861_p3 = pnand %p7860_p1, %p7854_p10 }
 0x675   : > { %7864 = shalt.err (!%p7861_p3)
}
 0x676   : > { %s7919_s28 = smov 128   ;;  %s7920_s15 = smov 8  }
 0x677   : > { %7686 = dma.vmem_to_hbm [thread:$0]  (%p9190_p0), %s9124_s30, 4096, %s9122_s9, %s5813_s22, %s7919_s28, %s7919_s28, %s7920_s15  }
 0x678 PF: > { %s5841_s16 = sand.u32 1, %s7895_s18   ;;  %p9191_p7 = scmp.ne.s32.totalorder %s9181_s25, 0 }
 0x679   : > { %p9192_p9 = scmp.ge.s32.totalorder %s7907_s21, 2  ;;  %s5842_s12 = scalar_lea.sflag [#allocation5], %s5841_s16 }
 0x67b   : > { %p7700_p12 = pnand %p9192_p9, %p9191_p7 }
 0x67d   : > { %7890 = dma.done.wait (!%p7700_p12), %s5842_s12, 4096  }
 0x67e   : > { %7892 = vsyncadd (!%p7700_p12), %s5842_s12, 4294963200  ;;  %p19_p2 = scmp.ge.s32.totalorder %s8061_s14, 4   ;;  %s9193_s18 = smov %s7899_s19 }
 0x67f   : > { %s9194_s19 = smov %s7903_s20  ;;  %s9195_s20 = smov %s8077_s27 }
 0x680   : > { %s9196_s21 = smov %s8061_s14  ;;  %21 = sbr.rel (!%p19_p2) target bundleno = 6 (0x6), region = 112 }
 0x687   :  { %5847 = vsyncpa [#allocation4], 1 }
 0x688   :  { %5849 = vsyncpa [#allocation4 + $0x1], 1 }
 0x689   :  { %5850 = vsyncpa [#allocation7], 1 }
 0x68a   :  { %5851 = vsyncpa [#allocation5], 1 }
 0x68b   :  { %5853 = vsyncpa [#allocation5 + $0x1], 1 }

</bundles_post_ra>
